<compile_context>
chip_gen: v5e
topology: v5e:2x2
jax: 0.10.0
libtpu: 0.0.40
codegen_flags: <defaults>
</compile_context>

<pallas_src>
import functools
import math

import jax
import jax.numpy as jnp
from jax.experimental import pallas as pl
from jax.experimental.pallas import tpu as pltpu


def _round_up(x, m):
    return ((x + m - 1) // m) * m


# ----------------------------------------------------------------------------
# Kernel 1: batch-invariant label branch (weights only)
# ----------------------------------------------------------------------------

def _cont_label_kernel(
    fe0_w, fe0_b, fe1_w, fe1_b, fe2_w, fe2_b, fe_mv_w, fe_mv_b,
    lr1_w, lr1_b, lr2_w, lr2_b, fe0_wt,
    fe_mv_o, sl_emb_o, sl_out_o,
    *, latent_dim, scale_coeff):
    L = latent_dim
    f32 = jnp.float32

    def dot(a, b):
        return jnp.dot(a, b, preferred_element_type=f32)

    relu = lambda v: jnp.maximum(v, 0.0)
    lrelu = lambda v: jnp.where(v > 0.0, v, 0.01 * v)   # PyTorch default slope

    def l2norm(v):                                      # F.normalize(x, dim=1)
        ss = jnp.sum(v * v, axis=1, keepdims=True)
        return v * jax.lax.rsqrt(jnp.maximum(ss, 1e-24))

    # label_encode(eye(label_dim)):  eye @ W == W  (fe0_w stored as [in, out])
    h0 = relu(fe0_w[...] + fe0_b[...])                               # [Ld, E]
    h1 = relu(dot(h0, fe1_w[...]) + fe1_b[...])                      # [Ld, 512]
    h2 = relu(dot(h1, fe2_w[...]) + fe2_b[...])                      # [Ld, 256]
    fe_mv = (dot(h2, fe_mv_w[...]) + fe_mv_b[...]) * scale_coeff     # [Ld, 2L]
    fe_mv_o[...] = fe_mv
    fe_mu = fe_mv[:, :L]

    # single_label_emb = normalize(label_recon(fe_mu))
    r1 = relu(dot(fe_mu, lr1_w[...]) + lr1_b[...])
    sl = l2norm(lrelu(dot(r1, lr2_w[...]) + lr2_b[...]))             # [Ld, E]
    sl_emb_o[...] = sl
    # single_label_out = single_label_emb @ fe0.weight  (pre-transposed input)
    sl_out_o[...] = dot(sl, fe0_wt[...])                             # [Ld, Ld]


# ----------------------------------------------------------------------------
# Kernel 2: batch-gridded branch
# ----------------------------------------------------------------------------

def _cont_batch_kernel(
    # gridded data
    label_ref, feat_ref, eps1_ref, eps2_ref,
    # constant (block index (0,0)) inputs
    fe_mu_ref,
    fx1_w, fx1_b, fx2_w, fx2_b, fx3_w, fx3_b, fx_mv_w, fx_mv_b,
    fd1_wf, fd1_wz, fd1_b, fd2_w, fd2_b,
    rc1_w, rc1_b, rc2_w, rc2_b, rc3_w, rc3_b,
    fe0_wt,
    # outputs
    fx_mv_o, d2_o, recon_o, proj_o,
    *, latent_dim, tile_b, scale_coeff):
    L = latent_dim
    TB = tile_b
    f32, bf16 = jnp.float32, jnp.bfloat16

    def dotb(a, w_ref):          # bf16 operands, f32 accumulation (MXU native)
        return jnp.dot(a.astype(bf16), w_ref[...], preferred_element_type=f32)

    def dotf(a, w_ref):          # f32 matmul for the precision-sensitive head
        return jnp.dot(a, w_ref[...], preferred_element_type=f32)

    relu = lambda v: jnp.maximum(v, 0.0)
    lrelu = lambda v: jnp.where(v > 0.0, v, 0.01 * v)

    def l2norm(v):
        ss = jnp.sum(v * v, axis=1, keepdims=True)
        return v * jax.lax.rsqrt(jnp.maximum(ss, 1e-24))

    x = feat_ref[...]                                                # [TB, F]
    lab = label_ref[...]                                             # [TB, Ld]

    # ---------- feature encoder ----------
    fh1 = relu(dotb(x, fx1_w) + fx1_b[...])
    fh2 = relu(dotb(fh1, fx2_w) + fx2_b[...])
    fh3 = relu(dotb(fh2, fx3_w) + fx3_b[...])
    fx_mv = (dotf(fh3, fx_mv_w) + fx_mv_b[...]) * scale_coeff        # [TB, 2L]
    fx_mv_o[...] = fx_mv
    fx_mu = fx_mv[:, :L]
    fx_logvar = fx_mv[:, L:]

    # ---------- reparameterize (two samples) ----------
    std = jnp.exp(0.5 * fx_logvar)
    z1 = fx_mu + eps1_ref[...] * std
    z2 = fx_mu + eps2_ref[...] * std

    # ---------- gmvae z for the label branch ----------
    z_lab = dotf(lab, fe_mu_ref) / (jnp.sum(lab, axis=1, keepdims=True) + 1e-7)

    # ---------- shared decoder fd_x1/fd_x2, 3 passes stacked on M ----------
    zs = jnp.concatenate([z_lab, z1, z2], axis=0)                    # [3TB, L]
    dz = dotb(zs, fd1_wz)                                            # [3TB, 512]
    xwb = dotb(x, fd1_wf) + fd1_b[...]                               # [TB, 512]
    d1 = relu((dz.reshape(3, TB, 512) + xwb[None]).reshape(3 * TB, 512))
    d2 = l2norm(lrelu(dotb(d1, fd2_w) + fd2_b[...]))                 # [3TB, E]
    E = d2.shape[1]
    d2_o[...] = d2.reshape(3, TB, E)

    # ---------- feat_recon = recon(z1) ----------
    r1 = relu(dotb(z1, rc1_w) + rc1_b[...])
    r2 = relu(dotb(r1, rc2_w) + rc2_b[...])
    recon_o[...] = dotb(r2, rc3_w) + rc3_b[...]                      # [TB, F]

    # ---------- projections onto fe0.weight (pre-transposed, no XLU) ----------
    proj = dotb(d2, fe0_wt)                                          # [3TB, Ld]
    Ld = proj.shape[1]
    proj_o[...] = proj.reshape(3, TB, Ld)


# ----------------------------------------------------------------------------
# Parameter init (mimics PyTorch nn.Linear default U(-1/sqrt(in), 1/sqrt(in)))
# Weights stored as [in_features, out_features] so y = x @ W + b.
# ----------------------------------------------------------------------------

def _init_linear(key, fan_in, fan_out):
    kw, kb = jax.random.split(key)
    bound = 1.0 / math.sqrt(fan_in)
    w = jax.random.uniform(kw, (fan_in, fan_out), jnp.float32, -bound, bound)
    b = jax.random.uniform(kb, (fan_out,), jnp.float32, -bound, bound)
    return w, b


def init_params(key, feature_dim, label_dim, latent_dim, emb_size):
    names_dims = [
        ("fx1", feature_dim, 256), ("fx2", 256, 512), ("fx3", 512, 256),
        ("fx_mu", 256, latent_dim), ("fx_logvar", 256, latent_dim),
        ("fd_x1", feature_dim + latent_dim, 512), ("fd_x2", 512, emb_size),
        ("recon1", latent_dim, 512), ("recon2", 512, 512), ("recon3", 512, feature_dim),
        ("lrec1", latent_dim, 512), ("lrec2", 512, emb_size),
        ("fe0", label_dim, emb_size), ("fe1", emb_size, 512), ("fe2", 512, 256),
        ("fe_mu", 256, latent_dim), ("fe_logvar", 256, latent_dim),
    ]
    keys = jax.random.split(key, len(names_dims))
    params = {}
    for k, (name, fi, fo) in zip(keys, names_dims):
        params[name] = _init_linear(k, fi, fo)
    # feat_mp_mu / bias exist in __init__ but are unused by forward(); omitted.
    return params


# ----------------------------------------------------------------------------
# Forward wrapper (mirrors Cont.forward with reg='gmvae', eval-mode dropout)
# ----------------------------------------------------------------------------

def cont_forward(params, label, feature, key, scale_coeff=1.0):
    B, label_dim = label.shape
    feat_dim = feature.shape[1]
    L = params["fe_mu"][0].shape[1]
    emb_size = params["fe0"][0].shape[1]
    f32, bf16 = jnp.float32, jnp.bfloat16

    # batch tiling: sublane-aligned tile, capped so VMEM stays well under the
    # v7x (64 MiB physical) / v5e (small scoped default) limits.
    TB = min(128, _round_up(B, 8))
    Bp = _round_up(B, TB)
    grid = (Bp // TB,)

    def pad_rows(a):
        return a if Bp == B else jnp.pad(a, ((0, Bp - B), (0, 0)))

    k1, k2 = jax.random.split(key)
    eps1 = jax.random.normal(k1, (B, L), f32)
    eps2 = jax.random.normal(k2, (B, L), f32)
    label_p, feat_p, eps1_p, eps2_p = map(pad_rows, (label, feature, eps1, eps2))

    def b2(b):                                   # bias as [1, N] row
        return b.reshape(1, -1)

    # fused mu/logvar heads -> one lane-dense matmul each (scale_coeff scales
    # both mu and logvar in the reference, so the fusion is exact)
    fe_mv_w = jnp.concatenate([params["fe_mu"][0], params["fe_logvar"][0]], axis=1)
    fe_mv_b = jnp.concatenate([params["fe_mu"][1], params["fe_logvar"][1]])
    fx_mv_w = jnp.concatenate([params["fx_mu"][0], params["fx_logvar"][0]], axis=1)
    fx_mv_b = jnp.concatenate([params["fx_mu"][1], params["fx_logvar"][1]])

    # split-K fd_x1 weights (avoids concatenating [feature | z] activations)
    fd1_wf = params["fd_x1"][0][:feat_dim]
    fd1_wz = params["fd_x1"][0][feat_dim:]

    fe0_wt_f32 = params["fe0"][0].T              # torch fe0.weight layout [E, Ld]

    vmem = pl.BlockSpec(memory_space=pltpu.MemorySpace.VMEM)

    # --------------------- kernel 1: label branch (hoisted) ---------------------
    label_branch = pl.pallas_call(
        functools.partial(_cont_label_kernel, latent_dim=L, scale_coeff=scale_coeff),
        out_shape=(
            jax.ShapeDtypeStruct((label_dim, 2 * L), f32),       # fe_mu|fe_logvar
            jax.ShapeDtypeStruct((label_dim, emb_size), f32),    # single_label_emb
            jax.ShapeDtypeStruct((label_dim, label_dim), f32),   # single_label_out
        ),
        in_specs=[vmem] * 13,
        out_specs=(vmem, vmem, vmem),
        compiler_params=pltpu.CompilerParams(vmem_limit_bytes=32 * 1024 * 1024),
    )
    fe_mv, single_label_emb, single_label_out = label_branch(
        params["fe0"][0], b2(params["fe0"][1]),
        params["fe1"][0], b2(params["fe1"][1]),
        params["fe2"][0], b2(params["fe2"][1]),
        fe_mv_w, b2(fe_mv_b),
        params["lrec1"][0], b2(params["lrec1"][1]),
        params["lrec2"][0], b2(params["lrec2"][1]),
        fe0_wt_f32,
    )
    fe_mu = fe_mv[:, :L]
    fe_logvar = fe_mv[:, L:]

    # --------------------- kernel 2: batch-gridded branch ---------------------
    data_in = [label_p, feat_p, eps1_p, eps2_p]
    data_specs = [
        pl.BlockSpec((TB, label_dim), lambda i: (i, 0)),
        pl.BlockSpec((TB, feat_dim), lambda i: (i, 0)),
        pl.BlockSpec((TB, L), lambda i: (i, 0)),
        pl.BlockSpec((TB, L), lambda i: (i, 0)),
    ]

    consts = [
        fe_mu,
        params["fx1"][0].astype(bf16), b2(params["fx1"][1]),
        params["fx2"][0].astype(bf16), b2(params["fx2"][1]),
        params["fx3"][0].astype(bf16), b2(params["fx3"][1]),
        fx_mv_w, b2(fx_mv_b),
        fd1_wf.astype(bf16), fd1_wz.astype(bf16), b2(params["fd_x1"][1]),
        params["fd_x2"][0].astype(bf16), b2(params["fd_x2"][1]),
        params["recon1"][0].astype(bf16), b2(params["recon1"][1]),
        params["recon2"][0].astype(bf16), b2(params["recon2"][1]),
        params["recon3"][0].astype(bf16), b2(params["recon3"][1]),
        fe0_wt_f32.astype(bf16),
    ]
    const_specs = [pl.BlockSpec(a.shape, lambda i: (0, 0)) for a in consts]

    out_shapes = (
        jax.ShapeDtypeStruct((Bp, 2 * L), f32),            # fx_mu|fx_logvar
        jax.ShapeDtypeStruct((3, Bp, emb_size), f32),      # [label_emb; feat_emb; feat_emb2]
        jax.ShapeDtypeStruct((Bp, feat_dim), f32),         # feat_recon
        jax.ShapeDtypeStruct((3, Bp, label_dim), f32),     # [label_out; feat_out; feat_out2]
    )
    out_specs = (
        pl.BlockSpec((TB, 2 * L), lambda i: (i, 0)),
        pl.BlockSpec((3, TB, emb_size), lambda i: (0, i, 0)),
        pl.BlockSpec((TB, feat_dim), lambda i: (i, 0)),
        pl.BlockSpec((3, TB, label_dim), lambda i: (0, i, 0)),
    )

    fx_mv, d2_slab, feat_recon_p, proj_slab = pl.pallas_call(
        functools.partial(_cont_batch_kernel, latent_dim=L, tile_b=TB,
                          scale_coeff=scale_coeff),
        out_shape=out_shapes,
        grid=grid,
        in_specs=data_specs + const_specs,
        out_specs=out_specs,
        compiler_params=pltpu.CompilerParams(
            dimension_semantics=("parallel",),
            vmem_limit_bytes=48 * 1024 * 1024),
    )(*data_in, *consts)

    sl = lambda a: a[:B]   # drop batch padding
    return {
        "fe_mu": fe_mu, "fe_logvar": fe_logvar,
        "label_emb": sl(d2_slab[0]), "single_label_emb": single_label_emb,
        "fx_mu": sl(fx_mv[:, :L]), "fx_logvar": sl(fx_mv[:, L:]),
        "feat_emb": sl(d2_slab[1]), "feat_emb2": sl(d2_slab[2]),
        "feat_recon": sl(feat_recon_p),
        "embs": fe0_wt_f32,                       # torch layout [emb_size, label_dim]
        "label_out": sl(proj_slab[0]), "single_label_out": single_label_out,
        "feat_out": sl(proj_slab[1]), "feat_out2": sl(proj_slab[2]),
        "feat": feature,
    }


# ----------------------------------------------------------------------------
# Demo
# ----------------------------------------------------------------------------

if __name__ == "__main__":
    feature_dim, label_dim, latent_dim, emb_size = 32, 8, 64, 256  # small for test
    batch = 4

    root = jax.random.PRNGKey(0)
    k_params, k_feat, k_label, k_noise = jax.random.split(root, 4)

    params = init_params(k_params, feature_dim, label_dim, latent_dim, emb_size)
    feature = jax.random.normal(k_feat, (batch, feature_dim), jnp.float32)
    label = (jax.random.uniform(k_label, (batch, label_dim)) > 0.5).astype(jnp.float32)

    fwd = jax.jit(cont_forward, static_argnames=("scale_coeff",))
    out = fwd(params, label, feature, k_noise, scale_coeff=1.0)
    jax.block_until_ready(out)

    # basic sanity checks on shapes
    assert out["label_out"].shape == (batch, label_dim)
    assert out["feat_emb"].shape == (batch, emb_size)
    assert out["feat_emb2"].shape == (batch, emb_size)
    assert out["feat_recon"].shape == (batch, feature_dim)
    assert out["single_label_out"].shape == (label_dim, label_dim)
    assert out["fe_mu"].shape == (label_dim, latent_dim)
    assert out["fx_mu"].shape == (batch, latent_dim)
    assert out["label_emb"].shape == (batch, emb_size)
    assert out["embs"].shape == (emb_size, label_dim)

    print("KERNEL_OK")
</pallas_src>

<mosaic_0001>
module attributes {stable_mosaic.version = 11 : i64} {
  func.func @_cont_label_kernel(%arg0: memref<8x256xf32, #tpu.memory_space<vmem>>, %arg1: memref<1x256xf32, #tpu.memory_space<vmem>>, %arg2: memref<256x512xf32, #tpu.memory_space<vmem>>, %arg3: memref<1x512xf32, #tpu.memory_space<vmem>>, %arg4: memref<512x256xf32, #tpu.memory_space<vmem>>, %arg5: memref<1x256xf32, #tpu.memory_space<vmem>>, %arg6: memref<256x128xf32, #tpu.memory_space<vmem>>, %arg7: memref<1x128xf32, #tpu.memory_space<vmem>>, %arg8: memref<64x512xf32, #tpu.memory_space<vmem>>, %arg9: memref<1x512xf32, #tpu.memory_space<vmem>>, %arg10: memref<512x256xf32, #tpu.memory_space<vmem>>, %arg11: memref<1x256xf32, #tpu.memory_space<vmem>>, %arg12: memref<256x8xf32, #tpu.memory_space<vmem>>, %arg13: memref<8x128xf32, #tpu.memory_space<vmem>>, %arg14: memref<8x256xf32, #tpu.memory_space<vmem>>, %arg15: memref<8x8xf32, #tpu.memory_space<vmem>>) attributes {dimension_semantics = [], scalar_prefetch = 0 : i64, scratch_operands = 0 : i64, tpu.core_type = #tpu.core_type<tc>} {
    %c0 = arith.constant 0 : index
    %c0_0 = arith.constant 0 : index
    %0 = vector.load %arg0[%c0, %c0_0] : memref<8x256xf32, #tpu.memory_space<vmem>>, vector<8x256xf32>
    %c0_1 = arith.constant 0 : index
    %c0_2 = arith.constant 0 : index
    %1 = vector.load %arg1[%c0_1, %c0_2] : memref<1x256xf32, #tpu.memory_space<vmem>>, vector<1x256xf32>
    %2 = vector.broadcast %1 : vector<1x256xf32> to vector<8x256xf32>
    %3 = arith.addf %0, %2 : vector<8x256xf32>
    %cst = arith.constant 0.000000e+00 : f32
    %4 = vector.broadcast %cst : f32 to vector<8x256xf32>
    %5 = arith.maximumf %3, %4 : vector<8x256xf32>
    %c0_3 = arith.constant 0 : index
    %c0_4 = arith.constant 0 : index
    %6 = vector.load %arg2[%c0_3, %c0_4] : memref<256x512xf32, #tpu.memory_space<vmem>>, vector<256x512xf32>
    %cst_5 = arith.constant dense<0.000000e+00> : vector<8x512xf32>
    %7 = tpu.matmul %5, %6, %cst_5 {dimension_numbers = #tpu.dot_dimension_numbers<[1], [0], [0], [1], [0, 0, 1, 1], [], []>} : vector<8x256xf32>, vector<256x512xf32>, vector<8x512xf32> -> vector<8x512xf32>
    %c0_6 = arith.constant 0 : index
    %c0_7 = arith.constant 0 : index
    %8 = vector.load %arg3[%c0_6, %c0_7] : memref<1x512xf32, #tpu.memory_space<vmem>>, vector<1x512xf32>
    %9 = vector.broadcast %8 : vector<1x512xf32> to vector<8x512xf32>
    %10 = arith.addf %7, %9 : vector<8x512xf32>
    %cst_8 = arith.constant 0.000000e+00 : f32
    %11 = vector.broadcast %cst_8 : f32 to vector<8x512xf32>
    %12 = arith.maximumf %10, %11 : vector<8x512xf32>
    %c0_9 = arith.constant 0 : index
    %c0_10 = arith.constant 0 : index
    %13 = vector.load %arg4[%c0_9, %c0_10] : memref<512x256xf32, #tpu.memory_space<vmem>>, vector<512x256xf32>
    %cst_11 = arith.constant dense<0.000000e+00> : vector<8x256xf32>
    %14 = tpu.matmul %12, %13, %cst_11 {dimension_numbers = #tpu.dot_dimension_numbers<[1], [0], [0], [1], [0, 0, 1, 1], [], []>} : vector<8x512xf32>, vector<512x256xf32>, vector<8x256xf32> -> vector<8x256xf32>
    %c0_12 = arith.constant 0 : index
    %c0_13 = arith.constant 0 : index
    %15 = vector.load %arg5[%c0_12, %c0_13] : memref<1x256xf32, #tpu.memory_space<vmem>>, vector<1x256xf32>
    %16 = vector.broadcast %15 : vector<1x256xf32> to vector<8x256xf32>
    %17 = arith.addf %14, %16 : vector<8x256xf32>
    %cst_14 = arith.constant 0.000000e+00 : f32
    %18 = vector.broadcast %cst_14 : f32 to vector<8x256xf32>
    %19 = arith.maximumf %17, %18 : vector<8x256xf32>
    %c0_15 = arith.constant 0 : index
    %c0_16 = arith.constant 0 : index
    %20 = vector.load %arg6[%c0_15, %c0_16] : memref<256x128xf32, #tpu.memory_space<vmem>>, vector<256x128xf32>
    %cst_17 = arith.constant dense<0.000000e+00> : vector<8x128xf32>
    %21 = tpu.matmul %19, %20, %cst_17 {dimension_numbers = #tpu.dot_dimension_numbers<[1], [0], [0], [1], [0, 0, 1, 1], [], []>} : vector<8x256xf32>, vector<256x128xf32>, vector<8x128xf32> -> vector<8x128xf32>
    %c0_18 = arith.constant 0 : index
    %c0_19 = arith.constant 0 : index
    %22 = vector.load %arg7[%c0_18, %c0_19] : memref<1x128xf32, #tpu.memory_space<vmem>>, vector<1x128xf32>
    %23 = vector.broadcast %22 : vector<1x128xf32> to vector<8x128xf32>
    %24 = arith.addf %21, %23 : vector<8x128xf32>
    %cst_20 = arith.constant 1.000000e+00 : f32
    %25 = vector.broadcast %cst_20 : f32 to vector<8x128xf32>
    %26 = arith.mulf %24, %25 : vector<8x128xf32>
    %c0_21 = arith.constant 0 : index
    %c0_22 = arith.constant 0 : index
    %27 = vector.load %arg13[%c0_21, %c0_22] : memref<8x128xf32, #tpu.memory_space<vmem>>, vector<8x128xf32>
    tpu.vector_store %arg13[%c0_21, %c0_22], %26 {strides = array<i32>} : memref<8x128xf32, #tpu.memory_space<vmem>>, vector<8x128xf32>,
    %28 = vector.extract_strided_slice %26 {offsets = [0, 0], sizes = [8, 64], strides = [1, 1]} : vector<8x128xf32> to vector<8x64xf32>
    %c0_23 = arith.constant 0 : index
    %c0_24 = arith.constant 0 : index
    %29 = vector.load %arg8[%c0_23, %c0_24] : memref<64x512xf32, #tpu.memory_space<vmem>>, vector<64x512xf32>
    %cst_25 = arith.constant dense<0.000000e+00> : vector<8x512xf32>
    %30 = tpu.matmul %28, %29, %cst_25 {dimension_numbers = #tpu.dot_dimension_numbers<[1], [0], [0], [1], [0, 0, 1, 1], [], []>} : vector<8x64xf32>, vector<64x512xf32>, vector<8x512xf32> -> vector<8x512xf32>
    %c0_26 = arith.constant 0 : index
    %c0_27 = arith.constant 0 : index
    %31 = vector.load %arg9[%c0_26, %c0_27] : memref<1x512xf32, #tpu.memory_space<vmem>>, vector<1x512xf32>
    %32 = vector.broadcast %31 : vector<1x512xf32> to vector<8x512xf32>
    %33 = arith.addf %30, %32 : vector<8x512xf32>
    %cst_28 = arith.constant 0.000000e+00 : f32
    %34 = vector.broadcast %cst_28 : f32 to vector<8x512xf32>
    %35 = arith.maximumf %33, %34 : vector<8x512xf32>
    %c0_29 = arith.constant 0 : index
    %c0_30 = arith.constant 0 : index
    %36 = vector.load %arg10[%c0_29, %c0_30] : memref<512x256xf32, #tpu.memory_space<vmem>>, vector<512x256xf32>
    %cst_31 = arith.constant dense<0.000000e+00> : vector<8x256xf32>
    %37 = tpu.matmul %35, %36, %cst_31 {dimension_numbers = #tpu.dot_dimension_numbers<[1], [0], [0], [1], [0, 0, 1, 1], [], []>} : vector<8x512xf32>, vector<512x256xf32>, vector<8x256xf32> -> vector<8x256xf32>
    %c0_32 = arith.constant 0 : index
    %c0_33 = arith.constant 0 : index
    %38 = vector.load %arg11[%c0_32, %c0_33] : memref<1x256xf32, #tpu.memory_space<vmem>>, vector<1x256xf32>
    %39 = vector.broadcast %38 : vector<1x256xf32> to vector<8x256xf32>
    %40 = arith.addf %37, %39 : vector<8x256xf32>
    %cst_34 = arith.constant 0.000000e+00 : f32
    %41 = vector.broadcast %cst_34 : f32 to vector<8x256xf32>
    %42 = arith.cmpf ogt, %40, %41 : vector<8x256xf32>
    %cst_35 = arith.constant 0.00999999977 : f32
    %43 = vector.broadcast %cst_35 : f32 to vector<8x256xf32>
    %44 = arith.mulf %43, %40 : vector<8x256xf32>
    %45 = arith.select %42, %40, %44 : vector<8x256xi1>, vector<8x256xf32>
    %46 = arith.mulf %45, %45 : vector<8x256xf32>
    %cst_36 = arith.constant dense<0.000000e+00> : vector<8xf32>
    %47 = vector.multi_reduction <add>, %46, %cst_36 [1] : vector<8x256xf32> to vector<8xf32>
    %48 = vector.shape_cast %47 : vector<8xf32> to vector<8x1xf32>
    %cst_37 = arith.constant 1.000000e-24 : f32
    %49 = vector.broadcast %cst_37 : f32 to vector<8x1xf32>
    %50 = arith.maximumf %48, %49 : vector<8x1xf32>
    %51 = math.rsqrt %50 : vector<8x1xf32>
    %52 = vector.broadcast %51 : vector<8x1xf32> to vector<8x256xf32>
    %53 = arith.mulf %45, %52 : vector<8x256xf32>
    %c0_38 = arith.constant 0 : index
    %c0_39 = arith.constant 0 : index
    %54 = vector.load %arg14[%c0_38, %c0_39] : memref<8x256xf32, #tpu.memory_space<vmem>>, vector<8x256xf32>
    tpu.vector_store %arg14[%c0_38, %c0_39], %53 {strides = array<i32>} : memref<8x256xf32, #tpu.memory_space<vmem>>, vector<8x256xf32>,
    %c0_40 = arith.constant 0 : index
    %c0_41 = arith.constant 0 : index
    %55 = vector.load %arg12[%c0_40, %c0_41] : memref<256x8xf32, #tpu.memory_space<vmem>>, vector<256x8xf32>
    %cst_42 = arith.constant dense<0.000000e+00> : vector<8x8xf32>
    %56 = tpu.matmul %53, %55, %cst_42 {dimension_numbers = #tpu.dot_dimension_numbers<[1], [0], [0], [1], [0, 0, 1, 1], [], []>} : vector<8x256xf32>, vector<256x8xf32>, vector<8x8xf32> -> vector<8x8xf32>
    %c0_43 = arith.constant 0 : index
    %c0_44 = arith.constant 0 : index
    %57 = vector.load %arg15[%c0_43, %c0_44] : memref<8x8xf32, #tpu.memory_space<vmem>>, vector<8x8xf32>
    tpu.vector_store %arg15[%c0_43, %c0_44], %56 {strides = array<i32>} : memref<8x8xf32, #tpu.memory_space<vmem>>, vector<8x8xf32>,
    return
  }
}

module attributes {stable_mosaic.version = 11 : i64} {
  func.func @_cont_batch_kernel(%arg0: i32, %arg1: memref<8x8xf32, #tpu.memory_space<vmem>>, %arg2: memref<8x32xf32, #tpu.memory_space<vmem>>, %arg3: memref<8x64xf32, #tpu.memory_space<vmem>>, %arg4: memref<8x64xf32, #tpu.memory_space<vmem>>, %arg5: memref<8x64xf32, #tpu.memory_space<vmem>>, %arg6: memref<32x256xbf16, #tpu.memory_space<vmem>>, %arg7: memref<1x256xf32, #tpu.memory_space<vmem>>, %arg8: memref<256x512xbf16, #tpu.memory_space<vmem>>, %arg9: memref<1x512xf32, #tpu.memory_space<vmem>>, %arg10: memref<512x256xbf16, #tpu.memory_space<vmem>>, %arg11: memref<1x256xf32, #tpu.memory_space<vmem>>, %arg12: memref<256x128xf32, #tpu.memory_space<vmem>>, %arg13: memref<1x128xf32, #tpu.memory_space<vmem>>, %arg14: memref<32x512xbf16, #tpu.memory_space<vmem>>, %arg15: memref<64x512xbf16, #tpu.memory_space<vmem>>, %arg16: memref<1x512xf32, #tpu.memory_space<vmem>>, %arg17: memref<512x256xbf16, #tpu.memory_space<vmem>>, %arg18: memref<1x256xf32, #tpu.memory_space<vmem>>, %arg19: memref<64x512xbf16, #tpu.memory_space<vmem>>, %arg20: memref<1x512xf32, #tpu.memory_space<vmem>>, %arg21: memref<512x512xbf16, #tpu.memory_space<vmem>>, %arg22: memref<1x512xf32, #tpu.memory_space<vmem>>, %arg23: memref<512x32xbf16, #tpu.memory_space<vmem>>, %arg24: memref<1x32xf32, #tpu.memory_space<vmem>>, %arg25: memref<256x8xbf16, #tpu.memory_space<vmem>>, %arg26: memref<8x128xf32, #tpu.memory_space<vmem>>, %arg27: memref<3x8x256xf32, #tpu.memory_space<vmem>>, %arg28: memref<8x32xf32, #tpu.memory_space<vmem>>, %arg29: memref<3x8x8xf32, #tpu.memory_space<vmem>>) attributes {dimension_semantics = [#tpu.dimension_semantics<parallel>], iteration_bounds = array<i64: 1>, scalar_prefetch = 0 : i64, scratch_operands = 0 : i64, tpu.core_type = #tpu.core_type<tc>, window_params = [{transform_indices = @transform_0, window_bounds = array<i64: 8, 8>}, {transform_indices = @transform_1, window_bounds = array<i64: 8, 32>}, {transform_indices = @transform_2, window_bounds = array<i64: 8, 64>}, {transform_indices = @transform_3, window_bounds = array<i64: 8, 64>}, {pipeline_mode = #tpu.pipeline_mode<synchronous>, transform_indices = @transform_4, window_bounds = array<i64: 8, 64>}, {pipeline_mode = #tpu.pipeline_mode<synchronous>, transform_indices = @transform_5, window_bounds = array<i64: 32, 256>}, {pipeline_mode = #tpu.pipeline_mode<synchronous>, transform_indices = @transform_6, window_bounds = array<i64: 1, 256>}, {pipeline_mode = #tpu.pipeline_mode<synchronous>, transform_indices = @transform_7, window_bounds = array<i64: 256, 512>}, {pipeline_mode = #tpu.pipeline_mode<synchronous>, transform_indices = @transform_8, window_bounds = array<i64: 1, 512>}, {pipeline_mode = #tpu.pipeline_mode<synchronous>, transform_indices = @transform_9, window_bounds = array<i64: 512, 256>}, {pipeline_mode = #tpu.pipeline_mode<synchronous>, transform_indices = @transform_10, window_bounds = array<i64: 1, 256>}, {pipeline_mode = #tpu.pipeline_mode<synchronous>, transform_indices = @transform_11, window_bounds = array<i64: 256, 128>}, {pipeline_mode = #tpu.pipeline_mode<synchronous>, transform_indices = @transform_12, window_bounds = array<i64: 1, 128>}, {pipeline_mode = #tpu.pipeline_mode<synchronous>, transform_indices = @transform_13, window_bounds = array<i64: 32, 512>}, {pipeline_mode = #tpu.pipeline_mode<synchronous>, transform_indices = @transform_14, window_bounds = array<i64: 64, 512>}, {pipeline_mode = #tpu.pipeline_mode<synchronous>, transform_indices = @transform_15, window_bounds = array<i64: 1, 512>}, {pipeline_mode = #tpu.pipeline_mode<synchronous>, transform_indices = @transform_16, window_bounds = array<i64: 512, 256>}, {pipeline_mode = #tpu.pipeline_mode<synchronous>, transform_indices = @transform_17, window_bounds = array<i64: 1, 256>}, {pipeline_mode = #tpu.pipeline_mode<synchronous>, transform_indices = @transform_18, window_bounds = array<i64: 64, 512>}, {pipeline_mode = #tpu.pipeline_mode<synchronous>, transform_indices = @transform_19, window_bounds = array<i64: 1, 512>}, {pipeline_mode = #tpu.pipeline_mode<synchronous>, transform_indices = @transform_20, window_bounds = array<i64: 512, 512>}, {pipeline_mode = #tpu.pipeline_mode<synchronous>, transform_indices = @transform_21, window_bounds = array<i64: 1, 512>}, {pipeline_mode = #tpu.pipeline_mode<synchronous>, transform_indices = @transform_22, window_bounds = array<i64: 512, 32>}, {pipeline_mode = #tpu.pipeline_mode<synchronous>, transform_indices = @transform_23, window_bounds = array<i64: 1, 32>}, {pipeline_mode = #tpu.pipeline_mode<synchronous>, transform_indices = @transform_24, window_bounds = array<i64: 256, 8>}, {transform_indices = @transform_25, window_bounds = array<i64: 8, 128>}, {transform_indices = @transform_26, window_bounds = array<i64: 3, 8, 256>}, {transform_indices = @transform_27, window_bounds = array<i64: 8, 32>}, {transform_indices = @transform_28, window_bounds = array<i64: 3, 8, 8>}]} {
    %c0 = arith.constant 0 : index
    %c0_0 = arith.constant 0 : index
    %0 = vector.load %arg2[%c0, %c0_0] : memref<8x32xf32, #tpu.memory_space<vmem>>, vector<8x32xf32>
    %c0_1 = arith.constant 0 : index
    %c0_2 = arith.constant 0 : index
    %1 = vector.load %arg1[%c0_1, %c0_2] : memref<8x8xf32, #tpu.memory_space<vmem>>, vector<8x8xf32>
    %2 = arith.truncf %0 : vector<8x32xf32> to vector<8x32xbf16>
    %c0_3 = arith.constant 0 : index
    %c0_4 = arith.constant 0 : index
    %3 = vector.load %arg6[%c0_3, %c0_4] : memref<32x256xbf16, #tpu.memory_space<vmem>>, vector<32x256xbf16>
    %cst = arith.constant dense<0.000000e+00> : vector<8x256xf32>
    %4 = tpu.matmul %2, %3, %cst {dimension_numbers = #tpu.dot_dimension_numbers<[1], [0], [0], [1], [0, 0, 1, 1], [], []>} : vector<8x32xbf16>, vector<32x256xbf16>, vector<8x256xf32> -> vector<8x256xf32>
    %c0_5 = arith.constant 0 : index
    %c0_6 = arith.constant 0 : index
    %5 = vector.load %arg7[%c0_5, %c0_6] : memref<1x256xf32, #tpu.memory_space<vmem>>, vector<1x256xf32>
    %6 = vector.broadcast %5 : vector<1x256xf32> to vector<8x256xf32>
    %7 = arith.addf %4, %6 : vector<8x256xf32>
    %cst_7 = arith.constant 0.000000e+00 : f32
    %8 = vector.broadcast %cst_7 : f32 to vector<8x256xf32>
    %9 = arith.maximumf %7, %8 : vector<8x256xf32>
    %10 = arith.truncf %9 : vector<8x256xf32> to vector<8x256xbf16>
    %c0_8 = arith.constant 0 : index
    %c0_9 = arith.constant 0 : index
    %11 = vector.load %arg8[%c0_8, %c0_9] : memref<256x512xbf16, #tpu.memory_space<vmem>>, vector<256x512xbf16>
    %cst_10 = arith.constant dense<0.000000e+00> : vector<8x512xf32>
    %12 = tpu.matmul %10, %11, %cst_10 {dimension_numbers = #tpu.dot_dimension_numbers<[1], [0], [0], [1], [0, 0, 1, 1], [], []>} : vector<8x256xbf16>, vector<256x512xbf16>, vector<8x512xf32> -> vector<8x512xf32>
    %c0_11 = arith.constant 0 : index
    %c0_12 = arith.constant 0 : index
    %13 = vector.load %arg9[%c0_11, %c0_12] : memref<1x512xf32, #tpu.memory_space<vmem>>, vector<1x512xf32>
    %14 = vector.broadcast %13 : vector<1x512xf32> to vector<8x512xf32>
    %15 = arith.addf %12, %14 : vector<8x512xf32>
    %cst_13 = arith.constant 0.000000e+00 : f32
    %16 = vector.broadcast %cst_13 : f32 to vector<8x512xf32>
    %17 = arith.maximumf %15, %16 : vector<8x512xf32>
    %18 = arith.truncf %17 : vector<8x512xf32> to vector<8x512xbf16>
    %c0_14 = arith.constant 0 : index
    %c0_15 = arith.constant 0 : index
    %19 = vector.load %arg10[%c0_14, %c0_15] : memref<512x256xbf16, #tpu.memory_space<vmem>>, vector<512x256xbf16>
    %cst_16 = arith.constant dense<0.000000e+00> : vector<8x256xf32>
    %20 = tpu.matmul %18, %19, %cst_16 {dimension_numbers = #tpu.dot_dimension_numbers<[1], [0], [0], [1], [0, 0, 1, 1], [], []>} : vector<8x512xbf16>, vector<512x256xbf16>, vector<8x256xf32> -> vector<8x256xf32>
    %c0_17 = arith.constant 0 : index
    %c0_18 = arith.constant 0 : index
    %21 = vector.load %arg11[%c0_17, %c0_18] : memref<1x256xf32, #tpu.memory_space<vmem>>, vector<1x256xf32>
    %22 = vector.broadcast %21 : vector<1x256xf32> to vector<8x256xf32>
    %23 = arith.addf %20, %22 : vector<8x256xf32>
    %cst_19 = arith.constant 0.000000e+00 : f32
    %24 = vector.broadcast %cst_19 : f32 to vector<8x256xf32>
    %25 = arith.maximumf %23, %24 : vector<8x256xf32>
    %c0_20 = arith.constant 0 : index
    %c0_21 = arith.constant 0 : index
    %26 = vector.load %arg12[%c0_20, %c0_21] : memref<256x128xf32, #tpu.memory_space<vmem>>, vector<256x128xf32>
    %cst_22 = arith.constant dense<0.000000e+00> : vector<8x128xf32>
    %27 = tpu.matmul %25, %26, %cst_22 {dimension_numbers = #tpu.dot_dimension_numbers<[1], [0], [0], [1], [0, 0, 1, 1], [], []>} : vector<8x256xf32>, vector<256x128xf32>, vector<8x128xf32> -> vector<8x128xf32>
    %c0_23 = arith.constant 0 : index
    %c0_24 = arith.constant 0 : index
    %28 = vector.load %arg13[%c0_23, %c0_24] : memref<1x128xf32, #tpu.memory_space<vmem>>, vector<1x128xf32>
    %29 = vector.broadcast %28 : vector<1x128xf32> to vector<8x128xf32>
    %30 = arith.addf %27, %29 : vector<8x128xf32>
    %cst_25 = arith.constant 1.000000e+00 : f32
    %31 = vector.broadcast %cst_25 : f32 to vector<8x128xf32>
    %32 = arith.mulf %30, %31 : vector<8x128xf32>
    %c0_26 = arith.constant 0 : index
    %c0_27 = arith.constant 0 : index
    %33 = vector.load %arg26[%c0_26, %c0_27] : memref<8x128xf32, #tpu.memory_space<vmem>>, vector<8x128xf32>
    tpu.vector_store %arg26[%c0_26, %c0_27], %32 {strides = array<i32>} : memref<8x128xf32, #tpu.memory_space<vmem>>, vector<8x128xf32>,
    %34 = vector.extract_strided_slice %32 {offsets = [0, 0], sizes = [8, 64], strides = [1, 1]} : vector<8x128xf32> to vector<8x64xf32>
    %35 = vector.extract_strided_slice %32 {offsets = [0, 64], sizes = [8, 64], strides = [1, 1]} : vector<8x128xf32> to vector<8x64xf32>
    %cst_28 = arith.constant 5.000000e-01 : f32
    %36 = vector.broadcast %cst_28 : f32 to vector<8x64xf32>
    %37 = arith.mulf %36, %35 : vector<8x64xf32>
    %38 = math.exp %37 : vector<8x64xf32>
    %c0_29 = arith.constant 0 : index
    %c0_30 = arith.constant 0 : index
    %39 = vector.load %arg3[%c0_29, %c0_30] : memref<8x64xf32, #tpu.memory_space<vmem>>, vector<8x64xf32>
    %40 = arith.mulf %39, %38 : vector<8x64xf32>
    %41 = arith.addf %34, %40 : vector<8x64xf32>
    %c0_31 = arith.constant 0 : index
    %c0_32 = arith.constant 0 : index
    %42 = vector.load %arg4[%c0_31, %c0_32] : memref<8x64xf32, #tpu.memory_space<vmem>>, vector<8x64xf32>
    %43 = arith.mulf %42, %38 : vector<8x64xf32>
    %44 = arith.addf %34, %43 : vector<8x64xf32>
    %c0_33 = arith.constant 0 : index
    %c0_34 = arith.constant 0 : index
    %45 = vector.load %arg5[%c0_33, %c0_34] : memref<8x64xf32, #tpu.memory_space<vmem>>, vector<8x64xf32>
    %cst_35 = arith.constant dense<0.000000e+00> : vector<8x64xf32>
    %46 = tpu.matmul %1, %45, %cst_35 {dimension_numbers = #tpu.dot_dimension_numbers<[1], [0], [0], [1], [0, 0, 1, 1], [], []>} : vector<8x8xf32>, vector<8x64xf32>, vector<8x64xf32> -> vector<8x64xf32>
    %cst_36 = arith.constant dense<0.000000e+00> : vector<8xf32>
    %47 = vector.multi_reduction <add>, %1, %cst_36 [1] : vector<8x8xf32> to vector<8xf32>
    %48 = vector.shape_cast %47 : vector<8xf32> to vector<8x1xf32>
    %cst_37 = arith.constant 1.000000e-07 : f32
    %49 = vector.broadcast %cst_37 : f32 to vector<8x1xf32>
    %50 = arith.addf %48, %49 : vector<8x1xf32>
    %51 = vector.broadcast %50 : vector<8x1xf32> to vector<8x64xf32>
    %52 = arith.divf %46, %51 : vector<8x64xf32>
    %53 = tpu.concatenate %52, %41, %44 in 0 : vector<8x64xf32>, vector<8x64xf32>, vector<8x64xf32> -> vector<24x64xf32>
    %54 = arith.truncf %53 : vector<24x64xf32> to vector<24x64xbf16>
    %c0_38 = arith.constant 0 : index
    %c0_39 = arith.constant 0 : index
    %55 = vector.load %arg15[%c0_38, %c0_39] : memref<64x512xbf16, #tpu.memory_space<vmem>>, vector<64x512xbf16>
    %cst_40 = arith.constant dense<0.000000e+00> : vector<24x512xf32>
    %56 = tpu.matmul %54, %55, %cst_40 {dimension_numbers = #tpu.dot_dimension_numbers<[1], [0], [0], [1], [0, 0, 1, 1], [], []>} : vector<24x64xbf16>, vector<64x512xbf16>, vector<24x512xf32> -> vector<24x512xf32>
    %57 = arith.truncf %0 : vector<8x32xf32> to vector<8x32xbf16>
    %c0_41 = arith.constant 0 : index
    %c0_42 = arith.constant 0 : index
    %58 = vector.load %arg14[%c0_41, %c0_42] : memref<32x512xbf16, #tpu.memory_space<vmem>>, vector<32x512xbf16>
    %cst_43 = arith.constant dense<0.000000e+00> : vector<8x512xf32>
    %59 = tpu.matmul %57, %58, %cst_43 {dimension_numbers = #tpu.dot_dimension_numbers<[1], [0], [0], [1], [0, 0, 1, 1], [], []>} : vector<8x32xbf16>, vector<32x512xbf16>, vector<8x512xf32> -> vector<8x512xf32>
    %c0_44 = arith.constant 0 : index
    %c0_45 = arith.constant 0 : index
    %60 = vector.load %arg16[%c0_44, %c0_45] : memref<1x512xf32, #tpu.memory_space<vmem>>, vector<1x512xf32>
    %61 = vector.broadcast %60 : vector<1x512xf32> to vector<8x512xf32>
    %62 = arith.addf %59, %61 : vector<8x512xf32>
    %63 = vector.shape_cast %56 : vector<24x512xf32> to vector<3x8x512xf32>
    %64 = vector.shape_cast %62 : vector<8x512xf32> to vector<1x8x512xf32>
    %65 = vector.broadcast %64 : vector<1x8x512xf32> to vector<3x8x512xf32>
    %66 = arith.addf %63, %65 : vector<3x8x512xf32>
    %67 = vector.shape_cast %66 : vector<3x8x512xf32> to vector<24x512xf32>
    %cst_46 = arith.constant 0.000000e+00 : f32
    %68 = vector.broadcast %cst_46 : f32 to vector<24x512xf32>
    %69 = arith.maximumf %67, %68 : vector<24x512xf32>
    %70 = arith.truncf %69 : vector<24x512xf32> to vector<24x512xbf16>
    %c0_47 = arith.constant 0 : index
    %c0_48 = arith.constant 0 : index
    %71 = vector.load %arg17[%c0_47, %c0_48] : memref<512x256xbf16, #tpu.memory_space<vmem>>, vector<512x256xbf16>
    %cst_49 = arith.constant dense<0.000000e+00> : vector<24x256xf32>
    %72 = tpu.matmul %70, %71, %cst_49 {dimension_numbers = #tpu.dot_dimension_numbers<[1], [0], [0], [1], [0, 0, 1, 1], [], []>} : vector<24x512xbf16>, vector<512x256xbf16>, vector<24x256xf32> -> vector<24x256xf32>
    %c0_50 = arith.constant 0 : index
    %c0_51 = arith.constant 0 : index
    %73 = vector.load %arg18[%c0_50, %c0_51] : memref<1x256xf32, #tpu.memory_space<vmem>>, vector<1x256xf32>
    %74 = vector.broadcast %73 : vector<1x256xf32> to vector<24x256xf32>
    %75 = arith.addf %72, %74 : vector<24x256xf32>
    %cst_52 = arith.constant 0.000000e+00 : f32
    %76 = vector.broadcast %cst_52 : f32 to vector<24x256xf32>
    %77 = arith.cmpf ogt, %75, %76 : vector<24x256xf32>
    %cst_53 = arith.constant 0.00999999977 : f32
    %78 = vector.broadcast %cst_53 : f32 to vector<24x256xf32>
    %79 = arith.mulf %78, %75 : vector<24x256xf32>
    %80 = arith.select %77, %75, %79 : vector<24x256xi1>, vector<24x256xf32>
    %81 = arith.mulf %80, %80 : vector<24x256xf32>
    %cst_54 = arith.constant dense<0.000000e+00> : vector<24xf32>
    %82 = vector.multi_reduction <add>, %81, %cst_54 [1] : vector<24x256xf32> to vector<24xf32>
    %83 = vector.shape_cast %82 : vector<24xf32> to vector<24x1xf32>
    %cst_55 = arith.constant 1.000000e-24 : f32
    %84 = vector.broadcast %cst_55 : f32 to vector<24x1xf32>
    %85 = arith.maximumf %83, %84 : vector<24x1xf32>
    %86 = math.rsqrt %85 : vector<24x1xf32>
    %87 = vector.broadcast %86 : vector<24x1xf32> to vector<24x256xf32>
    %88 = arith.mulf %80, %87 : vector<24x256xf32>
    %89 = vector.shape_cast %88 : vector<24x256xf32> to vector<3x8x256xf32>
    %c0_56 = arith.constant 0 : index
    %c0_57 = arith.constant 0 : index
    %c0_58 = arith.constant 0 : index
    %90 = vector.load %arg27[%c0_56, %c0_57, %c0_58] : memref<3x8x256xf32, #tpu.memory_space<vmem>>, vector<3x8x256xf32>
    tpu.vector_store %arg27[%c0_56, %c0_57, %c0_58], %89 {strides = array<i32>} : memref<3x8x256xf32, #tpu.memory_space<vmem>>, vector<3x8x256xf32>,
    %91 = arith.truncf %41 : vector<8x64xf32> to vector<8x64xbf16>
    %c0_59 = arith.constant 0 : index
    %c0_60 = arith.constant 0 : index
    %92 = vector.load %arg19[%c0_59, %c0_60] : memref<64x512xbf16, #tpu.memory_space<vmem>>, vector<64x512xbf16>
    %cst_61 = arith.constant dense<0.000000e+00> : vector<8x512xf32>
    %93 = tpu.matmul %91, %92, %cst_61 {dimension_numbers = #tpu.dot_dimension_numbers<[1], [0], [0], [1], [0, 0, 1, 1], [], []>} : vector<8x64xbf16>, vector<64x512xbf16>, vector<8x512xf32> -> vector<8x512xf32>
    %c0_62 = arith.constant 0 : index
    %c0_63 = arith.constant 0 : index
    %94 = vector.load %arg20[%c0_62, %c0_63] : memref<1x512xf32, #tpu.memory_space<vmem>>, vector<1x512xf32>
    %95 = vector.broadcast %94 : vector<1x512xf32> to vector<8x512xf32>
    %96 = arith.addf %93, %95 : vector<8x512xf32>
    %cst_64 = arith.constant 0.000000e+00 : f32
    %97 = vector.broadcast %cst_64 : f32 to vector<8x512xf32>
    %98 = arith.maximumf %96, %97 : vector<8x512xf32>
    %99 = arith.truncf %98 : vector<8x512xf32> to vector<8x512xbf16>
    %c0_65 = arith.constant 0 : index
    %c0_66 = arith.constant 0 : index
    %100 = vector.load %arg21[%c0_65, %c0_66] : memref<512x512xbf16, #tpu.memory_space<vmem>>, vector<512x512xbf16>
    %cst_67 = arith.constant dense<0.000000e+00> : vector<8x512xf32>
    %101 = tpu.matmul %99, %100, %cst_67 {dimension_numbers = #tpu.dot_dimension_numbers<[1], [0], [0], [1], [0, 0, 1, 1], [], []>} : vector<8x512xbf16>, vector<512x512xbf16>, vector<8x512xf32> -> vector<8x512xf32>
    %c0_68 = arith.constant 0 : index
    %c0_69 = arith.constant 0 : index
    %102 = vector.load %arg22[%c0_68, %c0_69] : memref<1x512xf32, #tpu.memory_space<vmem>>, vector<1x512xf32>
    %103 = vector.broadcast %102 : vector<1x512xf32> to vector<8x512xf32>
    %104 = arith.addf %101, %103 : vector<8x512xf32>
    %cst_70 = arith.constant 0.000000e+00 : f32
    %105 = vector.broadcast %cst_70 : f32 to vector<8x512xf32>
    %106 = arith.maximumf %104, %105 : vector<8x512xf32>
    %107 = arith.truncf %106 : vector<8x512xf32> to vector<8x512xbf16>
    %c0_71 = arith.constant 0 : index
    %c0_72 = arith.constant 0 : index
    %108 = vector.load %arg23[%c0_71, %c0_72] : memref<512x32xbf16, #tpu.memory_space<vmem>>, vector<512x32xbf16>
    %cst_73 = arith.constant dense<0.000000e+00> : vector<8x32xf32>
    %109 = tpu.matmul %107, %108, %cst_73 {dimension_numbers = #tpu.dot_dimension_numbers<[1], [0], [0], [1], [0, 0, 1, 1], [], []>} : vector<8x512xbf16>, vector<512x32xbf16>, vector<8x32xf32> -> vector<8x32xf32>
    %c0_74 = arith.constant 0 : index
    %c0_75 = arith.constant 0 : index
    %110 = vector.load %arg24[%c0_74, %c0_75] : memref<1x32xf32, #tpu.memory_space<vmem>>, vector<1x32xf32>
    %111 = vector.broadcast %110 : vector<1x32xf32> to vector<8x32xf32>
    %112 = arith.addf %109, %111 : vector<8x32xf32>
    %c0_76 = arith.constant 0 : index
    %c0_77 = arith.constant 0 : index
    %113 = vector.load %arg28[%c0_76, %c0_77] : memref<8x32xf32, #tpu.memory_space<vmem>>, vector<8x32xf32>
    tpu.vector_store %arg28[%c0_76, %c0_77], %112 {strides = array<i32>} : memref<8x32xf32, #tpu.memory_space<vmem>>, vector<8x32xf32>,
    %114 = arith.truncf %88 : vector<24x256xf32> to vector<24x256xbf16>
    %c0_78 = arith.constant 0 : index
    %c0_79 = arith.constant 0 : index
    %115 = vector.load %arg25[%c0_78, %c0_79] : memref<256x8xbf16, #tpu.memory_space<vmem>>, vector<256x8xbf16>
    %cst_80 = arith.constant dense<0.000000e+00> : vector<24x8xf32>
    %116 = tpu.matmul %114, %115, %cst_80 {dimension_numbers = #tpu.dot_dimension_numbers<[1], [0], [0], [1], [0, 0, 1, 1], [], []>} : vector<24x256xbf16>, vector<256x8xbf16>, vector<24x8xf32> -> vector<24x8xf32>
    %117 = vector.shape_cast %116 : vector<24x8xf32> to vector<3x8x8xf32>
    %c0_81 = arith.constant 0 : index
    %c0_82 = arith.constant 0 : index
    %c0_83 = arith.constant 0 : index
    %118 = vector.load %arg29[%c0_81, %c0_82, %c0_83] : memref<3x8x8xf32, #tpu.memory_space<vmem>>, vector<3x8x8xf32>
    tpu.vector_store %arg29[%c0_81, %c0_82, %c0_83], %117 {strides = array<i32>} : memref<3x8x8xf32, #tpu.memory_space<vmem>>, vector<3x8x8xf32>,
    return
  }
  func.func @transform_0(%arg0: i32) -> (i32, i32) {
    %c0_i32 = arith.constant 0 : i32
    %c0_i32_0 = arith.constant 0 : i32
    return %arg0, %c0_i32 : i32, i32
  }
  func.func @transform_1(%arg0: i32) -> (i32, i32) {
    %c0_i32 = arith.constant 0 : i32
    %c0_i32_0 = arith.constant 0 : i32
    return %arg0, %c0_i32 : i32, i32
  }
  func.func @transform_2(%arg0: i32) -> (i32, i32) {
    %c0_i32 = arith.constant 0 : i32
    %c0_i32_0 = arith.constant 0 : i32
    return %arg0, %c0_i32 : i32, i32
  }
  func.func @transform_3(%arg0: i32) -> (i32, i32) {
    %c0_i32 = arith.constant 0 : i32
    %c0_i32_0 = arith.constant 0 : i32
    return %arg0, %c0_i32 : i32, i32
  }
  func.func @transform_4(%arg0: i32) -> (i32, i32) {
    %c0_i32 = arith.constant 0 : i32
    %c0_i32_0 = arith.constant 0 : i32
    %c0_i32_1 = arith.constant 0 : i32
    return %c0_i32, %c0_i32_0 : i32, i32
  }
  func.func @transform_5(%arg0: i32) -> (i32, i32) {
    %c0_i32 = arith.constant 0 : i32
    %c0_i32_0 = arith.constant 0 : i32
    %c0_i32_1 = arith.constant 0 : i32
    return %c0_i32, %c0_i32_0 : i32, i32
  }
  func.func @transform_6(%arg0: i32) -> (i32, i32) {
    %c0_i32 = arith.constant 0 : i32
    %c0_i32_0 = arith.constant 0 : i32
    %c0_i32_1 = arith.constant 0 : i32
    return %c0_i32, %c0_i32_0 : i32, i32
  }
  func.func @transform_7(%arg0: i32) -> (i32, i32) {
    %c0_i32 = arith.constant 0 : i32
    %c0_i32_0 = arith.constant 0 : i32
    %c0_i32_1 = arith.constant 0 : i32
    return %c0_i32, %c0_i32_0 : i32, i32
  }
  func.func @transform_8(%arg0: i32) -> (i32, i32) {
    %c0_i32 = arith.constant 0 : i32
    %c0_i32_0 = arith.constant 0 : i32
    %c0_i32_1 = arith.constant 0 : i32
    return %c0_i32, %c0_i32_0 : i32, i32
  }
  func.func @transform_9(%arg0: i32) -> (i32, i32) {
    %c0_i32 = arith.constant 0 : i32
    %c0_i32_0 = arith.constant 0 : i32
    %c0_i32_1 = arith.constant 0 : i32
    return %c0_i32, %c0_i32_0 : i32, i32
  }
  func.func @transform_10(%arg0: i32) -> (i32, i32) {
    %c0_i32 = arith.constant 0 : i32
    %c0_i32_0 = arith.constant 0 : i32
    %c0_i32_1 = arith.constant 0 : i32
    return %c0_i32, %c0_i32_0 : i32, i32
  }
  func.func @transform_11(%arg0: i32) -> (i32, i32) {
    %c0_i32 = arith.constant 0 : i32
    %c0_i32_0 = arith.constant 0 : i32
    %c0_i32_1 = arith.constant 0 : i32
    return %c0_i32, %c0_i32_0 : i32, i32
  }
  func.func @transform_12(%arg0: i32) -> (i32, i32) {
    %c0_i32 = arith.constant 0 : i32
    %c0_i32_0 = arith.constant 0 : i32
    %c0_i32_1 = arith.constant 0 : i32
    return %c0_i32, %c0_i32_0 : i32, i32
  }
  func.func @transform_13(%arg0: i32) -> (i32, i32) {
    %c0_i32 = arith.constant 0 : i32
    %c0_i32_0 = arith.constant 0 : i32
    %c0_i32_1 = arith.constant 0 : i32
    return %c0_i32, %c0_i32_0 : i32, i32
  }
  func.func @transform_14(%arg0: i32) -> (i32, i32) {
    %c0_i32 = arith.constant 0 : i32
    %c0_i32_0 = arith.constant 0 : i32
    %c0_i32_1 = arith.constant 0 : i32
    return %c0_i32, %c0_i32_0 : i32, i32
  }
  func.func @transform_15(%arg0: i32) -> (i32, i32) {
    %c0_i32 = arith.constant 0 : i32
    %c0_i32_0 = arith.constant 0 : i32
    %c0_i32_1 = arith.constant 0 : i32
    return %c0_i32, %c0_i32_0 : i32, i32
  }
  func.func @transform_16(%arg0: i32) -> (i32, i32) {
    %c0_i32 = arith.constant 0 : i32
    %c0_i32_0 = arith.constant 0 : i32
    %c0_i32_1 = arith.constant 0 : i32
    return %c0_i32, %c0_i32_0 : i32, i32
  }
  func.func @transform_17(%arg0: i32) -> (i32, i32) {
    %c0_i32 = arith.constant 0 : i32
    %c0_i32_0 = arith.constant 0 : i32
    %c0_i32_1 = arith.constant 0 : i32
    return %c0_i32, %c0_i32_0 : i32, i32
  }
  func.func @transform_18(%arg0: i32) -> (i32, i32) {
    %c0_i32 = arith.constant 0 : i32
    %c0_i32_0 = arith.constant 0 : i32
    %c0_i32_1 = arith.constant 0 : i32
    return %c0_i32, %c0_i32_0 : i32, i32
  }
  func.func @transform_19(%arg0: i32) -> (i32, i32) {
    %c0_i32 = arith.constant 0 : i32
    %c0_i32_0 = arith.constant 0 : i32
    %c0_i32_1 = arith.constant 0 : i32
    return %c0_i32, %c0_i32_0 : i32, i32
  }
  func.func @transform_20(%arg0: i32) -> (i32, i32) {
    %c0_i32 = arith.constant 0 : i32
    %c0_i32_0 = arith.constant 0 : i32
    %c0_i32_1 = arith.constant 0 : i32
    return %c0_i32, %c0_i32_0 : i32, i32
  }
  func.func @transform_21(%arg0: i32) -> (i32, i32) {
    %c0_i32 = arith.constant 0 : i32
    %c0_i32_0 = arith.constant 0 : i32
    %c0_i32_1 = arith.constant 0 : i32
    return %c0_i32, %c0_i32_0 : i32, i32
  }
  func.func @transform_22(%arg0: i32) -> (i32, i32) {
    %c0_i32 = arith.constant 0 : i32
    %c0_i32_0 = arith.constant 0 : i32
    %c0_i32_1 = arith.constant 0 : i32
    return %c0_i32, %c0_i32_0 : i32, i32
  }
  func.func @transform_23(%arg0: i32) -> (i32, i32) {
    %c0_i32 = arith.constant 0 : i32
    %c0_i32_0 = arith.constant 0 : i32
    %c0_i32_1 = arith.constant 0 : i32
    return %c0_i32, %c0_i32_0 : i32, i32
  }
  func.func @transform_24(%arg0: i32) -> (i32, i32) {
    %c0_i32 = arith.constant 0 : i32
    %c0_i32_0 = arith.constant 0 : i32
    %c0_i32_1 = arith.constant 0 : i32
    return %c0_i32, %c0_i32_0 : i32, i32
  }
  func.func @transform_25(%arg0: i32) -> (i32, i32) {
    %c0_i32 = arith.constant 0 : i32
    %c0_i32_0 = arith.constant 0 : i32
    return %arg0, %c0_i32 : i32, i32
  }
  func.func @transform_26(%arg0: i32) -> (i32, i32, i32) {
    %c0_i32 = arith.constant 0 : i32
    %c0_i32_0 = arith.constant 0 : i32
    %c0_i32_1 = arith.constant 0 : i32
    return %c0_i32, %arg0, %c0_i32_0 : i32, i32, i32
  }
  func.func @transform_27(%arg0: i32) -> (i32, i32) {
    %c0_i32 = arith.constant 0 : i32
    %c0_i32_0 = arith.constant 0 : i32
    return %arg0, %c0_i32 : i32, i32
  }
  func.func @transform_28(%arg0: i32) -> (i32, i32, i32) {
    %c0_i32 = arith.constant 0 : i32
    %c0_i32_0 = arith.constant 0 : i32
    %c0_i32_1 = arith.constant 0 : i32
    return %c0_i32, %arg0, %c0_i32_0 : i32, i32, i32
  }
}

</mosaic_0001>

<bundles_post_ra>
// kernel: cont_forward.4
= control target key start
LH: loop header
LB: loop body
LE: loop exit
PB: predicated region body
PF: predicated region fallthrough
CT: control target
= control target key end

     0   :  { %21 = vsyncpa [#allocation3], 0  ;;  %s1934_s0 = inlined_call_operand.vmem [shape: f32[8,256], index: 0, kind: input, shape index: {}]   ;;  %s1935_s1 = inlined_call_operand.vmem [shape: f32[1,256], index: 1, kind: input, shape index: {}]   ;;  %s1936_s2 = inlined_call_operand.hbm [shape: f32[256,512], index: 2, kind: input, shape index: {}]   ;;  %s1937_s3 = inlined_call_operand.vmem [shape: f32[1,512], index: 3, kind: input, shape index: {}]   ;;  %s1938_s4 = inlined_call_operand.hbm [shape: f32[512,256], index: 4, kind: input, shape index: {}]   ;;  %s1939_s5 = inlined_call_operand.vmem [shape: f32[1,256], index: 5, kind: input, shape index: {}]   ;;  %s1940_s6 = inlined_call_operand.vmem [shape: f32[256,128], index: 6, kind: input, shape index: {}]   ;;  %s1941_s7 = inlined_call_operand.vmem [shape: f32[1,128], index: 7, kind: input, shape index: {}]   ;;  %s1942_s8 = inlined_call_operand.vmem [shape: f32[64,512], index: 8, kind: input, shape index: {}]   ;;  %s1943_s9 = inlined_call_operand.vmem [shape: f32[1,512], index: 9, kind: input, shape index: {}]   ;;  %s1944_s10 = inlined_call_operand.hbm [shape: f32[512,256], index: 10, kind: input, shape index: {}]   ;;  %s1945_s11 = inlined_call_operand.vmem [shape: f32[1,256], index: 11, kind: input, shape index: {}]   ;;  %s1946_s12 = inlined_call_operand.vmem [shape: f32[256,8], index: 12, kind: input, shape index: {}]   ;;  %s1947_s13 = inlined_call_operand.vmem [shape: f32[8,128], index: 13, kind: output, shape index: {0}]   ;;  %s1948_s14 = inlined_call_operand.hbm [shape: f32[8,256], index: 14, kind: output, shape index: {1}]   ;;  %s1949_s15 = inlined_call_operand.hbm [shape: f32[8,8], index: 15, kind: output, shape index: {2}]  }
   0x1   :  { %22 = vsyncpa [#allocation6], 0 }
   0x2   :  { %23 = vsyncpa [#allocation4], 0  ;;  %s48_s20 = sshll.u32 %s1938_s4, 4  ;;  %s49_s20 = int_to_ptr.hbm [resolvable:$true] %s48_s20 }
   0x3   :  { %24 = vsyncpa [#allocation10], 0  ;;  %s1489_s21 = smov [#allocation5]   ;;  %s33_s25 = sshll.u32 %s1936_s2, 4  ;;  %s34_s25 = int_to_ptr.hbm [resolvable:$true] %s33_s25 }
   0x4   :  { %s50_s22 = sshll.u32 %s1489_s21, 4  ;;  %s1490_s26 = smov 256   ;;  %s51_s22 = int_to_ptr.vmem [resolvable:$true] %s50_s22 }
   0x5   :  { %s1491_s27 = smov 16   ;;  %s1492_s28 = smov [#allocation2]  }
   0x6   :  { %56 = dma.hbm_to_vmem [thread:$0]  %s49_s20, 16384, %s51_s22, [#allocation6], %s1490_s26, %s1490_s26, %s1491_s27  }
   0x7   :  { %s35_s29 = sshll.u32 %s1492_s28, 4  ;;  %s1493_s30 = smov 512   ;;  %s36_s29 = int_to_ptr.vmem [resolvable:$true] %s35_s29 }
   0x8   :  { %s1494_s16 = smov 32   ;;  %s71_s18 = sshll.u32 %s1944_s10, 4  ;;  %s72_s18 = int_to_ptr.hbm [resolvable:$true] %s71_s18 }
   0x9   :  { %41 = dma.hbm_to_vmem [thread:$0]  %s34_s25, 16384, %s36_s29, [#allocation3], %s1493_s30, %s1493_s30, %s1494_s16  }
   0xa   :  { %s1495_s19 = smov [#allocation7]  }
   0xb   :  { %s73_s21 = sshll.u32 %s1495_s19, 4  ;;  %s74_s21 = int_to_ptr.vmem [resolvable:$true] %s73_s21 }
   0xc   :  { %79 = dma.hbm_to_vmem [thread:$0]  %s72_s18, 16384, %s74_s21, [#allocation6], %s1490_s26, %s1490_s26, %s1491_s27  }
   0xd   :  { %1481 = dma.done.wait [#allocation3], 16384  }
   0xe   :  { %1482 = vsyncadd [#allocation3], 4294950912 }
   0xf   :  { %1483 = dma.done.wait [#allocation6], 32768  }
  0x10   :  { %1484 = vsyncadd [#allocation6], 4294934528  ;;  %v168_v0 = vld [vmem:[#allocation2 + $0x1e0] sm:$0xff]  ;;  %v169_v1 = vld [vmem:[#allocation2 + $0x1e8] sm:$0xff]  ;;  %vm825_vm0 = vcmask 523264   ;;  %s1316_s17 = sshll.u32 %s1948_s14, 4  ;;  %s1317_s17 = int_to_ptr.hbm [resolvable:$true] %s1316_s17 }
  0x11   :  { %v164_v2 = vld [vmem:[#allocation2 + $0x1c0] sm:$0xff]  ;;  %246 = vmatpush.msra.mxu0 %v168_v0  ;;  %286 = vmatpush.msra.mxu2 %v169_v1  ;;  %v165_v4 = vld [vmem:[#allocation2 + $0x1c8] sm:$0xff]  ;;  %v170_v62 = vld [vmem:[#allocation2 + $0x1f0] sm:$0xff]  ;;  %s1496_s18 = smov [#allocation8]   ;;  %s1497_s21 = smov [#allocation9]   ;;  %vm1305_vm6 = vcmask 64512  }
  0x12   :  { %v232_v3 = vld [vmem:[#allocation2 + $0x3e0] sm:$0xff]  ;;  %v233_v5 = vld [vmem:[#allocation2 + $0x3e8] sm:$0xff]  ;;  %v171_v63 = vld [vmem:[#allocation2 + $0x1f8] sm:$0xff]  ;;  %s1314_s19 = sshll.u32 %s1496_s18, 4  ;;  %s1325_s2 = sshll.u32 %s1497_s21, 4  ;;  %s1315_s19 = int_to_ptr.vmem [resolvable:$true] %s1314_s19  ;;  %s1326_s2 = int_to_ptr.vmem [resolvable:$true] %s1325_s2 }
  0x13   :  { %266 = vmatpush.msra.mxu1 %v232_v3  ;;  %306 = vmatpush.msra.mxu3 %v233_v5  ;;  %v160_v6 = vld [vmem:[#allocation2 + $0x1a0] sm:$0xff]  ;;  %v161_v8 = vld [vmem:[#allocation2 + $0x1a8] sm:$0xff]  ;;  %v234_v3 = vld [vmem:[#allocation2 + $0x3f0] sm:$0xff]  ;;  %s1327_s22 = sshll.u32 %s1949_s15, 4  ;;  %s1328_s22 = int_to_ptr.hbm [resolvable:$true] %s1327_s22 }
  0x14   :  { %v228_v7 = vld [vmem:[#allocation2 + $0x3c0] sm:$0xff]  ;;  %247 = vmatpush.msra.mxu0 %v164_v2  ;;  %287 = vmatpush.msra.mxu2 %v165_v4  ;;  %v229_v9 = vld [vmem:[#allocation2 + $0x3c8] sm:$0xff]  ;;  %v166_v2 = vld [vmem:[#allocation2 + $0x1d0] sm:$0xff] }
  0x15   :  { %v224_v10 = vld [vmem:[#allocation2 + $0x3a0] sm:$0xff]  ;;  %267 = vmatpush.msra.mxu1 %v228_v7  ;;  %307 = vmatpush.msra.mxu3 %v229_v9  ;;  %v157_v12 = vld [vmem:[#allocation2 + $0x188] sm:$0xff]  ;;  %v167_v4 = vld [vmem:[#allocation2 + $0x1d8] sm:$0xff] }
  0x16   :  { %v156_v11 = vld [vmem:[#allocation2 + $0x180] sm:$0xff]  ;;  %v225_v13 = vld [vmem:[#allocation2 + $0x3a8] sm:$0xff]  ;;  %248 = vmatpush.msra.mxu0 %v160_v6  ;;  %288 = vmatpush.msra.mxu2 %v161_v8  ;;  %v235_v5 = vld [vmem:[#allocation2 + $0x3f8] sm:$0xff] }
  0x17   :  { %v220_v14 = vld [vmem:[#allocation2 + $0x380] sm:$0xff]  ;;  %v221_v15 = vld [vmem:[#allocation2 + $0x388] sm:$0xff]  ;;  %268 = vmatpush.msra.mxu1 %v224_v10  ;;  %308 = vmatpush.msra.mxu3 %v225_v13  ;;  %v162_v6 = vld [vmem:[#allocation2 + $0x1b0] sm:$0xff] }
  0x18   :  { %v152_v16 = vld [vmem:[#allocation2 + $0x160] sm:$0xff]  ;;  %v153_v17 = vld [vmem:[#allocation2 + $0x168] sm:$0xff]  ;;  %249 = vmatpush.msra.mxu0 %v156_v11  ;;  %289 = vmatpush.msra.mxu2 %v157_v12  ;;  %v230_v7 = vld [vmem:[#allocation2 + $0x3d0] sm:$0xff] }
  0x19   :  { %v216_v18 = vld [vmem:[#allocation2 + $0x360] sm:$0xff]  ;;  %v217_v19 = vld [vmem:[#allocation2 + $0x368] sm:$0xff]  ;;  %269 = vmatpush.msra.mxu1 %v220_v14  ;;  %309 = vmatpush.msra.mxu3 %v221_v15  ;;  %v163_v9 = vld [vmem:[#allocation2 + $0x1b8] sm:$0xff] }
  0x1a   :  { %v148_v20 = vld [vmem:[#allocation2 + $0x140] sm:$0xff]  ;;  %v149_v21 = vld [vmem:[#allocation2 + $0x148] sm:$0xff]  ;;  %250 = vmatpush.msra.mxu0 %v152_v16  ;;  %290 = vmatpush.msra.mxu2 %v153_v17  ;;  %v231_v10 = vld [vmem:[#allocation2 + $0x3d8] sm:$0xff] }
  0x1b   :  { %v212_v22 = vld [vmem:[#allocation2 + $0x340] sm:$0xff]  ;;  %v213_v23 = vld [vmem:[#allocation2 + $0x348] sm:$0xff]  ;;  %270 = vmatpush.msra.mxu1 %v216_v18  ;;  %310 = vmatpush.msra.mxu3 %v217_v19  ;;  %v158_v11 = vld [vmem:[#allocation2 + $0x190] sm:$0xff] }
  0x1c   :  { %v144_v24 = vld [vmem:[#allocation2 + $0x120] sm:$0xff]  ;;  %v145_v25 = vld [vmem:[#allocation2 + $0x128] sm:$0xff]  ;;  %251 = vmatpush.msra.mxu0 %v148_v20  ;;  %291 = vmatpush.msra.mxu2 %v149_v21  ;;  %v226_v12 = vld [vmem:[#allocation2 + $0x3b0] sm:$0xff] }
  0x1d   :  { %v208_v26 = vld [vmem:[#allocation2 + $0x320] sm:$0xff]  ;;  %v209_v27 = vld [vmem:[#allocation2 + $0x328] sm:$0xff]  ;;  %271 = vmatpush.msra.mxu1 %v212_v22  ;;  %311 = vmatpush.msra.mxu3 %v213_v23  ;;  %v159_v13 = vld [vmem:[#allocation2 + $0x198] sm:$0xff] }
  0x1e   :  { %v140_v28 = vld [vmem:[#allocation2 + $0x100] sm:$0xff]  ;;  %v141_v29 = vld [vmem:[#allocation2 + $0x108] sm:$0xff]  ;;  %252 = vmatpush.msra.mxu0 %v144_v24  ;;  %292 = vmatpush.msra.mxu2 %v145_v25  ;;  %v227_v14 = vld [vmem:[#allocation2 + $0x3b8] sm:$0xff] }
  0x1f   :  { %v204_v30 = vld [vmem:[#allocation2 + $0x300] sm:$0xff]  ;;  %v205_v31 = vld [vmem:[#allocation2 + $0x308] sm:$0xff]  ;;  %272 = vmatpush.msra.mxu1 %v208_v26  ;;  %312 = vmatpush.msra.mxu3 %v209_v27  ;;  %v154_v16 = vld [vmem:[#allocation2 + $0x170] sm:$0xff] }
  0x20   :  { %v136_v32 = vld [vmem:[#allocation2 + $0xe0] sm:$0xff]  ;;  %v137_v33 = vld [vmem:[#allocation2 + $0xe8] sm:$0xff]  ;;  %253 = vmatpush.msra.mxu0 %v140_v28  ;;  %293 = vmatpush.msra.mxu2 %v141_v29  ;;  %v222_v17 = vld [vmem:[#allocation2 + $0x390] sm:$0xff] }
  0x21   :  { %v200_v34 = vld [vmem:[#allocation2 + $0x2e0] sm:$0xff]  ;;  %v201_v35 = vld [vmem:[#allocation2 + $0x2e8] sm:$0xff]  ;;  %273 = vmatpush.msra.mxu1 %v204_v30  ;;  %313 = vmatpush.msra.mxu3 %v205_v31  ;;  %v155_v19 = vld [vmem:[#allocation2 + $0x178] sm:$0xff] }
  0x22   :  { %v132_v36 = vld [vmem:[#allocation2 + $0xc0] sm:$0xff]  ;;  %v133_v37 = vld [vmem:[#allocation2 + $0xc8] sm:$0xff]  ;;  %254 = vmatpush.msra.mxu0 %v136_v32  ;;  %294 = vmatpush.msra.mxu2 %v137_v33  ;;  %v223_v20 = vld [vmem:[#allocation2 + $0x398] sm:$0xff] }
  0x23   :  { %v196_v38 = vld [vmem:[#allocation2 + $0x2c0] sm:$0xff]  ;;  %v197_v39 = vld [vmem:[#allocation2 + $0x2c8] sm:$0xff]  ;;  %274 = vmatpush.msra.mxu1 %v200_v34  ;;  %314 = vmatpush.msra.mxu3 %v201_v35  ;;  %v150_v21 = vld [vmem:[#allocation2 + $0x150] sm:$0xff] }
  0x24   :  { %v128_v40 = vld [vmem:[#allocation2 + $0xa0] sm:$0xff]  ;;  %v129_v41 = vld [vmem:[#allocation2 + $0xa8] sm:$0xff]  ;;  %255 = vmatpush.msra.mxu0 %v132_v36  ;;  %295 = vmatpush.msra.mxu2 %v133_v37  ;;  %v218_v22 = vld [vmem:[#allocation2 + $0x370] sm:$0xff] }
  0x25   :  { %v192_v42 = vld [vmem:[#allocation2 + $0x2a0] sm:$0xff]  ;;  %v193_v43 = vld [vmem:[#allocation2 + $0x2a8] sm:$0xff]  ;;  %275 = vmatpush.msra.mxu1 %v196_v38  ;;  %315 = vmatpush.msra.mxu3 %v197_v39  ;;  %v151_v24 = vld [vmem:[#allocation2 + $0x158] sm:$0xff] }
  0x26   :  { %v124_v44 = vld [vmem:[#allocation2 + $0x80] sm:$0xff]  ;;  %v125_v45 = vld [vmem:[#allocation2 + $0x88] sm:$0xff]  ;;  %256 = vmatpush.msra.mxu0 %v128_v40  ;;  %296 = vmatpush.msra.mxu2 %v129_v41  ;;  %v219_v25 = vld [vmem:[#allocation2 + $0x378] sm:$0xff] }
  0x27   :  { %v188_v46 = vld [vmem:[#allocation2 + $0x280] sm:$0xff]  ;;  %v189_v47 = vld [vmem:[#allocation2 + $0x288] sm:$0xff]  ;;  %276 = vmatpush.msra.mxu1 %v192_v42  ;;  %316 = vmatpush.msra.mxu3 %v193_v43  ;;  %v146_v28 = vld [vmem:[#allocation2 + $0x130] sm:$0xff] }
  0x28   :  { %v120_v48 = vld [vmem:[#allocation2 + $0x60] sm:$0xff]  ;;  %v121_v49 = vld [vmem:[#allocation2 + $0x68] sm:$0xff]  ;;  %257 = vmatpush.msra.mxu0 %v124_v44  ;;  %297 = vmatpush.msra.mxu2 %v125_v45  ;;  %v214_v29 = vld [vmem:[#allocation2 + $0x350] sm:$0xff] }
  0x29   :  { %v184_v50 = vld [vmem:[#allocation2 + $0x260] sm:$0xff]  ;;  %v185_v51 = vld [vmem:[#allocation2 + $0x268] sm:$0xff]  ;;  %277 = vmatpush.msra.mxu1 %v188_v46  ;;  %317 = vmatpush.msra.mxu3 %v189_v47  ;;  %v147_v30 = vld [vmem:[#allocation2 + $0x138] sm:$0xff] }
  0x2a   :  { %v116_v52 = vld [vmem:[#allocation2 + $0x40] sm:$0xff]  ;;  %v117_v53 = vld [vmem:[#allocation2 + $0x48] sm:$0xff]  ;;  %258 = vmatpush.msra.mxu0 %v120_v48  ;;  %298 = vmatpush.msra.mxu2 %v121_v49  ;;  %v215_v31 = vld [vmem:[#allocation2 + $0x358] sm:$0xff] }
  0x2b   :  { %v180_v54 = vld [vmem:[#allocation2 + $0x240] sm:$0xff]  ;;  %v181_v55 = vld [vmem:[#allocation2 + $0x248] sm:$0xff]  ;;  %278 = vmatpush.msra.mxu1 %v184_v50  ;;  %318 = vmatpush.msra.mxu3 %v185_v51  ;;  %v142_v32 = vld [vmem:[#allocation2 + $0x110] sm:$0xff] }
  0x2c   :  { %v112_v56 = vld [vmem:[#allocation2 + $0x20] sm:$0xff]  ;;  %v113_v57 = vld [vmem:[#allocation2 + $0x28] sm:$0xff]  ;;  %259 = vmatpush.msra.mxu0 %v116_v52  ;;  %299 = vmatpush.msra.mxu2 %v117_v53  ;;  %v210_v33 = vld [vmem:[#allocation2 + $0x330] sm:$0xff] }
  0x2d   :  { %v176_v58 = vld [vmem:[#allocation2 + $0x220] sm:$0xff]  ;;  %v177_v59 = vld [vmem:[#allocation2 + $0x228] sm:$0xff]  ;;  %279 = vmatpush.msra.mxu1 %v180_v54  ;;  %319 = vmatpush.msra.mxu3 %v181_v55  ;;  %v143_v35 = vld [vmem:[#allocation2 + $0x118] sm:$0xff] }
  0x2e   :  { %v108_v60 = vld [vmem:[#allocation2] sm:$0xff]  ;;  %v109_v61 = vld [vmem:[#allocation2 + $0x8] sm:$0xff]  ;;  %260 = vmatpush.msra.mxu0 %v112_v56  ;;  %300 = vmatpush.msra.mxu2 %v113_v57  ;;  %v211_v36 = vld [vmem:[#allocation2 + $0x338] sm:$0xff] }
  0x2f   :  { %280 = vmatpush.msra.mxu1 %v176_v58  ;;  %320 = vmatpush.msra.mxu3 %v177_v59  ;;  %v172_v0 = vld [vmem:[#allocation2 + $0x200] sm:$0xff]  ;;  %v173_v1 = vld [vmem:[#allocation2 + $0x208] sm:$0xff]  ;;  %v138_v38 = vld [vmem:[#allocation2 + $0xf0] sm:$0xff] }
  0x30   :  { %261 = vmatpush.msra.mxu0 %v108_v60  ;;  %301 = vmatpush.msra.mxu2 %v109_v61  ;;  %v98_v8 = vld [vmem:[%s1935_s1] sm:$0x3]  ;;  %v97_v27 = vld [vmem:[%s1934_s0 + $0x8] sm:$0xff]  ;;  %v206_v39 = vld [vmem:[#allocation2 + $0x310] sm:$0xff] }
  0x31   :  { %281 = vmatpush.msra.mxu1 %v172_v0  ;;  %321 = vmatpush.msra.mxu3 %v173_v1  ;;  %v100_v15 = vperm.slane %v98_v8, 0  ;;  %v96_v18 = vld [vmem:[%s1934_s0] sm:$0xff]  ;;  %v101_v23 = vperm.slane %v98_v8, 1  ;;  %v139_v40 = vld [vmem:[#allocation2 + $0xf8] sm:$0xff]  ;;  %v134_v43 = vld [vmem:[#allocation2 + $0xd0] sm:$0xff] }
  0x32   :  { %326 = vmatpush.msrb.mxu0 %v170_v62  ;;  %366 = vmatpush.msrb.mxu2 %v171_v63  ;;  %v207_v41 = vld [vmem:[#allocation2 + $0x318] sm:$0xff]  ;;  %v202_v44 = vld [vmem:[#allocation2 + $0x2f0] sm:$0xff] }
  0x33   :  { %346 = vmatpush.msrb.mxu1 %v234_v3  ;;  %386 = vmatpush.msrb.mxu3 %v235_v5  ;;  %v104_v26 = vadd.f32 %v100_v15, %v96_v18  ;;  %v105_v34 = vadd.f32 %v101_v23, %v97_v27  ;;  %v135_v45 = vld [vmem:[#allocation2 + $0xd8] sm:$0xff]  ;;  %v198_v47 = vld [vmem:[#allocation2 + $0x2d0] sm:$0xff]  ;;  %v502_v15 = vld [vmem:[#allocation5 + $0x2e0] sm:$0xff] }
  0x34   :  { %327 = vmatpush.msrb.mxu0 %v166_v2  ;;  %367 = vmatpush.msrb.mxu2 %v167_v4  ;;  %v203_v46 = vld [vmem:[#allocation2 + $0x2f8] sm:$0xff]  ;;  %v130_v48 = vld [vmem:[#allocation2 + $0xb0] sm:$0xff]  ;;  %v498_v23 = vld [vmem:[#allocation5 + $0x2c0] sm:$0xff] }
  0x35   :  { %347 = vmatpush.msrb.mxu1 %v230_v7  ;;  %387 = vmatpush.msrb.mxu3 %v231_v10  ;;  %v1596_v37 = vmax.f32 %v104_v26, 0.0  ;;  %v1598_v42 = vmax.f32 %v105_v34, 0.0  ;;  %v131_v49 = vld [vmem:[#allocation2 + $0xb8] sm:$0xff]  ;;  %v126_v51 = vld [vmem:[#allocation2 + $0x90] sm:$0xff] }
  0x36   :  { %328 = vmatpush.msrb.mxu0 %v162_v6  ;;  %368 = vmatpush.msrb.mxu2 %v163_v9  ;;  %v199_v50 = vld [vmem:[#allocation2 + $0x2d8] sm:$0xff]  ;;  %v194_v52 = vld [vmem:[#allocation2 + $0x2b0] sm:$0xff] }
  0x37   :  { %348 = vmatpush.msrb.mxu1 %v226_v12  ;;  %388 = vmatpush.msrb.mxu3 %v227_v14  ;;  %v127_v53 = vld [vmem:[#allocation2 + $0x98] sm:$0xff]  ;;  %v122_v55 = vld [vmem:[#allocation2 + $0x70] sm:$0xff]  ;;  %v470_v14 = vld [vmem:[#allocation5 + $0x1e0] sm:$0xff] }
  0x38   :  { %329 = vmatpush.msrb.mxu0 %v158_v11  ;;  %369 = vmatpush.msrb.mxu2 %v159_v13  ;;  %v195_v54 = vld [vmem:[#allocation2 + $0x2b8] sm:$0xff]  ;;  %v190_v56 = vld [vmem:[#allocation2 + $0x290] sm:$0xff]  ;;  %v438_v13 = vld [vmem:[#allocation5 + $0xe0] sm:$0xff] }
  0x39   :  { %349 = vmatpush.msrb.mxu1 %v222_v17  ;;  %389 = vmatpush.msrb.mxu3 %v223_v20  ;;  %v123_v57 = vld [vmem:[#allocation2 + $0x78] sm:$0xff]  ;;  %v118_v59 = vld [vmem:[#allocation2 + $0x50] sm:$0xff] }
  0x3a   :  { %330 = vmatpush.msrb.mxu0 %v154_v16  ;;  %370 = vmatpush.msrb.mxu2 %v155_v19  ;;  %v191_v58 = vld [vmem:[#allocation2 + $0x298] sm:$0xff]  ;;  %v186_v60 = vld [vmem:[#allocation2 + $0x270] sm:$0xff]  ;;  %v534_v16 = vld [vmem:[#allocation5 + $0x3e0] sm:$0xff] }
  0x3b   :  { %350 = vmatpush.msrb.mxu1 %v218_v22  ;;  %390 = vmatpush.msrb.mxu3 %v219_v25  ;;  %v119_v61 = vld [vmem:[#allocation2 + $0x58] sm:$0xff]  ;;  %v114_v63 = vld [vmem:[#allocation2 + $0x30] sm:$0xff]  ;;  %v466_v22 = vld [vmem:[#allocation5 + $0x1c0] sm:$0xff] }
  0x3c   :  { %331 = vmatpush.msrb.mxu0 %v150_v21  ;;  %371 = vmatpush.msrb.mxu2 %v151_v24  ;;  %v187_v62 = vld [vmem:[#allocation2 + $0x278] sm:$0xff]  ;;  %v182_v0 = vld [vmem:[#allocation2 + $0x250] sm:$0xff]  ;;  %v434_v21 = vld [vmem:[#allocation5 + $0xc0] sm:$0xff] }
  0x3d   :  { %351 = vmatpush.msrb.mxu1 %v214_v29  ;;  %391 = vmatpush.msrb.mxu3 %v215_v31  ;;  %v115_v1 = vld [vmem:[#allocation2 + $0x38] sm:$0xff]  ;;  %v110_v3 = vld [vmem:[#allocation2 + $0x10] sm:$0xff]  ;;  %v530_v24 = vld [vmem:[#allocation5 + $0x3c0] sm:$0xff] }
  0x3e   :  { %332 = vmatpush.msrb.mxu0 %v146_v28  ;;  %372 = vmatpush.msrb.mxu2 %v147_v30  ;;  %v183_v2 = vld [vmem:[#allocation2 + $0x258] sm:$0xff]  ;;  %v178_v4 = vld [vmem:[#allocation2 + $0x230] sm:$0xff]  ;;  %v430_v29 = vld [vmem:[#allocation5 + $0xa0] sm:$0xff] }
  0x3f   :  { %352 = vmatpush.msrb.mxu1 %v210_v33  ;;  %392 = vmatpush.msrb.mxu3 %v211_v36  ;;  %v111_v5 = vld [vmem:[#allocation2 + $0x18] sm:$0xff]  ;;  %v174_v7 = vld [vmem:[#allocation2 + $0x210] sm:$0xff]  ;;  %v462_v30 = vld [vmem:[#allocation5 + $0x1a0] sm:$0xff] }
  0x40   :  { %333 = vmatpush.msrb.mxu0 %v142_v32  ;;  %373 = vmatpush.msrb.mxu2 %v143_v35  ;;  %v179_v6 = vld [vmem:[#allocation2 + $0x238] sm:$0xff]  ;;  %v440_v9 = vld [vmem:[#allocation5 + $0xf0] sm:$0xff]  ;;  %v494_v31 = vld [vmem:[#allocation5 + $0x2a0] sm:$0xff] }
  0x41   :  { %302 = vmatmul.f32.vlgmr.msra.gmra.mxu2 %v1596_v37  ;;  %353 = vmatpush.msrb.mxu1 %v206_v39  ;;  %v175_v8 = vld [vmem:[#allocation2 + $0x218] sm:$0xff]  ;;  %v472_v10 = vld [vmem:[#allocation5 + $0x1f0] sm:$0xff]  ;;  %v526_v32 = vld [vmem:[#allocation5 + $0x3a0] sm:$0xff] }
  0x42   :  { %334 = vmatpush.msrb.mxu0 %v138_v38  ;;  %374 = vmatpush.msrb.mxu2 %v139_v40  ;;  %v504_v11 = vld [vmem:[#allocation5 + $0x2f0] sm:$0xff]  ;;  %v458_v38 = vld [vmem:[#allocation5 + $0x180] sm:$0xff] }
  0x43   :  { %393 = vmatpush.msrb.mxu3 %v207_v41  ;;  %354 = vmatpush.msrb.mxu1 %v202_v44  ;;  %v536_v12 = vld [vmem:[#allocation5 + $0x3f0] sm:$0xff]  ;;  %v490_v39 = vld [vmem:[#allocation5 + $0x280] sm:$0xff] }
  0x44   :  { %335 = vmatpush.msrb.mxu0 %v134_v43  ;;  %322 = vmatmul.f32.vlgmr.msra.gmra.mxu3 %v1598_v42  ;;  %v436_v17 = vld [vmem:[#allocation5 + $0xd0] sm:$0xff]  ;;  %v522_v40 = vld [vmem:[#allocation5 + $0x380] sm:$0xff] }
  0x45   :  { %375 = vmatpush.msrb.mxu2 %v135_v45  ;;  %394 = vmatpush.msrb.mxu3 %v203_v46  ;;  %v468_v18 = vld [vmem:[#allocation5 + $0x1d0] sm:$0xff]  ;;  %v422_v45 = vld [vmem:[#allocation5 + $0x60] sm:$0xff] }
  0x46   :  { %262 = vmatmul.f32.vlgmr.msra.gmra.mxu0 %v1596_v37  ;;  %355 = vmatpush.msrb.mxu1 %v198_v47  ;;  %v500_v19 = vld [vmem:[#allocation5 + $0x2d0] sm:$0xff]  ;;  %v454_v46 = vld [vmem:[#allocation5 + $0x160] sm:$0xff] }
  0x47   :  { %336 = vmatpush.msrb.mxu0 %v130_v48  ;;  %376 = vmatpush.msrb.mxu2 %v131_v49  ;;  %v532_v20 = vld [vmem:[#allocation5 + $0x3d0] sm:$0xff]  ;;  %v486_v47 = vld [vmem:[#allocation5 + $0x260] sm:$0xff] }
  0x48   :  { %395 = vmatpush.msrb.mxu3 %v199_v50  ;;  %282 = vmatmul.f32.vlgmr.msra.gmra.mxu1 %v1598_v42  ;;  %v432_v25 = vld [vmem:[#allocation5 + $0xb0] sm:$0xff]  ;;  %v518_v48 = vld [vmem:[#allocation5 + $0x360] sm:$0xff] }
  0x49   :  { %337 = vmatpush.msrb.mxu0 %v126_v51  ;;  %356 = vmatpush.msrb.mxu1 %v194_v52  ;;  %v464_v26 = vld [vmem:[#allocation5 + $0x1b0] sm:$0xff] }
  0x4a   :  { %377 = vmatpush.msrb.mxu2 %v127_v53  ;;  %396 = vmatpush.msrb.mxu3 %v195_v54  ;;  %v496_v27 = vld [vmem:[#allocation5 + $0x2b0] sm:$0xff]  ;;  %v418_v53 = vld [vmem:[#allocation5 + $0x40] sm:$0xff] }
  0x4b   :  { %338 = vmatpush.msrb.mxu0 %v122_v55  ;;  %357 = vmatpush.msrb.mxu1 %v190_v56  ;;  %v528_v28 = vld [vmem:[#allocation5 + $0x3b0] sm:$0xff]  ;;  %v450_v54 = vld [vmem:[#allocation5 + $0x140] sm:$0xff] }
  0x4c   :  { %378 = vmatpush.msrb.mxu2 %v123_v57  ;;  %397 = vmatpush.msrb.mxu3 %v191_v58  ;;  %v428_v33 = vld [vmem:[#allocation5 + $0x90] sm:$0xff]  ;;  %v482_v55 = vld [vmem:[#allocation5 + $0x240] sm:$0xff] }
  0x4d   :  { %339 = vmatpush.msrb.mxu0 %v118_v59  ;;  %358 = vmatpush.msrb.mxu1 %v186_v60  ;;  %v460_v34 = vld [vmem:[#allocation5 + $0x190] sm:$0xff]  ;;  %v514_v56 = vld [vmem:[#allocation5 + $0x340] sm:$0xff] }
  0x4e   :  { %379 = vmatpush.msrb.mxu2 %v119_v61  ;;  %398 = vmatpush.msrb.mxu3 %v187_v62  ;;  %v492_v35 = vld [vmem:[#allocation5 + $0x290] sm:$0xff]  ;;  %v414_v61 = vld [vmem:[#allocation5 + $0x20] sm:$0xff] }
  0x4f   :  { %340 = vmatpush.msrb.mxu0 %v114_v63  ;;  %359 = vmatpush.msrb.mxu1 %v182_v0  ;;  %v524_v36 = vld [vmem:[#allocation5 + $0x390] sm:$0xff]  ;;  %v446_v62 = vld [vmem:[#allocation5 + $0x120] sm:$0xff] }
  0x50   :  { %380 = vmatpush.msrb.mxu2 %v115_v1  ;;  %399 = vmatpush.msrb.mxu3 %v183_v2  ;;  %v424_v41 = vld [vmem:[#allocation5 + $0x70] sm:$0xff]  ;;  %v478_v63 = vld [vmem:[#allocation5 + $0x220] sm:$0xff] }
  0x51   :  { %341 = vmatpush.msrb.mxu0 %v110_v3  ;;  %360 = vmatpush.msrb.mxu1 %v178_v4  ;;  %v488_v43 = vld [vmem:[#allocation5 + $0x270] sm:$0xff]  ;;  %v510_v0 = vld [vmem:[#allocation5 + $0x320] sm:$0xff] }
  0x52   :  { %381 = vmatpush.msrb.mxu2 %v111_v5  ;;  %400 = vmatpush.msrb.mxu3 %v179_v6  ;;  %v520_v44 = vld [vmem:[#allocation5 + $0x370] sm:$0xff]  ;;  %v410_v5 = vld [vmem:[#allocation5] sm:$0xff] }
  0x53   :  { %342 = vmatmul.f32.vlgmr.msrb.gmra.mxu0 %v1596_v37  ;;  %382 = vmatmul.f32.vlgmr.msrb.gmra.mxu2 %v1596_v37  ;;  %v426_v37 = vld [vmem:[#allocation5 + $0x80] sm:$0xff]  ;;  %v420_v49 = vld [vmem:[#allocation5 + $0x50] sm:$0xff] }
  0x54   :  { %361 = vmatpush.msrb.mxu1 %v174_v7  ;;  %401 = vmatpush.msrb.mxu3 %v175_v8  ;;  %v452_v50 = vld [vmem:[#allocation5 + $0x150] sm:$0xff]  ;;  %v442_v6 = vld [vmem:[#allocation5 + $0x100] sm:$0xff]  ;;  %v441_v7 = vld [vmem:[#allocation5 + $0xf8] sm:$0xff] }
  0x55   :  { %362 = vmatmul.f32.vlgmr.msrb.gmra.mxu1 %v1598_v42  ;;  %402 = vmatmul.f32.vlgmr.msrb.gmra.mxu3 %v1598_v42  ;;  %v456_v42 = vld [vmem:[#allocation5 + $0x170] sm:$0xff]  ;;  %v473_v8 = vld [vmem:[#allocation5 + $0x1f8] sm:$0xff] }
  0x56   :  { %544 = vmatpush.msra.mxu0 %v440_v9  ;;  %564 = vmatpush.msra.mxu1 %v472_v10  ;;  %v484_v51 = vld [vmem:[#allocation5 + $0x250] sm:$0xff]  ;;  %v474_v9 = vld [vmem:[#allocation5 + $0x200] sm:$0xff]  ;;  %v439_v10 = vld [vmem:[#allocation5 + $0xe8] sm:$0xff] }
  0x57   :  { %584 = vmatpush.msra.mxu2 %v504_v11  ;;  %604 = vmatpush.msra.mxu3 %v536_v12  ;;  %v516_v52 = vld [vmem:[#allocation5 + $0x350] sm:$0xff]  ;;  %v471_v11 = vld [vmem:[#allocation5 + $0x1e8] sm:$0xff]  ;;  %v505_v12 = vld [vmem:[#allocation5 + $0x2f8] sm:$0xff] }
  0x58   :  { %545 = vmatpush.msra.mxu0 %v438_v13  ;;  %565 = vmatpush.msra.mxu1 %v470_v14  ;;  %v416_v57 = vld [vmem:[#allocation5 + $0x30] sm:$0xff]  ;;  %v437_v13 = vld [vmem:[#allocation5 + $0xd8] sm:$0xff] }
  0x59   :  { %585 = vmatpush.msra.mxu2 %v502_v15  ;;  %605 = vmatpush.msra.mxu3 %v534_v16  ;;  %v448_v58 = vld [vmem:[#allocation5 + $0x130] sm:$0xff]  ;;  %v469_v14 = vld [vmem:[#allocation5 + $0x1d8] sm:$0xff]  ;;  %v503_v15 = vld [vmem:[#allocation5 + $0x2e8] sm:$0xff] }
  0x5a   :  { %546 = vmatpush.msra.mxu0 %v436_v17  ;;  %566 = vmatpush.msra.mxu1 %v468_v18  ;;  %v480_v59 = vld [vmem:[#allocation5 + $0x230] sm:$0xff]  ;;  %v435_v16 = vld [vmem:[#allocation5 + $0xc8] sm:$0xff]  ;;  %v433_v18 = vld [vmem:[#allocation5 + $0xb8] sm:$0xff] }
  0x5b   :  { %586 = vmatpush.msra.mxu2 %v500_v19  ;;  %606 = vmatpush.msra.mxu3 %v532_v20  ;;  %v512_v60 = vld [vmem:[#allocation5 + $0x330] sm:$0xff]  ;;  %v467_v17 = vld [vmem:[#allocation5 + $0x1c8] sm:$0xff]  ;;  %v465_v19 = vld [vmem:[#allocation5 + $0x1b8] sm:$0xff] }
  0x5c   :  { %547 = vmatpush.msra.mxu0 %v434_v21  ;;  %567 = vmatpush.msra.mxu1 %v466_v22  ;;  %v412_v1 = vld [vmem:[#allocation5 + $0x10] sm:$0xff]  ;;  %v431_v20 = vld [vmem:[#allocation5 + $0xa8] sm:$0xff]  ;;  %v429_v22 = vld [vmem:[#allocation5 + $0x98] sm:$0xff] }
  0x5d   :  { %587 = vmatpush.msra.mxu2 %v498_v23  ;;  %607 = vmatpush.msra.mxu3 %v530_v24  ;;  %v444_v2 = vld [vmem:[#allocation5 + $0x110] sm:$0xff]  ;;  %v463_v21 = vld [vmem:[#allocation5 + $0x1a8] sm:$0xff]  ;;  %v461_v23 = vld [vmem:[#allocation5 + $0x198] sm:$0xff] }
  0x5e   :  { %548 = vmatpush.msra.mxu0 %v432_v25  ;;  %568 = vmatpush.msra.mxu1 %v464_v26  ;;  %v476_v3 = vld [vmem:[#allocation5 + $0x210] sm:$0xff]  ;;  %v427_v24 = vld [vmem:[#allocation5 + $0x88] sm:$0xff]  ;;  %v425_v25 = vld [vmem:[#allocation5 + $0x78] sm:$0xff] }
  0x5f   :  { %588 = vmatpush.msra.mxu2 %v496_v27  ;;  %608 = vmatpush.msra.mxu3 %v528_v28  ;;  %v508_v4 = vld [vmem:[#allocation5 + $0x310] sm:$0xff]  ;;  %v459_v26 = vld [vmem:[#allocation5 + $0x188] sm:$0xff]  ;;  %v501_v27 = vld [vmem:[#allocation5 + $0x2d8] sm:$0xff] }
  0x60   :  { %549 = vmatpush.msra.mxu0 %v430_v29  ;;  %569 = vmatpush.msra.mxu1 %v462_v30  ;;  %v506_v28 = vld [vmem:[#allocation5 + $0x300] sm:$0xff]  ;;  %v423_v29 = vld [vmem:[#allocation5 + $0x68] sm:$0xff]  ;;  %v457_v30 = vld [vmem:[#allocation5 + $0x178] sm:$0xff] }
  0x61   :  { %589 = vmatpush.msra.mxu2 %v494_v31  ;;  %609 = vmatpush.msra.mxu3 %v526_v32  ;;  %v499_v31 = vld [vmem:[#allocation5 + $0x2c8] sm:$0xff]  ;;  %v537_v32 = vld [vmem:[#allocation5 + $0x3f8] sm:$0xff] }
  0x62   :  { %550 = vmatpush.msra.mxu0 %v428_v33  ;;  %570 = vmatpush.msra.mxu1 %v460_v34  ;;  %v421_v33 = vld [vmem:[#allocation5 + $0x58] sm:$0xff]  ;;  %v455_v34 = vld [vmem:[#allocation5 + $0x168] sm:$0xff] }
  0x63   :  { %590 = vmatpush.msra.mxu2 %v492_v35  ;;  %610 = vmatpush.msra.mxu3 %v524_v36  ;;  %v497_v35 = vld [vmem:[#allocation5 + $0x2b8] sm:$0xff]  ;;  %v535_v36 = vld [vmem:[#allocation5 + $0x3e8] sm:$0xff] }
  0x64   :  { %551 = vmatpush.msra.mxu0 %v426_v37  ;;  %571 = vmatpush.msra.mxu1 %v458_v38  ;;  %v419_v37 = vld [vmem:[#allocation5 + $0x48] sm:$0xff]  ;;  %v453_v38 = vld [vmem:[#allocation5 + $0x158] sm:$0xff] }
  0x65   :  { %591 = vmatpush.msra.mxu2 %v490_v39  ;;  %611 = vmatpush.msra.mxu3 %v522_v40  ;;  %v495_v39 = vld [vmem:[#allocation5 + $0x2a8] sm:$0xff]  ;;  %v533_v40 = vld [vmem:[#allocation5 + $0x3d8] sm:$0xff] }
  0x66   :  { %552 = vmatpush.msra.mxu0 %v424_v41  ;;  %572 = vmatpush.msra.mxu1 %v456_v42  ;;  %v417_v41 = vld [vmem:[#allocation5 + $0x38] sm:$0xff]  ;;  %v451_v42 = vld [vmem:[#allocation5 + $0x148] sm:$0xff] }
  0x67   :  { %592 = vmatpush.msra.mxu2 %v488_v43  ;;  %612 = vmatpush.msra.mxu3 %v520_v44  ;;  %v493_v43 = vld [vmem:[#allocation5 + $0x298] sm:$0xff]  ;;  %v531_v44 = vld [vmem:[#allocation5 + $0x3c8] sm:$0xff] }
  0x68   :  { %553 = vmatpush.msra.mxu0 %v422_v45  ;;  %573 = vmatpush.msra.mxu1 %v454_v46  ;;  %v415_v45 = vld [vmem:[#allocation5 + $0x28] sm:$0xff]  ;;  %v449_v46 = vld [vmem:[#allocation5 + $0x138] sm:$0xff] }
  0x69   :  { %593 = vmatpush.msra.mxu2 %v486_v47  ;;  %613 = vmatpush.msra.mxu3 %v518_v48  ;;  %v491_v47 = vld [vmem:[#allocation5 + $0x288] sm:$0xff]  ;;  %v529_v48 = vld [vmem:[#allocation5 + $0x3b8] sm:$0xff] }
  0x6a   :  { %554 = vmatpush.msra.mxu0 %v420_v49  ;;  %574 = vmatpush.msra.mxu1 %v452_v50  ;;  %v413_v49 = vld [vmem:[#allocation5 + $0x18] sm:$0xff]  ;;  %v447_v50 = vld [vmem:[#allocation5 + $0x128] sm:$0xff] }
  0x6b   :  { %594 = vmatpush.msra.mxu2 %v484_v51  ;;  %614 = vmatpush.msra.mxu3 %v516_v52  ;;  %v489_v51 = vld [vmem:[#allocation5 + $0x278] sm:$0xff]  ;;  %v527_v52 = vld [vmem:[#allocation5 + $0x3a8] sm:$0xff] }
  0x6c   :  { %555 = vmatpush.msra.mxu0 %v418_v53  ;;  %575 = vmatpush.msra.mxu1 %v450_v54  ;;  %v411_v53 = vld [vmem:[#allocation5 + $0x8] sm:$0xff]  ;;  %v445_v54 = vld [vmem:[#allocation5 + $0x118] sm:$0xff] }
  0x6d   :  { %595 = vmatpush.msra.mxu2 %v482_v55  ;;  %615 = vmatpush.msra.mxu3 %v514_v56  ;;  %v487_v55 = vld [vmem:[#allocation5 + $0x268] sm:$0xff]  ;;  %v525_v56 = vld [vmem:[#allocation5 + $0x398] sm:$0xff] }
  0x6e   :  { %556 = vmatpush.msra.mxu0 %v416_v57  ;;  %576 = vmatpush.msra.mxu1 %v448_v58  ;;  %v443_v57 = vld [vmem:[#allocation5 + $0x108] sm:$0xff]  ;;  %v485_v58 = vld [vmem:[#allocation5 + $0x258] sm:$0xff] }
  0x6f   :  { %596 = vmatpush.msra.mxu2 %v480_v59  ;;  %616 = vmatpush.msra.mxu3 %v512_v60  ;;  %v523_v59 = vld [vmem:[#allocation5 + $0x388] sm:$0xff] }
  0x70   :  { %557 = vmatpush.msra.mxu0 %v414_v61  ;;  %577 = vmatpush.msra.mxu1 %v446_v62  ;;  %v483_v60 = vld [vmem:[#allocation5 + $0x248] sm:$0xff]  ;;  %v521_v61 = vld [vmem:[#allocation5 + $0x378] sm:$0xff] }
  0x71   :  { %597 = vmatpush.msra.mxu2 %v478_v63  ;;  %617 = vmatpush.msra.mxu3 %v510_v0  ;;  %v481_v62 = vld [vmem:[#allocation5 + $0x238] sm:$0xff]  ;;  %v519_v63 = vld [vmem:[#allocation5 + $0x368] sm:$0xff] }
  0x72   :  { %558 = vmatpush.msra.mxu0 %v412_v1  ;;  %578 = vmatpush.msra.mxu1 %v444_v2  ;;  %v479_v0 = vld [vmem:[#allocation5 + $0x228] sm:$0xff]  ;;  %v517_v1 = vld [vmem:[#allocation5 + $0x358] sm:$0xff] }
  0x73   :  { %598 = vmatpush.msra.mxu2 %v476_v3  ;;  %618 = vmatpush.msra.mxu3 %v508_v4  ;;  %v477_v2 = vld [vmem:[#allocation5 + $0x218] sm:$0xff]  ;;  %v515_v3 = vld [vmem:[#allocation5 + $0x348] sm:$0xff]  ;;  %v236_v4 = vld [vmem:[%s1937_s3] sm:$0xf] }
  0x74   :  { %559 = vmatpush.msra.mxu0 %v410_v5  ;;  %579 = vmatpush.msra.mxu1 %v442_v6  ;;  %v475_v5 = vld [vmem:[#allocation5 + $0x208] sm:$0xff]  ;;  %v513_v6 = vld [vmem:[#allocation5 + $0x338] sm:$0xff] }
  0x75   :  { %599 = vmatpush.msra.mxu2 %v474_v9  ;;  %619 = vmatpush.msra.mxu3 %v506_v28  ;;  %v509_v9 = vld [vmem:[#allocation5 + $0x318] sm:$0xff]  ;;  %v241_v28 = vperm.slane %v236_v4, 3 }
  0x76   :  { %624 = vmatpush.msrb.mxu0 %v441_v7  ;;  %644 = vmatpush.msrb.mxu1 %v473_v8  ;;  %v511_v7 = vld [vmem:[#allocation5 + $0x328] sm:$0xff]  ;;  %v238_v8 = vperm.slane %v236_v4, 0 }
  0x77   :  { %664 = vmatpush.msrb.mxu2 %v505_v12  ;;  %684 = vmatpush.msrb.mxu3 %v537_v32 }
  0x78   :  { %625 = vmatpush.msrb.mxu0 %v439_v10  ;;  %645 = vmatpush.msrb.mxu1 %v471_v11  ;;  %v239_v10 = vperm.slane %v236_v4, 1  ;;  %v507_v11 = vld [vmem:[#allocation5 + $0x308] sm:$0xff] }
  0x79   :  { %665 = vmatpush.msrb.mxu2 %v503_v15  ;;  %685 = vmatpush.msrb.mxu3 %v535_v36  ;;  %v719_v36 = vld [vmem:[%s1940_s6 + $0x68] sm:$0xff] }
  0x7a   :  { %626 = vmatpush.msrb.mxu0 %v437_v13  ;;  %646 = vmatpush.msrb.mxu1 %v469_v14 }
  0x7b   :  { %666 = vmatpush.msrb.mxu2 %v501_v27  ;;  %686 = vmatpush.msrb.mxu3 %v533_v40  ;;  %v716_v40 = vld [vmem:[%s1940_s6 + $0x50] sm:$0xff] }
  0x7c   :  { %627 = vmatpush.msrb.mxu0 %v435_v16  ;;  %647 = vmatpush.msrb.mxu1 %v467_v17 }
  0x7d   :  { %667 = vmatpush.msrb.mxu2 %v499_v31  ;;  %687 = vmatpush.msrb.mxu3 %v531_v44  ;;  %v714_v44 = vld [vmem:[%s1940_s6 + $0x40] sm:$0xff] }
  0x7e   :  { %628 = vmatpush.msrb.mxu0 %v433_v18  ;;  %648 = vmatpush.msrb.mxu1 %v465_v19 }
  0x7f   :  { %668 = vmatpush.msrb.mxu2 %v497_v35  ;;  %688 = vmatpush.msrb.mxu3 %v529_v48  ;;  %v720_v35 = vld [vmem:[%s1940_s6 + $0x70] sm:$0xff] }
  0x80   :  { %629 = vmatpush.msrb.mxu0 %v431_v20  ;;  %649 = vmatpush.msrb.mxu1 %v463_v21  ;;  %v721_v21 = vld [vmem:[%s1940_s6 + $0x78] sm:$0xff]  ;;  %v712_v48 = vld [vmem:[%s1940_s6 + $0x30] sm:$0xff] }
  0x81   :  { %669 = vmatpush.msrb.mxu2 %v495_v39  ;;  %689 = vmatpush.msrb.mxu3 %v527_v52  ;;  %v717_v39 = vld [vmem:[%s1940_s6 + $0x58] sm:$0xff]  ;;  %v710_v52 = vld [vmem:[%s1940_s6 + $0x20] sm:$0xff] }
  0x82   :  { %630 = vmatpush.msrb.mxu0 %v429_v22  ;;  %650 = vmatpush.msrb.mxu1 %v461_v23  ;;  %v240_v23 = vperm.slane %v236_v4, 2  ;;  %v807_v4 = vld [vmem:[%s1942_s8 + $0xc0] sm:$0xff] }
  0x83   :  { %670 = vmatpush.msrb.mxu2 %v493_v43  ;;  %690 = vmatpush.msrb.mxu3 %v525_v56  ;;  %v735_v43 = vld [vmem:[%s1940_s6 + $0xe8] sm:$0xff]  ;;  %v708_v56 = vld [vmem:[%s1940_s6 + $0x10] sm:$0xff] }
  0x84   :  { %631 = vmatpush.msrb.mxu0 %v427_v24  ;;  %651 = vmatpush.msrb.mxu1 %v459_v26 }
  0x85   :  { %671 = vmatpush.msrb.mxu2 %v491_v47  ;;  %691 = vmatpush.msrb.mxu3 %v523_v59  ;;  %v733_v47 = vld [vmem:[%s1940_s6 + $0xd8] sm:$0xff]  ;;  %v727_v59 = vld [vmem:[%s1940_s6 + $0xa8] sm:$0xff] }
  0x86   :  { %632 = vmatpush.msrb.mxu0 %v425_v25  ;;  %652 = vmatpush.msrb.mxu1 %v457_v30 }
  0x87   :  { %672 = vmatpush.msrb.mxu2 %v489_v51  ;;  %692 = vmatpush.msrb.mxu3 %v521_v61  ;;  %v731_v51 = vld [vmem:[%s1940_s6 + $0xc8] sm:$0xff]  ;;  %v726_v61 = vld [vmem:[%s1940_s6 + $0xa0] sm:$0xff] }
  0x88   :  { %633 = vmatpush.msrb.mxu0 %v423_v29  ;;  %653 = vmatpush.msrb.mxu1 %v455_v34 }
  0x89   :  { %673 = vmatpush.msrb.mxu2 %v487_v55  ;;  %693 = vmatpush.msrb.mxu3 %v519_v63  ;;  %v729_v55 = vld [vmem:[%s1940_s6 + $0xb8] sm:$0xff]  ;;  %v724_v63 = vld [vmem:[%s1940_s6 + $0x90] sm:$0xff] }
  0x8a   :  { %634 = vmatpush.msrb.mxu0 %v421_v33  ;;  %654 = vmatpush.msrb.mxu1 %v453_v38  ;;  %v737_v38 = vld [vmem:[%s1940_s6 + $0xf8] sm:$0xff] }
  0x8b   :  { %674 = vmatpush.msrb.mxu2 %v485_v58  ;;  %694 = vmatpush.msrb.mxu3 %v517_v1  ;;  %v707_v58 = vld [vmem:[%s1940_s6 + $0x8] sm:$0xff]  ;;  %v722_v1 = vld [vmem:[%s1940_s6 + $0x80] sm:$0xff] }
  0x8c   :  { %635 = vmatpush.msrb.mxu0 %v419_v37  ;;  %655 = vmatpush.msrb.mxu1 %v451_v42  ;;  %v718_v37 = vld [vmem:[%s1940_s6 + $0x60] sm:$0xff]  ;;  %v715_v42 = vld [vmem:[%s1940_s6 + $0x48] sm:$0xff] }
  0x8d   :  { %675 = vmatpush.msrb.mxu2 %v483_v60  ;;  %695 = vmatpush.msrb.mxu3 %v515_v3  ;;  %v706_v60 = vld [vmem:[%s1940_s6] sm:$0xff]  ;;  %v812_v3 = vld [vmem:[%s1942_s8 + $0xe8] sm:$0xff] }
  0x8e   :  { %636 = vmatpush.msrb.mxu0 %v417_v41  ;;  %656 = vmatpush.msrb.mxu1 %v449_v46  ;;  %v736_v41 = vld [vmem:[%s1940_s6 + $0xf0] sm:$0xff]  ;;  %v713_v46 = vld [vmem:[%s1940_s6 + $0x38] sm:$0xff] }
  0x8f   :  { %676 = vmatpush.msrb.mxu2 %v481_v62  ;;  %696 = vmatpush.msrb.mxu3 %v513_v6  ;;  %v725_v62 = vld [vmem:[%s1940_s6 + $0x98] sm:$0xff]  ;;  %v803_v6 = vld [vmem:[%s1942_s8 + $0xa0] sm:$0xff] }
  0x90   :  { %637 = vmatpush.msrb.mxu0 %v415_v45  ;;  %657 = vmatpush.msrb.mxu1 %v447_v50  ;;  %v734_v45 = vld [vmem:[%s1940_s6 + $0xe0] sm:$0xff]  ;;  %v711_v50 = vld [vmem:[%s1940_s6 + $0x28] sm:$0xff] }
  0x91   :  { %677 = vmatpush.msrb.mxu2 %v479_v0  ;;  %697 = vmatpush.msrb.mxu3 %v511_v7  ;;  %v723_v0 = vld [vmem:[%s1940_s6 + $0x88] sm:$0xff] }
  0x92   :  { %638 = vmatpush.msrb.mxu0 %v413_v49  ;;  %658 = vmatpush.msrb.mxu1 %v445_v54  ;;  %v732_v49 = vld [vmem:[%s1940_s6 + $0xd0] sm:$0xff]  ;;  %v709_v54 = vld [vmem:[%s1940_s6 + $0x18] sm:$0xff]  ;;  %v804_v7 = vld [vmem:[%s1942_s8 + $0xa8] sm:$0xff] }
  0x93   :  { %678 = vmatpush.msrb.mxu2 %v477_v2  ;;  %698 = vmatpush.msrb.mxu3 %v509_v9  ;;  %v811_v2 = vld [vmem:[%s1942_s8 + $0xe0] sm:$0xff]  ;;  %v800_v9 = vld [vmem:[%s1942_s8 + $0x88] sm:$0xff] }
  0x94   :  { %639 = vmatpush.msrb.mxu0 %v411_v53  ;;  %659 = vmatpush.msrb.mxu1 %v443_v57  ;;  %v730_v53 = vld [vmem:[%s1940_s6 + $0xc0] sm:$0xff]  ;;  %v728_v57 = vld [vmem:[%s1940_s6 + $0xb0] sm:$0xff] }
  0x95   :  { %679 = vmatpush.msrb.mxu2 %v475_v5  ;;  %699 = vmatpush.msrb.mxu3 %v507_v11  ;;  %v808_v5 = vld [vmem:[%s1942_s8 + $0xc8] sm:$0xff]  ;;  %v795_v11 = vld [vmem:[%s1942_s8 + $0x60] sm:$0xff] }
  0xc3   :  { %v263_v12 = vpop.f32.mrf.mxu0 }
  0xc4   :  { %v264_v13 = vadd.f32 %v263_v12, %v238_v8  ;;  %v303_v14 = vpop.f32.mrf.mxu2  ;;  %v799_v8 = vld [vmem:[%s1942_s8 + $0x80] sm:$0xff]  ;;  %v796_v12 = vld [vmem:[%s1942_s8 + $0x68] sm:$0xff] }
  0xc5   :  { %v283_v15 = vpop.f32.mrf.mxu1  ;;  %v304_v16 = vadd.f32 %v303_v14, %v239_v10  ;;  %v538_v10 = vld [vmem:[%s1939_s5] sm:$0x3] }
  0xc6   :  { %v284_v17 = vadd.f32 %v283_v15, %v264_v13  ;;  %v540_v14 = vperm.slane %v538_v10, 0  ;;  %v791_v15 = vld [vmem:[%s1942_s8 + $0x40] sm:$0xff] }
  0xc7   :  { %v323_v18 = vpop.f32.mrf.mxu3 }
  0xc8   :  { %v406_v19 = vmax.f32 %v284_v17, 0.0  ;;  %v324_v20 = vadd.f32 %v323_v18, %v304_v16  ;;  %v792_v16 = vld [vmem:[%s1942_s8 + $0x48] sm:$0xff] }
  0xca   :  { %v407_v22 = vmax.f32 %v324_v20, 0.0  ;;  %560 = vmatmul.f32.vlgmr.msra.gmra.mxu0 %v406_v19 }
  0xcb   :  { %742 = vmatpush.msra.mxu0 %v721_v21  ;;  %v541_v21 = vperm.slane %v538_v10, 1  ;;  %v925_v10 = vld [vmem:[#allocation7 + $0x60] sm:$0xff] }
  0xcc   :  { %580 = vmatmul.f32.vlgmr.msra.gmra.mxu1 %v407_v22 }
  0xcd   :  { %743 = vmatpush.msra.mxu0 %v720_v35  ;;  %762 = vmatpush.msra.mxu1 %v737_v38  ;;  %v787_v35 = vld [vmem:[%s1942_s8 + $0x20] sm:$0xff]  ;;  %v784_v38 = vld [vmem:[%s1942_s8 + $0x8] sm:$0xff] }
  0xcf   :  { %744 = vmatpush.msra.mxu0 %v719_v36  ;;  %763 = vmatpush.msra.mxu1 %v736_v41  ;;  %v788_v36 = vld [vmem:[%s1942_s8 + $0x28] sm:$0xff]  ;;  %v809_v41 = vld [vmem:[%s1942_s8 + $0xd0] sm:$0xff] }
  0xd0   :  { %v343_v24 = vpop.f32.mrf.mxu0 }
  0xd1   :  { %v344_v25 = vadd.f32 %v343_v24, %v240_v23  ;;  %745 = vmatpush.msra.mxu0 %v718_v37  ;;  %764 = vmatpush.msra.mxu1 %v735_v43  ;;  %v783_v37 = vld [vmem:[%s1942_s8] sm:$0xff]  ;;  %v805_v43 = vld [vmem:[%s1942_s8 + $0xb0] sm:$0xff] }
  0xd2   :  { %v363_v26 = vpop.f32.mrf.mxu1  ;;  %640 = vmatmul.f32.vlgmr.msrb.gmra.mxu0 %v406_v19 }
  0xd3   :  { %v364_v27 = vadd.f32 %v363_v26, %v344_v25  ;;  %746 = vmatpush.msra.mxu0 %v717_v39  ;;  %765 = vmatpush.msra.mxu1 %v734_v45  ;;  %v813_v39 = vld [vmem:[%s1942_s8 + $0xf0] sm:$0xff] }
  0xd4   :  { %660 = vmatmul.f32.vlgmr.msrb.gmra.mxu1 %v407_v22  ;;  %v801_v45 = vld [vmem:[%s1942_s8 + $0x90] sm:$0xff] }
  0xd5   :  { %v408_v29 = vmax.f32 %v364_v27, 0.0  ;;  %747 = vmatpush.msra.mxu0 %v716_v40  ;;  %766 = vmatpush.msra.mxu1 %v733_v47  ;;  %v814_v40 = vld [vmem:[%s1942_s8 + $0xf8] sm:$0xff]  ;;  %v797_v47 = vld [vmem:[%s1942_s8 + $0x70] sm:$0xff] }
  0xd6   :  { %v383_v30 = vpop.f32.mrf.mxu2 }
  0xd7   :  { %v384_v31 = vadd.f32 %v383_v30, %v241_v28  ;;  %600 = vmatmul.f32.vlgmr.msra.gmra.mxu2 %v408_v29  ;;  %748 = vmatpush.msra.mxu0 %v715_v42  ;;  %v810_v42 = vld [vmem:[%s1942_s8 + $0xd8] sm:$0xff] }
  0xd8   :  { %v403_v32 = vpop.f32.mrf.mxu3  ;;  %767 = vmatpush.msra.mxu1 %v732_v49  ;;  %837 = vmatpush.msra.mxu2 %v811_v2  ;;  %v793_v49 = vld [vmem:[%s1942_s8 + $0x50] sm:$0xff]  ;;  %v965_v2 = vld [vmem:[#allocation7 + $0x1a0] sm:$0xff] }
  0xd9   :  { %v404_v33 = vadd.f32 %v403_v32, %v384_v31  ;;  %749 = vmatpush.msra.mxu0 %v714_v44  ;;  %v806_v44 = vld [vmem:[%s1942_s8 + $0xb8] sm:$0xff] }
  0xda   :  { %768 = vmatpush.msra.mxu1 %v731_v51  ;;  %838 = vmatpush.msra.mxu2 %v807_v4  ;;  %v789_v51 = vld [vmem:[%s1942_s8 + $0x30] sm:$0xff] }
  0xdb   :  { %v409_v34 = vmax.f32 %v404_v33, 0.0  ;;  %750 = vmatpush.msra.mxu0 %v713_v46  ;;  %v802_v46 = vld [vmem:[%s1942_s8 + $0x98] sm:$0xff]  ;;  %v963_v4 = vld [vmem:[#allocation7 + $0x190] sm:$0xff] }
  0xdc   :  { %769 = vmatpush.msra.mxu1 %v730_v53  ;;  %839 = vmatpush.msra.mxu2 %v803_v6  ;;  %v785_v53 = vld [vmem:[%s1942_s8 + $0x10] sm:$0xff]  ;;  %v961_v6 = vld [vmem:[#allocation7 + $0x180] sm:$0xff] }
  0xdd   :  { %620 = vmatmul.f32.vlgmr.msra.gmra.mxu3 %v409_v34  ;;  %751 = vmatpush.msra.mxu0 %v712_v48  ;;  %v798_v48 = vld [vmem:[%s1942_s8 + $0x78] sm:$0xff] }
  0xde   :  { %770 = vmatpush.msra.mxu1 %v729_v55  ;;  %857 = vmatpush.msra.mxu3 %v812_v3  ;;  %v943_v55 = vld [vmem:[#allocation7 + $0xf0] sm:$0xff] }
  0xdf   :  { %680 = vmatmul.f32.vlgmr.msrb.gmra.mxu2 %v408_v29  ;;  %752 = vmatpush.msra.mxu0 %v711_v50  ;;  %v794_v50 = vld [vmem:[%s1942_s8 + $0x58] sm:$0xff]  ;;  %v931_v3 = vld [vmem:[#allocation7 + $0x90] sm:$0xff] }
  0xe0   :  { %771 = vmatpush.msra.mxu1 %v728_v57  ;;  %858 = vmatpush.msra.mxu3 %v808_v5  ;;  %v941_v57 = vld [vmem:[#allocation7 + $0xe0] sm:$0xff] }
  0xe1   :  { %753 = vmatpush.msra.mxu0 %v710_v52  ;;  %840 = vmatpush.msra.mxu2 %v799_v8  ;;  %v790_v52 = vld [vmem:[%s1942_s8 + $0x38] sm:$0xff]  ;;  %v929_v5 = vld [vmem:[#allocation7 + $0x80] sm:$0xff]  ;;  %v959_v8 = vld [vmem:[#allocation7 + $0x170] sm:$0xff] }
  0xe2   :  { %772 = vmatpush.msra.mxu1 %v727_v59  ;;  %859 = vmatpush.msra.mxu3 %v804_v7  ;;  %v939_v59 = vld [vmem:[#allocation7 + $0xd0] sm:$0xff] }
  0xe3   :  { %754 = vmatpush.msra.mxu0 %v709_v54  ;;  %841 = vmatpush.msra.mxu2 %v795_v11  ;;  %v786_v54 = vld [vmem:[%s1942_s8 + $0x18] sm:$0xff]  ;;  %v927_v7 = vld [vmem:[#allocation7 + $0x70] sm:$0xff]  ;;  %v957_v11 = vld [vmem:[#allocation7 + $0x160] sm:$0xff] }
  0xe4   :  { %773 = vmatpush.msra.mxu1 %v726_v61  ;;  %860 = vmatpush.msra.mxu3 %v800_v9  ;;  %v937_v61 = vld [vmem:[#allocation7 + $0xc0] sm:$0xff] }
  0xe5   :  { %700 = vmatmul.f32.vlgmr.msrb.gmra.mxu3 %v409_v34  ;;  %755 = vmatpush.msra.mxu0 %v708_v56  ;;  %v975_v56 = vld [vmem:[#allocation7 + $0x1f0] sm:$0xff]  ;;  %v1358_v9 = vld [vmem:[%s1941_s7] ss:$0 sm:$0xff] }
  0xe6   :  { %774 = vmatpush.msra.mxu1 %v725_v62  ;;  %861 = vmatpush.msra.mxu3 %v796_v12  ;;  %v969_v62 = vld [vmem:[#allocation7 + $0x1c0] sm:$0xff] }
  0xe7   :  { %756 = vmatpush.msra.mxu0 %v707_v58  ;;  %842 = vmatpush.msra.mxu2 %v791_v15  ;;  %v973_v58 = vld [vmem:[#allocation7 + $0x1e0] sm:$0xff] }
  0xe8   :  { %775 = vmatpush.msra.mxu1 %v724_v63  ;;  %862 = vmatpush.msra.mxu3 %v792_v16  ;;  %v935_v63 = vld [vmem:[#allocation7 + $0xb0] sm:$0xff]  ;;  %v921_v16 = vld [vmem:[#allocation7 + $0x40] sm:$0xff] }
  0xe9   :  { %757 = vmatpush.msra.mxu0 %v706_v60  ;;  %843 = vmatpush.msra.mxu2 %v787_v35  ;;  %v971_v60 = vld [vmem:[#allocation7 + $0x1d0] sm:$0xff] }
  0xea   :  { %776 = vmatpush.msra.mxu1 %v723_v0  ;;  %863 = vmatpush.msra.mxu3 %v788_v36  ;;  %v967_v0 = vld [vmem:[#allocation7 + $0x1b0] sm:$0xff]  ;;  %v913_v36 = vld [vmem:[#allocation7] sm:$0xff] }
  0xeb   :  { %844 = vmatpush.msra.mxu2 %v783_v37  ;;  %1047 = vmatpush.msrb.mxu0 %v943_v55  ;;  %v1031_v35 = vld [vmem:[#allocation7 + $0x3b0] sm:$0xff]  ;;  %v945_v37 = vld [vmem:[#allocation7 + $0x100] sm:$0xff] }
  0xec   :  { %777 = vmatpush.msra.mxu1 %v722_v1  ;;  %864 = vmatpush.msra.mxu3 %v784_v38  ;;  %v933_v1 = vld [vmem:[#allocation7 + $0xa0] sm:$0xff] }
  0xed   :  { %877 = vmatpush.msrb.mxu2 %v813_v39  ;;  %1048 = vmatpush.msrb.mxu0 %v941_v57  ;;  %v997_v38 = vld [vmem:[#allocation7 + $0x2a0] sm:$0xff]  ;;  %v968_v57 = vld [vmem:[#allocation7 + $0x1b8] sm:$0xff] }
  0xee   :  { %897 = vmatpush.msrb.mxu3 %v814_v40  ;;  %1067 = vmatpush.msrb.mxu1 %v975_v56  ;;  %v1029_v39 = vld [vmem:[#allocation7 + $0x3a0] sm:$0xff]  ;;  %v944_v40 = vld [vmem:[#allocation7 + $0xf8] sm:$0xff] }
  0xef   :  { %878 = vmatpush.msrb.mxu2 %v809_v41  ;;  %1049 = vmatpush.msrb.mxu0 %v939_v59  ;;  %v976_v41 = vld [vmem:[#allocation7 + $0x1f8] sm:$0xff]  ;;  %v1021_v55 = vld [vmem:[#allocation7 + $0x360] sm:$0xff]  ;;  %v1019_v59 = vld [vmem:[#allocation7 + $0x350] sm:$0xff] }
  0xf0   :  { %898 = vmatpush.msrb.mxu3 %v810_v42  ;;  %1068 = vmatpush.msrb.mxu1 %v973_v58  ;;  %v995_v42 = vld [vmem:[#allocation7 + $0x290] sm:$0xff]  ;;  %v936_v56 = vld [vmem:[#allocation7 + $0xb8] sm:$0xff] }
  0xf1   :  { %879 = vmatpush.msrb.mxu2 %v805_v43  ;;  %1050 = vmatpush.msrb.mxu0 %v937_v61  ;;  %v1027_v43 = vld [vmem:[#allocation7 + $0x390] sm:$0xff]  ;;  %v966_v61 = vld [vmem:[#allocation7 + $0x1a8] sm:$0xff] }
  0xf2   :  { %899 = vmatpush.msrb.mxu3 %v806_v44  ;;  %1069 = vmatpush.msrb.mxu1 %v971_v60  ;;  %v942_v44 = vld [vmem:[#allocation7 + $0xe8] sm:$0xff]  ;;  %v987_v58 = vld [vmem:[#allocation7 + $0x250] sm:$0xff] }
  0xf3   :  { %880 = vmatpush.msrb.mxu2 %v801_v45  ;;  %1051 = vmatpush.msrb.mxu0 %v935_v63  ;;  %v974_v45 = vld [vmem:[#allocation7 + $0x1e8] sm:$0xff]  ;;  %v1017_v63 = vld [vmem:[#allocation7 + $0x340] sm:$0xff] }
  0xf4   :  { %900 = vmatpush.msrb.mxu3 %v802_v46  ;;  %1070 = vmatpush.msrb.mxu1 %v969_v62  ;;  %v993_v46 = vld [vmem:[#allocation7 + $0x280] sm:$0xff]  ;;  %v934_v60 = vld [vmem:[#allocation7 + $0xa8] sm:$0xff] }
  0xf5   :  { %881 = vmatpush.msrb.mxu2 %v797_v47  ;;  %1052 = vmatpush.msrb.mxu0 %v933_v1  ;;  %v1025_v47 = vld [vmem:[#allocation7 + $0x380] sm:$0xff]  ;;  %v964_v1 = vld [vmem:[#allocation7 + $0x198] sm:$0xff] }
  0xf6   :  { %901 = vmatpush.msrb.mxu3 %v798_v48  ;;  %1071 = vmatpush.msrb.mxu1 %v967_v0  ;;  %v940_v48 = vld [vmem:[#allocation7 + $0xd8] sm:$0xff]  ;;  %v985_v62 = vld [vmem:[#allocation7 + $0x240] sm:$0xff] }
  0xf7   :  { %882 = vmatpush.msrb.mxu2 %v793_v49  ;;  %1053 = vmatpush.msrb.mxu0 %v931_v3  ;;  %v972_v49 = vld [vmem:[#allocation7 + $0x1d8] sm:$0xff]  ;;  %v1015_v3 = vld [vmem:[#allocation7 + $0x330] sm:$0xff] }
  0xf8   :  { %902 = vmatpush.msrb.mxu3 %v794_v50  ;;  %1072 = vmatpush.msrb.mxu1 %v965_v2  ;;  %v991_v50 = vld [vmem:[#allocation7 + $0x270] sm:$0xff]  ;;  %v932_v0 = vld [vmem:[#allocation7 + $0x98] sm:$0xff] }
  0xf9   :  { %883 = vmatpush.msrb.mxu2 %v789_v51  ;;  %1054 = vmatpush.msrb.mxu0 %v929_v5  ;;  %v1023_v51 = vld [vmem:[#allocation7 + $0x370] sm:$0xff]  ;;  %v962_v5 = vld [vmem:[#allocation7 + $0x188] sm:$0xff] }
  0xfa   :  { %903 = vmatpush.msrb.mxu3 %v790_v52  ;;  %1073 = vmatpush.msrb.mxu1 %v963_v4  ;;  %v938_v52 = vld [vmem:[#allocation7 + $0xc8] sm:$0xff]  ;;  %v983_v2 = vld [vmem:[#allocation7 + $0x230] sm:$0xff] }
  0xfb   :  { %884 = vmatpush.msrb.mxu2 %v785_v53  ;;  %1055 = vmatpush.msrb.mxu0 %v927_v7  ;;  %v970_v53 = vld [vmem:[#allocation7 + $0x1c8] sm:$0xff]  ;;  %v1013_v7 = vld [vmem:[#allocation7 + $0x320] sm:$0xff] }
  0xfc   :  { %904 = vmatpush.msrb.mxu3 %v786_v54  ;;  %1074 = vmatpush.msrb.mxu1 %v961_v6  ;;  %v989_v54 = vld [vmem:[#allocation7 + $0x260] sm:$0xff]  ;;  %v930_v4 = vld [vmem:[#allocation7 + $0x88] sm:$0xff] }
  0xfd   :  { %1056 = vmatpush.msrb.mxu0 %v925_v10  ;;  %v981_v6 = vld [vmem:[#allocation7 + $0x220] sm:$0xff]  ;;  %v979_v10 = vld [vmem:[#allocation7 + $0x210] sm:$0xff] }
  0xfe   :  { %1075 = vmatpush.msrb.mxu1 %v959_v8  ;;  %v928_v8 = vld [vmem:[#allocation7 + $0x78] sm:$0xff] }
 0x100   :  { %1076 = vmatpush.msrb.mxu1 %v957_v11  ;;  %v1011_v11 = vld [vmem:[#allocation7 + $0x310] sm:$0xff] }
 0x147   :  { %v561_v13 = vpop.f32.mrf.mxu0 }
 0x148   :  { %v562_v18 = vadd.f32 %v561_v13, %v540_v14  ;;  %v923_v13 = vld [vmem:[#allocation7 + $0x50] sm:$0xff] }
 0x149   :  { %v581_v17 = vpop.f32.mrf.mxu1  ;;  %v955_v14 = vld [vmem:[#allocation7 + $0x150] sm:$0xff]  ;;  %1057 = vmatpush.msrb.mxu0 %v923_v13  ;;  %v1009_v13 = vld [vmem:[#allocation7 + $0x300] sm:$0xff] }
 0x14a   :  { %v582_v20 = vadd.f32 %v581_v17, %v562_v18  ;;  %v953_v17 = vld [vmem:[#allocation7 + $0x140] sm:$0xff]  ;;  %1077 = vmatpush.msrb.mxu1 %v955_v14  ;;  %v1008_v14 = vld [vmem:[#allocation7 + $0x2f8] sm:$0xff] }
 0x14b   :  { %1058 = vmatpush.msrb.mxu0 %v921_v16  ;;  %v1006_v16 = vld [vmem:[#allocation7 + $0x2e8] sm:$0xff] }
 0x14c   :  { %1078 = vmatpush.msrb.mxu1 %v953_v17  ;;  %v1038_v17 = vld [vmem:[#allocation7 + $0x3e8] sm:$0xff] }
 0x14f   :  { %v641_v22 = vpop.f32.mrf.mxu0 }
 0x150   :  { %v642_v25 = vadd.f32 %v641_v22, %v541_v21  ;;  %v1039_v21 = vld [vmem:[#allocation7 + $0x3f0] sm:$0xff] }
 0x151   :  { %v661_v27 = vpop.f32.mrf.mxu1  ;;  %v919_v22 = vld [vmem:[#allocation7 + $0x30] sm:$0xff] }
 0x152   :  { %v662_v30 = vadd.f32 %v661_v27, %v642_v25  ;;  %v1037_v25 = vld [vmem:[#allocation7 + $0x3e0] sm:$0xff]  ;;  %1059 = vmatpush.msrb.mxu0 %v919_v22  ;;  %v1000_v22 = vld [vmem:[#allocation7 + $0x2b8] sm:$0xff] }
 0x153   :  { %v949_v27 = vld [vmem:[#allocation7 + $0x120] sm:$0xff] }
 0x15a   :  { %v601_v19 = vpop.f32.mrf.mxu2 }
 0x15b   :  { %v602_v23 = vadd.f32 %v601_v19, %v582_v20  ;;  %v1007_v20 = vld [vmem:[#allocation7 + $0x2f0] sm:$0xff] }
 0x160   :  { %v621_v24 = vpop.f32.mrf.mxu3 }
 0x161   :  { %v622_v26 = vadd.f32 %v621_v24, %v602_v23  ;;  %v951_v23 = vld [vmem:[#allocation7 + $0x130] sm:$0xff]  ;;  %v1005_v24 = vld [vmem:[#allocation7 + $0x2e0] sm:$0xff] }
 0x162   :  { %v681_v29 = vpop.f32.mrf.mxu2  ;;  %1079 = vmatpush.msrb.mxu1 %v951_v23  ;;  %v1032_v23 = vld [vmem:[#allocation7 + $0x3b8] sm:$0xff] }
 0x163   :  { %v704_v28 = vmax.f32 %v622_v26, 0.0  ;;  %v682_v31 = vadd.f32 %v681_v29, %v662_v30  ;;  %v917_v26 = vld [vmem:[#allocation7 + $0x20] sm:$0xff]  ;;  %v1035_v29 = vld [vmem:[#allocation7 + $0x3d0] sm:$0xff] }
 0x164   :  { %v915_v30 = vld [vmem:[#allocation7 + $0x10] sm:$0xff]  ;;  %1060 = vmatpush.msrb.mxu0 %v917_v26  ;;  %1080 = vmatpush.msrb.mxu1 %v949_v27  ;;  %v998_v26 = vld [vmem:[#allocation7 + $0x2a8] sm:$0xff] }
 0x165   :  { %758 = vmatmul.f32.vlgmr.msra.gmra.mxu0 %v704_v28  ;;  %v1003_v28 = vld [vmem:[#allocation7 + $0x2d0] sm:$0xff]  ;;  %v1030_v27 = vld [vmem:[#allocation7 + $0x3a8] sm:$0xff] }
 0x166   :  { %1061 = vmatpush.msrb.mxu0 %v915_v30  ;;  %v996_v30 = vld [vmem:[#allocation7 + $0x298] sm:$0xff] }
 0x168   :  { %v701_v32 = vpop.f32.mrf.mxu3  ;;  %1062 = vmatpush.msrb.mxu0 %v913_v36  ;;  %v920_v36 = vld [vmem:[#allocation7 + $0x38] sm:$0xff] }
 0x169   :  { %v702_v33 = vadd.f32 %v701_v32, %v682_v31  ;;  %v947_v31 = vld [vmem:[#allocation7 + $0x110] sm:$0xff]  ;;  %v1001_v32 = vld [vmem:[#allocation7 + $0x2c0] sm:$0xff] }
 0x16a   :  { %1081 = vmatpush.msrb.mxu1 %v947_v31  ;;  %1127 = vmatpush.msra.mxu0 %v944_v40  ;;  %v1028_v31 = vld [vmem:[#allocation7 + $0x398] sm:$0xff]  ;;  %v918_v40 = vld [vmem:[#allocation7 + $0x28] sm:$0xff] }
 0x16b   :  { %v705_v34 = vmax.f32 %v702_v33, 0.0  ;;  %v1033_v33 = vld [vmem:[#allocation7 + $0x3c0] sm:$0xff] }
 0x16c   :  { %1082 = vmatpush.msrb.mxu1 %v945_v37  ;;  %1128 = vmatpush.msra.mxu0 %v942_v44  ;;  %v952_v37 = vld [vmem:[#allocation7 + $0x138] sm:$0xff] }
 0x16d   :  { %778 = vmatmul.f32.vlgmr.msra.gmra.mxu1 %v705_v34  ;;  %v999_v34 = vld [vmem:[#allocation7 + $0x2b0] sm:$0xff]  ;;  %v916_v44 = vld [vmem:[#allocation7 + $0x18] sm:$0xff] }
 0x16e   :  { %1147 = vmatpush.msra.mxu1 %v976_v41  ;;  %1129 = vmatpush.msra.mxu0 %v940_v48  ;;  %v950_v41 = vld [vmem:[#allocation7 + $0x128] sm:$0xff] }
 0x16f   :  { %v914_v48 = vld [vmem:[#allocation7 + $0x8] sm:$0xff] }
 0x170   :  { %1148 = vmatpush.msra.mxu1 %v974_v45  ;;  %1130 = vmatpush.msra.mxu0 %v938_v52  ;;  %v948_v45 = vld [vmem:[#allocation7 + $0x118] sm:$0xff] }
 0x171   :  { %v984_v52 = vld [vmem:[#allocation7 + $0x238] sm:$0xff] }
 0x172   :  { %1149 = vmatpush.msra.mxu1 %v972_v49  ;;  %1131 = vmatpush.msra.mxu0 %v936_v56  ;;  %v946_v49 = vld [vmem:[#allocation7 + $0x108] sm:$0xff]  ;;  %v980_v56 = vld [vmem:[#allocation7 + $0x218] sm:$0xff] }
 0x174   :  { %1150 = vmatpush.msra.mxu1 %v970_v53  ;;  %1132 = vmatpush.msra.mxu0 %v934_v60  ;;  %v1016_v53 = vld [vmem:[#allocation7 + $0x338] sm:$0xff]  ;;  %v815_v60 = vld [vmem:[%s1943_s9] sm:$0xf] }
 0x176   :  { %1151 = vmatpush.msra.mxu1 %v968_v57  ;;  %1133 = vmatpush.msra.mxu0 %v932_v0  ;;  %v1012_v57 = vld [vmem:[#allocation7 + $0x318] sm:$0xff] }
 0x178   :  { %1152 = vmatpush.msra.mxu1 %v966_v61  ;;  %1134 = vmatpush.msra.mxu0 %v930_v4  ;;  %v817_v61 = vperm.slane %v815_v60, 0 }
 0x17a   :  { %1153 = vmatpush.msra.mxu1 %v964_v1  ;;  %1135 = vmatpush.msra.mxu0 %v928_v8 }
 0x17c   :  { %1154 = vmatpush.msra.mxu1 %v962_v5  ;;  %v819_v5 = vperm.slane %v815_v60, 2 }
 0x1e2   :  { %v759_v12 = vpop.f32.mrf.mxu0 }
 0x1e3   :  { %v760_v15 = vadd.f32 %v1358_v9, %v759_v12  ;;  %v960_v9 = vld [vmem:[#allocation7 + $0x178] sm:$0xff]  ;;  %v977_v12 = vld [vmem:[#allocation7 + $0x200] sm:$0xff] }
 0x1e4   :  { %1155 = vmatpush.msra.mxu1 %v960_v9 }
 0x1ea   :  { %v779_v18 = vpop.f32.mrf.mxu1 }
 0x1eb   :  { %v780_v19 = vadd.f32 %v779_v18, %v760_v15  ;;  %v1040_v15 = vld [vmem:[#allocation7 + $0x3f8] sm:$0xff] }
 0x1ec   :  { %v1004_v18 = vld [vmem:[#allocation7 + $0x2d8] sm:$0xff] }
 0x1ed   :  { %782 = vst [vmem:[%s1947_s13] sm:$0xff] %v780_v19  ;;  %1345 = vmatmul.msk.f32.vlgmr.msra.gmra.mxu2 %vm825_vm0, %v780_v19  ;;  %1346 = vmatmul.msk.f32.vlgmr.msra.gmra.mxu3 %vm825_vm0, %v780_v19 }
 0x1ee   :  { %1087 = vmatpush.msra.mxu2 %v1007_v20  ;;  %1107 = vmatpush.msra.mxu3 %v1039_v21  ;;  %v1002_v20 = vld [vmem:[#allocation7 + $0x2c8] sm:$0xff] }
 0x1ef   :  { %v1034_v21 = vld [vmem:[#allocation7 + $0x3c8] sm:$0xff] }
 0x1f0   :  { %1088 = vmatpush.msra.mxu2 %v1005_v24  ;;  %1108 = vmatpush.msra.mxu3 %v1037_v25  ;;  %v926_v24 = vld [vmem:[#allocation7 + $0x68] sm:$0xff] }
 0x1f1   :  { %v958_v25 = vld [vmem:[#allocation7 + $0x168] sm:$0xff]  ;;  %1136 = vmatpush.msra.mxu0 %v926_v24 }
 0x1f2   :  { %1089 = vmatpush.msra.mxu2 %v1003_v28  ;;  %1109 = vmatpush.msra.mxu3 %v1035_v29  ;;  %v924_v28 = vld [vmem:[#allocation7 + $0x58] sm:$0xff] }
 0x1f3   :  { %1156 = vmatpush.msra.mxu1 %v958_v25  ;;  %v956_v29 = vld [vmem:[#allocation7 + $0x158] sm:$0xff]  ;;  %1137 = vmatpush.msra.mxu0 %v924_v28 }
 0x1f4   :  { %1090 = vmatpush.msra.mxu2 %v1001_v32  ;;  %1110 = vmatpush.msra.mxu3 %v1033_v33  ;;  %v922_v32 = vld [vmem:[#allocation7 + $0x48] sm:$0xff] }
 0x1f5   :  { %1347 = vmatmul.msk.f32.vlgmr.msrb.gmra.mxu2 %vm825_vm0, %v780_v19  ;;  %1348 = vmatmul.msk.f32.vlgmr.msrb.gmra.mxu3 %vm825_vm0, %v780_v19  ;;  %v1036_v19 = vld [vmem:[#allocation7 + $0x3d8] sm:$0xff]  ;;  %v954_v33 = vld [vmem:[#allocation7 + $0x148] sm:$0xff] }
 0x1f6   :  { %1091 = vmatpush.msra.mxu2 %v999_v34  ;;  %1111 = vmatpush.msra.mxu3 %v1031_v35  ;;  %v994_v34 = vld [vmem:[#allocation7 + $0x288] sm:$0xff] }
 0x1f7   :  { %1157 = vmatpush.msra.mxu1 %v956_v29  ;;  %1138 = vmatpush.msra.mxu0 %v922_v32  ;;  %v1026_v35 = vld [vmem:[#allocation7 + $0x388] sm:$0xff] }
 0x1f8   :  { %1092 = vmatpush.msra.mxu2 %v997_v38  ;;  %1112 = vmatpush.msra.mxu3 %v1029_v39  ;;  %v992_v38 = vld [vmem:[#allocation7 + $0x278] sm:$0xff] }
 0x1f9   :  { %1158 = vmatpush.msra.mxu1 %v954_v33  ;;  %1139 = vmatpush.msra.mxu0 %v920_v36  ;;  %v1024_v39 = vld [vmem:[#allocation7 + $0x378] sm:$0xff] }
 0x1fa   :  { %1093 = vmatpush.msra.mxu2 %v995_v42  ;;  %1113 = vmatpush.msra.mxu3 %v1027_v43  ;;  %v990_v42 = vld [vmem:[#allocation7 + $0x268] sm:$0xff] }
 0x1fb   :  { %1159 = vmatpush.msra.mxu1 %v952_v37  ;;  %1140 = vmatpush.msra.mxu0 %v918_v40  ;;  %v1022_v43 = vld [vmem:[#allocation7 + $0x368] sm:$0xff] }
 0x1fc   :  { %1094 = vmatpush.msra.mxu2 %v993_v46  ;;  %1114 = vmatpush.msra.mxu3 %v1025_v47  ;;  %v988_v46 = vld [vmem:[#allocation7 + $0x258] sm:$0xff] }
 0x1fd   :  { %1160 = vmatpush.msra.mxu1 %v950_v41  ;;  %1141 = vmatpush.msra.mxu0 %v916_v44  ;;  %v1020_v47 = vld [vmem:[#allocation7 + $0x358] sm:$0xff] }
 0x1fe   :  { %1095 = vmatpush.msra.mxu2 %v991_v50  ;;  %1115 = vmatpush.msra.mxu3 %v1023_v51  ;;  %v986_v50 = vld [vmem:[#allocation7 + $0x248] sm:$0xff] }
 0x1ff   :  { %1161 = vmatpush.msra.mxu1 %v948_v45  ;;  %1142 = vmatpush.msra.mxu0 %v914_v48  ;;  %v1018_v51 = vld [vmem:[#allocation7 + $0x348] sm:$0xff]  ;;  %v1260_v48 = vld [vmem:[%s1946_s12 + $0xd8] sm:$0xff] }
 0x200   :  { %1096 = vmatpush.msra.mxu2 %v989_v54  ;;  %1116 = vmatpush.msra.mxu3 %v1021_v55  ;;  %v982_v54 = vld [vmem:[#allocation7 + $0x228] sm:$0xff] }
 0x201   :  { %1162 = vmatpush.msra.mxu1 %v946_v49  ;;  %v1014_v55 = vld [vmem:[#allocation7 + $0x328] sm:$0xff]  ;;  %v1243_v49 = vld [vmem:[%s1946_s12 + $0x50] sm:$0xff] }
 0x202   :  { %1097 = vmatpush.msra.mxu2 %v987_v58  ;;  %1117 = vmatpush.msra.mxu3 %v1019_v59  ;;  %v978_v58 = vld [vmem:[#allocation7 + $0x208] sm:$0xff] }
 0x203   :  { %v1010_v59 = vld [vmem:[#allocation7 + $0x308] sm:$0xff] }
 0x204   :  { %1098 = vmatpush.msra.mxu2 %v985_v62  ;;  %1118 = vmatpush.msra.mxu3 %v1017_v63  ;;  %v818_v62 = vperm.slane %v815_v60, 1 }
 0x206   :  { %1099 = vmatpush.msra.mxu2 %v983_v2  ;;  %1119 = vmatpush.msra.mxu3 %v1015_v3 }
 0x208   :  { %1100 = vmatpush.msra.mxu2 %v981_v6  ;;  %1120 = vmatpush.msra.mxu3 %v1013_v7  ;;  %v820_v6 = vperm.slane %v815_v60, 3  ;;  %v1254_v60 = vld [vmem:[%s1946_s12 + $0xa8] sm:$0xff] }
 0x20a   :  { %1101 = vmatpush.msra.mxu2 %v979_v10  ;;  %1121 = vmatpush.msra.mxu3 %v1011_v11 }
 0x20c   :  { %1102 = vmatpush.msra.mxu2 %v977_v12  ;;  %1122 = vmatpush.msra.mxu3 %v1009_v13  ;;  %v1041_v13 = vld [vmem:[%s1945_s11] sm:$0x3] }
 0x20e   :  { %1167 = vmatpush.msrb.mxu2 %v1008_v14  ;;  %1187 = vmatpush.msrb.mxu3 %v1040_v15  ;;  %v1248_v14 = vld [vmem:[%s1946_s12 + $0x78] sm:$0xff] }
 0x20f   :  { %v1264_v15 = vld [vmem:[%s1946_s12 + $0xf8] sm:$0xff] }
 0x210   :  { %1168 = vmatpush.msrb.mxu2 %v1006_v16  ;;  %1188 = vmatpush.msrb.mxu3 %v1038_v17  ;;  %v1247_v16 = vld [vmem:[%s1946_s12 + $0x70] sm:$0xff] }
 0x212   :  { %1169 = vmatpush.msrb.mxu2 %v1004_v18  ;;  %1189 = vmatpush.msrb.mxu3 %v1036_v19  ;;  %v1263_v18 = vld [vmem:[%s1946_s12 + $0xf0] sm:$0xff]  ;;  %v1246_v19 = vld [vmem:[%s1946_s12 + $0x68] sm:$0xff] }
 0x214   :  { %1170 = vmatpush.msrb.mxu2 %v1002_v20  ;;  %1190 = vmatpush.msrb.mxu3 %v1034_v21  ;;  %v1262_v20 = vld [vmem:[%s1946_s12 + $0xe8] sm:$0xff]  ;;  %v1043_v21 = vperm.slane %v1041_v13, 0 }
 0x216   :  { %1171 = vmatpush.msrb.mxu2 %v1000_v22  ;;  %1191 = vmatpush.msrb.mxu3 %v1032_v23  ;;  %v1245_v22 = vld [vmem:[%s1946_s12 + $0x60] sm:$0xff] }
 0x217   :  { %v1261_v23 = vld [vmem:[%s1946_s12 + $0xe0] sm:$0xff] }
 0x218   :  { %1172 = vmatpush.msrb.mxu2 %v998_v26  ;;  %1192 = vmatpush.msrb.mxu3 %v1030_v27  ;;  %v1044_v27 = vperm.slane %v1041_v13, 1 }
 0x21a   :  { %1173 = vmatpush.msrb.mxu2 %v996_v30  ;;  %1193 = vmatpush.msrb.mxu3 %v1028_v31 }
 0x21c   :  { %1174 = vmatpush.msrb.mxu2 %v994_v34  ;;  %1194 = vmatpush.msrb.mxu3 %v1026_v35 }
 0x21e   :  { %1175 = vmatpush.msrb.mxu2 %v992_v38  ;;  %1195 = vmatpush.msrb.mxu3 %v1024_v39 }
 0x220   :  { %1176 = vmatpush.msrb.mxu2 %v990_v42  ;;  %1196 = vmatpush.msrb.mxu3 %v1022_v43 }
 0x222   :  { %1177 = vmatpush.msrb.mxu2 %v988_v46  ;;  %1197 = vmatpush.msrb.mxu3 %v1020_v47  ;;  %v1244_v47 = vld [vmem:[%s1946_s12 + $0x58] sm:$0xff] }
 0x224   :  { %1178 = vmatpush.msrb.mxu2 %v986_v50  ;;  %1198 = vmatpush.msrb.mxu3 %v1018_v51  ;;  %v1259_v50 = vld [vmem:[%s1946_s12 + $0xd0] sm:$0xff]  ;;  %v1242_v51 = vld [vmem:[%s1946_s12 + $0x48] sm:$0xff] }
 0x226   :  { %1179 = vmatpush.msrb.mxu2 %v984_v52  ;;  %1199 = vmatpush.msrb.mxu3 %v1016_v53  ;;  %v1258_v52 = vld [vmem:[%s1946_s12 + $0xc8] sm:$0xff]  ;;  %v1241_v53 = vld [vmem:[%s1946_s12 + $0x40] sm:$0xff] }
 0x228   :  { %1180 = vmatpush.msrb.mxu2 %v982_v54  ;;  %1200 = vmatpush.msrb.mxu3 %v1014_v55  ;;  %v1257_v54 = vld [vmem:[%s1946_s12 + $0xc0] sm:$0xff]  ;;  %v1240_v55 = vld [vmem:[%s1946_s12 + $0x38] sm:$0xff] }
 0x22a   :  { %1181 = vmatpush.msrb.mxu2 %v980_v56  ;;  %1201 = vmatpush.msrb.mxu3 %v1012_v57  ;;  %v1256_v56 = vld [vmem:[%s1946_s12 + $0xb8] sm:$0xff]  ;;  %v1239_v57 = vld [vmem:[%s1946_s12 + $0x30] sm:$0xff] }
 0x22c   :  { %1182 = vmatpush.msrb.mxu2 %v978_v58  ;;  %1202 = vmatpush.msrb.mxu3 %v1010_v59  ;;  %v1255_v58 = vld [vmem:[%s1946_s12 + $0xb0] sm:$0xff]  ;;  %v1238_v59 = vld [vmem:[%s1946_s12 + $0x28] sm:$0xff] }
 0x270   :  { %v846_v63 = vpop.f32.mrf.mxu2  ;;  %v866_v0 = vpop.f32.mrf.mxu3 }
 0x271   :  { %v847_v1 = vadd.f32 %v846_v63, %v817_v61  ;;  %v867_v2 = vadd.f32 %v866_v0, %v818_v62  ;;  %v1237_v61 = vld [vmem:[%s1946_s12 + $0x20] sm:$0xff]  ;;  %v1236_v63 = vld [vmem:[%s1946_s12 + $0x18] sm:$0xff] }
 0x272   :  { %v1253_v62 = vld [vmem:[%s1946_s12 + $0xa0] sm:$0xff]  ;;  %v1252_v0 = vld [vmem:[%s1946_s12 + $0x98] sm:$0xff] }
 0x273   :  { %v909_v3 = vmax.f32 %v847_v1, 0.0  ;;  %v910_v4 = vmax.f32 %v867_v2, 0.0  ;;  %v1235_v1 = vld [vmem:[%s1946_s12 + $0x10] sm:$0xff] }
 0x274   :  { %v1251_v2 = vld [vmem:[%s1946_s12 + $0x90] sm:$0xff] }
 0x275   :  { %1063 = vmatmul.f32.vlgmr.msrb.gmra.mxu0 %v909_v3  ;;  %1083 = vmatmul.f32.vlgmr.msrb.gmra.mxu1 %v910_v4 }
 0x276   :  { %1265 = vmatpush.msrb.mxu0 %v1248_v14  ;;  %1285 = vmatpush.msrb.mxu1 %v1264_v15 }
 0x278   :  { %v886_v7 = vpop.f32.mrf.mxu2  ;;  %v906_v8 = vpop.f32.mrf.mxu3  ;;  %1266 = vmatpush.msrb.mxu0 %v1247_v16  ;;  %1286 = vmatpush.msrb.mxu1 %v1263_v18 }
 0x279   :  { %v887_v9 = vadd.f32 %v886_v7, %v819_v5  ;;  %v907_v10 = vadd.f32 %v906_v8, %v820_v6  ;;  %v1233_v5 = vld [vmem:[%s1946_s12] sm:$0xff] }
 0x27a   :  { %1267 = vmatpush.msrb.mxu0 %v1246_v19  ;;  %1287 = vmatpush.msrb.mxu1 %v1262_v20  ;;  %v1249_v6 = vld [vmem:[%s1946_s12 + $0x80] sm:$0xff] }
 0x27b   :  { %v911_v11 = vmax.f32 %v887_v9, 0.0  ;;  %v912_v12 = vmax.f32 %v907_v10, 0.0 }
 0x27c   :  { %1268 = vmatpush.msrb.mxu0 %v1245_v22  ;;  %1288 = vmatpush.msrb.mxu1 %v1261_v23 }
 0x27d   :  { %1103 = vmatmul.f32.vlgmr.msra.gmra.mxu2 %v911_v11  ;;  %1123 = vmatmul.f32.vlgmr.msra.gmra.mxu3 %v912_v12 }
 0x27e   :  { %1143 = vmatmul.f32.vlgmr.msra.gmra.mxu0 %v909_v3  ;;  %1163 = vmatmul.f32.vlgmr.msra.gmra.mxu1 %v910_v4  ;;  %v1234_v3 = vld [vmem:[%s1946_s12 + $0x8] sm:$0xff] }
 0x27f   :  { %1269 = vmatpush.msrb.mxu0 %v1244_v47  ;;  %1289 = vmatpush.msrb.mxu1 %v1260_v48  ;;  %v1250_v4 = vld [vmem:[%s1946_s12 + $0x88] sm:$0xff] }
 0x281   :  { %1270 = vmatpush.msrb.mxu0 %v1243_v49  ;;  %1290 = vmatpush.msrb.mxu1 %v1259_v50 }
 0x283   :  { %1271 = vmatpush.msrb.mxu0 %v1242_v51  ;;  %1291 = vmatpush.msrb.mxu1 %v1258_v52 }
 0x285   :  { %1183 = vmatmul.f32.vlgmr.msrb.gmra.mxu2 %v911_v11  ;;  %1203 = vmatmul.f32.vlgmr.msrb.gmra.mxu3 %v912_v12 }
 0x286   :  { %1272 = vmatpush.msrb.mxu0 %v1241_v53  ;;  %1292 = vmatpush.msrb.mxu1 %v1257_v54 }
 0x288   :  { %1273 = vmatpush.msrb.mxu0 %v1240_v55  ;;  %1293 = vmatpush.msrb.mxu1 %v1256_v56 }
 0x28a   :  { %1274 = vmatpush.msrb.mxu0 %v1239_v57  ;;  %1294 = vmatpush.msrb.mxu1 %v1255_v58 }
 0x28c   :  { %1275 = vmatpush.msrb.mxu0 %v1238_v59  ;;  %1295 = vmatpush.msrb.mxu1 %v1254_v60 }
 0x28e   :  { %1276 = vmatpush.msrb.mxu0 %v1237_v61  ;;  %1296 = vmatpush.msrb.mxu1 %v1253_v62 }
 0x290   :  { %1277 = vmatpush.msrb.mxu0 %v1236_v63  ;;  %1297 = vmatpush.msrb.mxu1 %v1252_v0 }
 0x292   :  { %1278 = vmatpush.msrb.mxu0 %v1235_v1  ;;  %1298 = vmatpush.msrb.mxu1 %v1251_v2 }
 0x294   :  { %1279 = vmatpush.msrb.mxu0 %v1234_v3  ;;  %1299 = vmatpush.msrb.mxu1 %v1250_v4 }
 0x296   :  { %1280 = vmatpush.msrb.mxu0 %v1233_v5  ;;  %1300 = vmatpush.msrb.mxu1 %v1249_v6 }
 0x2f2   :  { %v1064_v17 = vpop.f32.mrf.mxu0  ;;  %v1084_v25 = vpop.f32.mrf.mxu1 }
 0x2f3   :  { %v1065_v24 = vadd.f32 %v1064_v17, %v1043_v21 }
 0x2f5   :  { %v1085_v26 = vadd.f32 %v1084_v25, %v1065_v24 }
 0x2fb   :  { %v1144_v28 = vpop.f32.mrf.mxu0  ;;  %v1164_v34 = vpop.f32.mrf.mxu1 }
 0x2fc   :  { %v1145_v32 = vadd.f32 %v1144_v28, %v1044_v27 }
 0x2fe   :  { %v1165_v35 = vadd.f32 %v1164_v34, %v1145_v32 }
 0x300   :  { %v1104_v29 = vpop.f32.mrf.mxu2  ;;  %v1124_v30 = vpop.f32.mrf.mxu3 }
 0x301   :  { %v1105_v31 = vadd.f32 %v1104_v29, %v1085_v26 }
 0x303   :  { %v1125_v33 = vadd.f32 %v1124_v30, %v1105_v31 }
 0x305   :  { %v1209_v37 = vmul.f32 0.01, %v1125_v33  ;;  %vm1207_vm1 = vcmp.gt.f32.partialorder %v1125_v33, 0.0 }
 0x307   :  { %v1846_v42 = vsel %vm1207_vm1, %v1125_v33, %v1209_v37 }
 0x308   :  { %v1184_v36 = vpop.f32.mrf.mxu2  ;;  %v1204_v39 = vpop.f32.mrf.mxu3  ;;  %v1213_v44 = vmul.f32 %v1846_v42, %v1846_v42 }
 0x309   :  { %v1185_v38 = vadd.f32 %v1184_v36, %v1165_v35 }
 0x30b   :  { %v1205_v40 = vadd.f32 %v1204_v39, %v1185_v38 }
 0x30d   :  { %vm1208_vm2 = vcmp.gt.f32.partialorder %v1205_v40, 0.0  ;;  %v1210_v41 = vmul.f32 0.01, %v1205_v40 }
 0x30f   :  { %v1848_v43 = vsel %vm1208_vm2, %v1205_v40, %v1210_v41 }
 0x310   :  { %v1214_v45 = vmul.f32 %v1848_v43, %v1848_v43 }
 0x312   :  { %v1215_v46 = vadd.f32 %v1214_v45, %v1213_v44 }
 0x314   :  { %1216 = vadd.xlane.f32.xlu0 %v1215_v46 }
 0x387   :  { %v1217_v7 = vpop.xlane.xlu0 %1216 }
 0x388   :  { %v1218_v8 = vmax.f32 %v1217_v7, 1e-24 }
 0x38a   :  { %1359 = vrsqrt.f32 %v1218_v8  ;;  %vm1225_vm4 = vweird.f32 %v1218_v8 }
 0x390   :  { %v1360_v9 = vpop.eup %1359 }
 0x391   :  { %v1220_v10 = vmul.f32 %v1360_v9, %v1218_v8  ;;  %vm1226_vm3 = vweird.f32 %v1360_v9 }
 0x392   :  { %vm1227_vm5 = vmor %vm1225_vm4, %vm1226_vm3 }
 0x393   :  { %v1221_v11 = vmul.f32 %v1360_v9, %v1220_v10 }
 0x395   :  { %v1222_v12 = vmul.f32 0.5, %v1221_v11 }
 0x397   :  { %v1223_v13 = vsub.f32 1.5, %v1222_v12 }
 0x399   :  { %v1224_v14 = vmul.f32 %v1360_v9, %v1223_v13 }
 0x39b   :  { %v1228_v15 = vsel %vm1227_vm5, %v1360_v9, %v1224_v14 }
 0x39c   :  { %v1229_v16 = vmul.f32 %v1228_v15, %v1846_v42  ;;  %v1230_v17 = vmul.f32 %v1228_v15, %v1848_v43 }
 0x39e   :  { %1281 = vmatmul.f32.vlgmr.msrb.gmra.mxu0 %v1229_v16  ;;  %1231 = vst [vmem:[#allocation8] sm:$0xff] %v1229_v16  ;;  %1301 = vmatmul.f32.vlgmr.msrb.gmra.mxu1 %v1230_v17 }
 0x39f   :  { %1232 = vst [vmem:[#allocation8 + $0x8] sm:$0xff] %v1230_v17 }
 0x3a0   :  { %1319 = dma.vmem_to_hbm [thread:$0]  %s1315_s19, 256, %s1317_s17, [#allocation4]  }
 0x41b   :  { %v1282_v18 = vpop.f32.mrf.mxu0  ;;  %v1302_v19 = vpop.f32.mrf.mxu1 }
 0x41c   :  { %v1303_v20 = vadd.f32 %v1302_v19, %v1282_v18 }
 0x41e   :  { %1306 = vst.msk [vmem:[#allocation9] sm:$0xff] %vm1305_vm6, %v1303_v20 }
 0x41f   :  { %1330 = dma.vmem_to_hbm [thread:$0]  %s1326_s2, 128, %s1328_s22, [#allocation10]  }
 0x420   :  { %1485 = dma.done.wait [#allocation4], 256  }
 0x421   :  { %1486 = vsyncadd [#allocation4], 4294967040 }
 0x422   :  { %1487 = dma.done.wait [#allocation10], 128  }
 0x423   :  { %1488 = vsyncadd [#allocation10], 4294967168 }
 0x424   :  { %1341 = vsyncpa [#allocation3], 1 }
 0x425   :  { %1342 = vsyncpa [#allocation6], 1 }
 0x426   :  { %1343 = vsyncpa [#allocation4], 1 }
 0x427   :  { %1344 = vsyncpa [#allocation10], 1 }

// kernel: cont_forward.5
= control target key start
LH: loop header
LB: loop body
LE: loop exit
PB: predicated region body
PF: predicated region fallthrough
CT: control target
= control target key end

     0   :  { %vm118_vm0 = vcmask 261120   ;;  %vm1245_vm1 = vcmask 64512   ;;  %s5975_s29 = smov 64   ;;  %vm1386_vm6 = vcmask 523264   ;;  %s8905_s5 = inlined_call_operand.vmem [shape: bf16[32,256], index: 5, kind: input, shape index: {}]   ;;  %s8906_s1 = inlined_call_operand.vmem [shape: f32[8,32], index: 1, kind: input, shape index: {}]   ;;  %s8907_s7 = inlined_call_operand.vmem [shape: bf16[256,512], index: 7, kind: input, shape index: {}]   ;;  %s8908_s6 = inlined_call_operand.vmem [shape: f32[1,256], index: 6, kind: input, shape index: {}]   ;;  %s8909_s9 = inlined_call_operand.vmem [shape: bf16[512,256], index: 9, kind: input, shape index: {}]   ;;  %s8910_s8 = inlined_call_operand.vmem [shape: f32[1,512], index: 8, kind: input, shape index: {}]   ;;  %s8911_s11 = inlined_call_operand.vmem [shape: f32[256,128], index: 11, kind: input, shape index: {}]   ;;  %s8912_s12 = inlined_call_operand.vmem [shape: f32[1,128], index: 12, kind: input, shape index: {}]   ;;  %s8913_s10 = inlined_call_operand.vmem [shape: f32[1,256], index: 10, kind: input, shape index: {}]   ;;  %s8914_s0 = inlined_call_operand.vmem [shape: f32[8,8], index: 0, kind: input, shape index: {}]   ;;  %s8915_s4 = inlined_call_operand.vmem [shape: f32[8,64], index: 4, kind: input, shape index: {}]   ;;  %s8916_s14 = inlined_call_operand.vmem [shape: bf16[64,512], index: 14, kind: input, shape index: {}]   ;;  %s8917_s25 = inlined_call_operand.vmem [shape: f32[8,128], index: 25, kind: output, shape index: {0}]   ;;  %s8918_s13 = inlined_call_operand.vmem [shape: bf16[32,512], index: 13, kind: input, shape index: {}]   ;;  %s8919_s2 = inlined_call_operand.vmem [shape: f32[8,64], index: 2, kind: input, shape index: {}]   ;;  %s8920_s3 = inlined_call_operand.vmem [shape: f32[8,64], index: 3, kind: input, shape index: {}]   ;;  %s8921_s16 = inlined_call_operand.vmem [shape: bf16[512,256], index: 16, kind: input, shape index: {}]   ;;  %s8922_s15 = inlined_call_operand.vmem [shape: f32[1,512], index: 15, kind: input, shape index: {}]   ;;  %s8923_s18 = inlined_call_operand.vmem [shape: bf16[64,512], index: 18, kind: input, shape index: {}]   ;;  %s8924_s20 = inlined_call_operand.vmem [shape: bf16[512,512], index: 20, kind: input, shape index: {}]   ;;  %s8925_s17 = inlined_call_operand.vmem [shape: f32[1,256], index: 17, kind: input, shape index: {}]   ;;  %s8926_s19 = inlined_call_operand.vmem [shape: f32[1,512], index: 19, kind: input, shape index: {}]   ;;  %s8927_s22 = inlined_call_operand.vmem [shape: bf16[512,32], index: 22, kind: input, shape index: {}]   ;;  %s8928_s23 = inlined_call_operand.vmem [shape: f32[1,32], index: 23, kind: input, shape index: {}]   ;;  %s8929_s24 = inlined_call_operand.vmem [shape: bf16[256,8], index: 24, kind: input, shape index: {}]   ;;  %s8930_s26 = inlined_call_operand.vmem [shape: f32[3,8,256], index: 26, kind: output, shape index: {1}]   ;;  %s8931_s21 = inlined_call_operand.vmem [shape: f32[1,512], index: 21, kind: input, shape index: {}]   ;;  %s8932_s28 = inlined_call_operand.vmem [shape: f32[3,8,8], index: 28, kind: output, shape index: {3}]   ;;  %s8933_s27 = inlined_call_operand.vmem [shape: f32[8,32], index: 27, kind: output, shape index: {2}]  }
   0x1   :  { %8939 = sst [smem:[#allocation2_spill]] %s8905_s5 }
   0x2   :  { %8940 = sst [smem:[#allocation3_spill]] %s8906_s1 }
   0x3   :  { %8941 = sst [smem:[#allocation4_spill]] %s8907_s7 }
   0x4   :  { %8942 = sst [smem:[#allocation5_spill]] %s8908_s6 }
   0x5   :  { %8943 = sst [smem:[#allocation6_spill]] %s8909_s9 }
   0x6   :  { %8944 = sst [smem:[#allocation7_spill]] %s8910_s8 }
   0x7   :  { %8945 = sst [smem:[#allocation8_spill]] %s8911_s11 }
   0x8   :  { %8946 = sst [smem:[#allocation9_spill]] %s8912_s12 }
   0x9   :  { %8947 = sst [smem:[#allocation10_spill]] %s8913_s10 }
   0xa   :  { %8948 = sst [smem:[#allocation11_spill]] %s8914_s0 }
   0xb   :  { %8949 = sst [smem:[#allocation12_spill]] %s8915_s4 }
   0xc   :  { %8950 = sst [smem:[#allocation13_spill]] %s8916_s14 }
   0xd   :  { %8951 = sst [smem:[#allocation14_spill]] %s8917_s25 }
   0xe   :  { %s8952_s8 = sld [smem:[#allocation2_spill]] }
   0xf   :  { %s8953_s5 = sld [smem:[#allocation3_spill]] }
  0x10   :  { %s8954_s11 = sld [smem:[#allocation4_spill]] }
  0x11   :  { %s8956_s10 = sld [smem:[#allocation6_spill]] }
  0x12   :  { %s8957_s25 = sld [smem:[#allocation7_spill]] }
  0x13   :  { %s8958_s7 = sld [smem:[#allocation8_spill]] }
  0x14   :  { %v3893_v0 = vld [vmem:[%s8952_s8 + $0x10] sm:$0xf]  ;;  %v5553_v1 = vld [vmem:[%s8952_s8 + $0x14] sm:$0xf0]  ;;  %v3885_v2 = vld [vmem:[%s8952_s8] sm:$0xf] }
  0x15   :  { %v3894_v3 = vor.u32 %v5553_v1, %v3893_v0  ;;  %v5551_v4 = vld [vmem:[%s8952_s8 + $0x4] sm:$0xf0]  ;;  %v5552_v5 = vld [vmem:[%s8952_s8 + $0x14] sm:$0xf]  ;;  %v85_v6 = vld [vmem:[%s8953_s5] sm:$0xff]  ;;  %s8959_s5 = sld [smem:[#allocation10_spill]] }
  0x16   :  { %v3895_v7 = vld [vmem:[%s8952_s8 + $0x18] sm:$0xf0]  ;;  %v3886_v8 = vor.u32 %v5551_v4, %v3885_v2  ;;  %v5550_v9 = vld [vmem:[%s8952_s8 + $0x4] sm:$0xf]  ;;  %v4015_v10 = vld [vmem:[%s8954_s11 + $0xe0] sm:$0xf]  ;;  %v6172_v22 = vpack.c.bf16 %v85_v6, %v85_v6 }
  0x17   :  { %128 = vmatpush.bf16.msra.mxu1 %v3894_v3  ;;  %v5584_v11 = vld [vmem:[%s8954_s11 + $0xec] sm:$0xf0]  ;;  %v5582_v12 = vld [vmem:[%s8954_s11 + $0xe4] sm:$0xf]  ;;  %v3898_v13 = vor.u32 %v5552_v5, %v3895_v7  ;;  %v4017_v15 = vld [vmem:[%s8954_s11 + $0xf0] sm:$0xf0] }
  0x18   :  { %v4016_v14 = vor.u32 %v5584_v11, %v4015_v10  ;;  %v3999_v16 = vld [vmem:[%s8954_s11 + $0xc0] sm:$0xf]  ;;  %v5580_v17 = vld [vmem:[%s8954_s11 + $0xcc] sm:$0xf0]  ;;  %v3887_v18 = vld [vmem:[%s8952_s8 + $0x8] sm:$0xf0]  ;;  %v4020_v19 = vor.u32 %v5582_v12, %v4017_v15 }
  0x19   :  { %v5578_v20 = vld [vmem:[%s8954_s11 + $0xc4] sm:$0xf]  ;;  %v4001_v21 = vld [vmem:[%s8954_s11 + $0xd0] sm:$0xf0]  ;;  %v4000_v23 = vor.u32 %v5580_v17, %v3999_v16  ;;  %v3983_v25 = vld [vmem:[%s8954_s11 + $0xa0] sm:$0xf]  ;;  %v3890_v27 = vor.u32 %v5550_v9, %v3887_v18 }
  0x1a   :  { %546 = vmatpush.bf16.msra.mxu2 %v4016_v14  ;;  %572 = vmatpush.bf16.msra.mxu0 %v4020_v19  ;;  %v4004_v24 = vor.u32 %v5578_v20, %v4001_v21  ;;  %v5576_v26 = vld [vmem:[%s8954_s11 + $0xac] sm:$0xf0]  ;;  %v5574_v28 = vld [vmem:[%s8954_s11 + $0xa4] sm:$0xf]  ;;  %v3985_v29 = vld [vmem:[%s8954_s11 + $0xb0] sm:$0xf0] }
  0x1b   :  { %129 = vmatpush.bf16.msra.mxu1 %v3886_v8  ;;  %v4143_v30 = vld [vmem:[%s8954_s11 + $0x1e0] sm:$0xf]  ;;  %v5616_v31 = vld [vmem:[%s8954_s11 + $0x1ec] sm:$0xf0]  ;;  %v3984_v32 = vor.u32 %v5576_v26, %v3983_v25  ;;  %v5614_v34 = vld [vmem:[%s8954_s11 + $0x1e4] sm:$0xf]  ;;  %v3988_v36 = vor.u32 %v5574_v28, %v3985_v29 }
  0x1c   :  { %v4144_v33 = vor.u32 %v5616_v31, %v4143_v30  ;;  %v4145_v35 = vld [vmem:[%s8954_s11 + $0x1f0] sm:$0xf0]  ;;  %v3967_v37 = vld [vmem:[%s8954_s11 + $0x80] sm:$0xf]  ;;  %v5572_v38 = vld [vmem:[%s8954_s11 + $0x8c] sm:$0xf0] }
  0x1d   :  { %v4148_v39 = vor.u32 %v5614_v34, %v4145_v35  ;;  %v4127_v40 = vld [vmem:[%s8954_s11 + $0x1c0] sm:$0xf]  ;;  %v5570_v41 = vld [vmem:[%s8954_s11 + $0x84] sm:$0xf]  ;;  %v3969_v42 = vld [vmem:[%s8954_s11 + $0x90] sm:$0xf0]  ;;  %v3968_v47 = vor.u32 %v5572_v38, %v3967_v37 }
  0x1e   :  { %3899 = vmatmul.msk.bf16.vlgmr.msra.gmra.mxu1 %vm118_vm0, %v6172_v22  ;;  %547 = vmatpush.bf16.msra.mxu2 %v4000_v23  ;;  %v5612_v43 = vld [vmem:[%s8954_s11 + $0x1cc] sm:$0xf0]  ;;  %v5610_v45 = vld [vmem:[%s8954_s11 + $0x1c4] sm:$0xf]  ;;  %v4129_v46 = vld [vmem:[%s8954_s11 + $0x1d0] sm:$0xf0]  ;;  %v3972_v51 = vor.u32 %v5570_v41, %v3969_v42 }
  0x1f   :  { %141 = vmatpush.bf16.msrb.mxu1 %v3898_v13  ;;  %573 = vmatpush.bf16.msra.mxu0 %v4004_v24  ;;  %v4128_v44 = vor.u32 %v5612_v43, %v4127_v40  ;;  %v4132_v48 = vor.u32 %v5610_v45, %v4129_v46  ;;  %v4111_v49 = vld [vmem:[%s8954_s11 + $0x1a0] sm:$0xf]  ;;  %v5608_v50 = vld [vmem:[%s8954_s11 + $0x1ac] sm:$0xf0]  ;;  %v5606_v54 = vld [vmem:[%s8954_s11 + $0x1a4] sm:$0xf] }
  0x20   :  { %559 = vmatpush.bf16.msra.mxu3 %v4144_v33  ;;  %v3951_v52 = vld [vmem:[%s8954_s11 + $0x60] sm:$0xf]  ;;  %v5568_v53 = vld [vmem:[%s8954_s11 + $0x6c] sm:$0xf0]  ;;  %v5566_v55 = vld [vmem:[%s8954_s11 + $0x64] sm:$0xf]  ;;  %v4112_v57 = vor.u32 %v5608_v50, %v4111_v49 }
  0x21   :  { %v3953_v56 = vld [vmem:[%s8954_s11 + $0x70] sm:$0xf0]  ;;  %v4095_v60 = vld [vmem:[%s8954_s11 + $0x180] sm:$0xf]  ;;  %v5604_v61 = vld [vmem:[%s8954_s11 + $0x18c] sm:$0xf0]  ;;  %v3952_v62 = vor.u32 %v5568_v53, %v3951_v52 }
  0x22   :  { %548 = vmatpush.bf16.msra.mxu2 %v3984_v32  ;;  %v4113_v58 = vld [vmem:[%s8954_s11 + $0x1b0] sm:$0xf0]  ;;  %v5602_v63 = vld [vmem:[%s8954_s11 + $0x184] sm:$0xf]  ;;  %v3956_v1 = vor.u32 %v5566_v55, %v3953_v56  ;;  %v3935_v2 = vld [vmem:[%s8954_s11 + $0x40] sm:$0xf]  ;;  %v4096_v6 = vor.u32 %v5604_v61, %v4095_v60 }
  0x23   :  { %142 = vmatpush.bf16.msrb.mxu1 %v3890_v27  ;;  %574 = vmatpush.bf16.msra.mxu0 %v3988_v36  ;;  %v4116_v59 = vor.u32 %v5606_v54, %v4113_v58  ;;  %v4097_v0 = vld [vmem:[%s8954_s11 + $0x190] sm:$0xf0]  ;;  %v5564_v3 = vld [vmem:[%s8954_s11 + $0x4c] sm:$0xf0]  ;;  %v5562_v4 = vld [vmem:[%s8954_s11 + $0x44] sm:$0xf] }
  0x24   :  { %560 = vmatpush.bf16.msra.mxu3 %v4128_v44  ;;  %v3937_v5 = vld [vmem:[%s8954_s11 + $0x50] sm:$0xf0]  ;;  %v4100_v7 = vor.u32 %v5602_v63, %v4097_v0  ;;  %v4079_v8 = vld [vmem:[%s8954_s11 + $0x160] sm:$0xf]  ;;  %v5600_v9 = vld [vmem:[%s8954_s11 + $0x16c] sm:$0xf0]  ;;  %v3936_v10 = vor.u32 %v5564_v3, %v3935_v2 }
  0x25   :  { %v5598_v11 = vld [vmem:[%s8954_s11 + $0x164] sm:$0xf]  ;;  %v4081_v12 = vld [vmem:[%s8954_s11 + $0x170] sm:$0xf0]  ;;  %v3940_v13 = vor.u32 %v5562_v4, %v3937_v5  ;;  %v3919_v14 = vld [vmem:[%s8954_s11 + $0x20] sm:$0xf]  ;;  %v4080_v18 = vor.u32 %v5600_v9, %v4079_v8 }
  0x26   :  { %549 = vmatpush.bf16.msra.mxu2 %v3968_v47  ;;  %v5560_v15 = vld [vmem:[%s8954_s11 + $0x2c] sm:$0xf0]  ;;  %v5558_v16 = vld [vmem:[%s8954_s11 + $0x24] sm:$0xf]  ;;  %v3921_v17 = vld [vmem:[%s8954_s11 + $0x30] sm:$0xf0]  ;;  %v4084_v19 = vor.u32 %v5598_v11, %v4081_v12 }
  0x27   :  { %585 = vmatpush.bf16.msra.mxu1 %v4148_v39  ;;  %575 = vmatpush.bf16.msra.mxu0 %v3972_v51  ;;  %v4063_v20 = vld [vmem:[%s8954_s11 + $0x140] sm:$0xf]  ;;  %v5596_v21 = vld [vmem:[%s8954_s11 + $0x14c] sm:$0xf0]  ;;  %v3920_v23 = vor.u32 %v5560_v15, %v3919_v14  ;;  %v5594_v24 = vld [vmem:[%s8954_s11 + $0x144] sm:$0xf]  ;;  %v3924_v26 = vor.u32 %v5558_v16, %v3921_v17 }
  0x28   :  { %561 = vmatpush.bf16.msra.mxu3 %v4112_v57  ;;  %v4065_v25 = vld [vmem:[%s8954_s11 + $0x150] sm:$0xf0]  ;;  %v3903_v27 = vld [vmem:[%s8954_s11] sm:$0xf]  ;;  %v5556_v28 = vld [vmem:[%s8954_s11 + $0xc] sm:$0xf0]  ;;  %v4064_v33 = vor.u32 %v5596_v21, %v4063_v20 }
  0x29   :  { %v5554_v29 = vld [vmem:[%s8954_s11 + $0x4] sm:$0xf]  ;;  %v3905_v30 = vld [vmem:[%s8954_s11 + $0x10] sm:$0xf0]  ;;  %v4023_v31 = vld [vmem:[%s8954_s11 + $0xe8] sm:$0xf]  ;;  %v4068_v36 = vor.u32 %v5594_v24, %v4065_v25  ;;  %v3904_v37 = vor.u32 %v5556_v28, %v3903_v27 }
  0x2a   :  { %550 = vmatpush.bf16.msra.mxu2 %v3952_v62  ;;  %v5585_v32 = vld [vmem:[%s8954_s11 + $0xf4] sm:$0xf0]  ;;  %v5583_v34 = vld [vmem:[%s8954_s11 + $0xec] sm:$0xf]  ;;  %v4025_v35 = vld [vmem:[%s8954_s11 + $0xf8] sm:$0xf0]  ;;  %v3908_v38 = vor.u32 %v5554_v29, %v3905_v30 }
  0x2b   :  { %586 = vmatpush.bf16.msra.mxu1 %v4132_v48  ;;  %576 = vmatpush.bf16.msra.mxu0 %v3956_v1  ;;  %v4024_v39 = vor.u32 %v5585_v32, %v4023_v31  ;;  %v4028_v40 = vor.u32 %v5583_v34, %v4025_v35  ;;  %v4007_v41 = vld [vmem:[%s8954_s11 + $0xc8] sm:$0xf]  ;;  %v5581_v42 = vld [vmem:[%s8954_s11 + $0xd4] sm:$0xf0]  ;;  %v5579_v43 = vld [vmem:[%s8954_s11 + $0xcc] sm:$0xf] }
  0x2c   :  { %562 = vmatpush.bf16.msra.mxu3 %v4096_v6  ;;  %v4009_v44 = vld [vmem:[%s8954_s11 + $0xd8] sm:$0xf0]  ;;  %v4008_v45 = vor.u32 %v5581_v42, %v4007_v41  ;;  %v3991_v47 = vld [vmem:[%s8954_s11 + $0xa8] sm:$0xf]  ;;  %v5577_v48 = vld [vmem:[%s8954_s11 + $0xb4] sm:$0xf0] }
  0x2d   :  { %v4012_v46 = vor.u32 %v5579_v43, %v4009_v44  ;;  %v5575_v49 = vld [vmem:[%s8954_s11 + $0xac] sm:$0xf]  ;;  %v3992_v50 = vor.u32 %v5577_v48, %v3991_v47  ;;  %v3993_v51 = vld [vmem:[%s8954_s11 + $0xb8] sm:$0xf0]  ;;  %v4047_v53 = vld [vmem:[%s8954_s11 + $0x120] sm:$0xf] }
  0x2e   :  { %3900 = vmatmul.msk.bf16.vlgmr.msrb.gmra.mxu1 %vm118_vm0, %v6172_v22  ;;  %551 = vmatpush.bf16.msra.mxu2 %v3936_v10  ;;  %v3996_v52 = vor.u32 %v5575_v49, %v3993_v51  ;;  %v5592_v54 = vld [vmem:[%s8954_s11 + $0x12c] sm:$0xf0]  ;;  %v5590_v55 = vld [vmem:[%s8954_s11 + $0x124] sm:$0xf]  ;;  %v4049_v57 = vld [vmem:[%s8954_s11 + $0x130] sm:$0xf0] }
  0x2f   :  { %587 = vmatpush.bf16.msra.mxu1 %v4116_v59  ;;  %577 = vmatpush.bf16.msra.mxu0 %v3940_v13  ;;  %v4048_v56 = vor.u32 %v5592_v54, %v4047_v53  ;;  %v3975_v58 = vld [vmem:[%s8954_s11 + $0x88] sm:$0xf]  ;;  %v5573_v59 = vld [vmem:[%s8954_s11 + $0x94] sm:$0xf0]  ;;  %v4052_v60 = vor.u32 %v5590_v55, %v4049_v57  ;;  %v5571_v62 = vld [vmem:[%s8954_s11 + $0x8c] sm:$0xf] }
  0x30   :  { %563 = vmatpush.bf16.msra.mxu3 %v4080_v18  ;;  %v3976_v61 = vor.u32 %v5573_v59, %v3975_v58  ;;  %v3977_v63 = vld [vmem:[%s8954_s11 + $0x98] sm:$0xf0]  ;;  %v4031_v1 = vld [vmem:[%s8954_s11 + $0x100] sm:$0xf]  ;;  %v5588_v2 = vld [vmem:[%s8954_s11 + $0x10c] sm:$0xf0] }
  0x31   :  { %v3980_v0 = vor.u32 %v5571_v62, %v3977_v63  ;;  %v5586_v3 = vld [vmem:[%s8954_s11 + $0x104] sm:$0xf]  ;;  %v4032_v4 = vor.u32 %v5588_v2, %v4031_v1  ;;  %v4033_v5 = vld [vmem:[%s8954_s11 + $0x110] sm:$0xf0]  ;;  %v3959_v6 = vld [vmem:[%s8954_s11 + $0x68] sm:$0xf] }
  0x32   :  { %552 = vmatpush.bf16.msra.mxu2 %v3920_v23  ;;  %v4036_v8 = vor.u32 %v5586_v3, %v4033_v5  ;;  %v4151_v10 = vld [vmem:[%s8954_s11 + $0x1e8] sm:$0xf]  ;;  %v5617_v11 = vld [vmem:[%s8954_s11 + $0x1f4] sm:$0xf0]  ;;  %v5567_v12 = vld [vmem:[%s8954_s11 + $0x6c] sm:$0xf] }
  0x33   :  { %588 = vmatpush.bf16.msra.mxu1 %v4100_v7  ;;  %578 = vmatpush.bf16.msra.mxu0 %v3924_v26  ;;  %v5569_v7 = vld [vmem:[%s8954_s11 + $0x74] sm:$0xf0]  ;;  %v4152_v13 = vor.u32 %v5617_v11, %v4151_v10  ;;  %v3961_v14 = vld [vmem:[%s8954_s11 + $0x78] sm:$0xf0]  ;;  %v5615_v15 = vld [vmem:[%s8954_s11 + $0x1ec] sm:$0xf] }
  0x34   :  { %564 = vmatpush.bf16.msra.mxu3 %v4064_v33  ;;  %v3960_v9 = vor.u32 %v5569_v7, %v3959_v6  ;;  %v4153_v16 = vld [vmem:[%s8954_s11 + $0x1f8] sm:$0xf0]  ;;  %v3964_v17 = vor.u32 %v5567_v12, %v3961_v14  ;;  %v5565_v20 = vld [vmem:[%s8954_s11 + $0x54] sm:$0xf0]  ;;  %v4135_v21 = vld [vmem:[%s8954_s11 + $0x1c8] sm:$0xf] }
  0x35   :  { %v4156_v18 = vor.u32 %v5615_v15, %v4153_v16  ;;  %v5613_v24 = vld [vmem:[%s8954_s11 + $0x1d4] sm:$0xf0]  ;;  %v5563_v25 = vld [vmem:[%s8954_s11 + $0x4c] sm:$0xf]  ;;  %v3945_v26 = vld [vmem:[%s8954_s11 + $0x58] sm:$0xf0] }
  0x36   :  { %553 = vmatpush.bf16.msra.mxu2 %v3904_v37  ;;  %v4136_v27 = vor.u32 %v5613_v24, %v4135_v21  ;;  %v3948_v28 = vor.u32 %v5563_v25, %v3945_v26  ;;  %v5611_v29 = vld [vmem:[%s8954_s11 + $0x1cc] sm:$0xf]  ;;  %v4137_v30 = vld [vmem:[%s8954_s11 + $0x1d8] sm:$0xf0]  ;;  %v3927_v32 = vld [vmem:[%s8954_s11 + $0x28] sm:$0xf] }
  0x37   :  { %589 = vmatpush.bf16.msra.mxu1 %v4084_v19  ;;  %579 = vmatpush.bf16.msra.mxu0 %v3908_v38  ;;  %v3943_v19 = vld [vmem:[%s8954_s11 + $0x48] sm:$0xf]  ;;  %v4140_v31 = vor.u32 %v5611_v29, %v4137_v30  ;;  %v5561_v33 = vld [vmem:[%s8954_s11 + $0x34] sm:$0xf0]  ;;  %v5559_v37 = vld [vmem:[%s8954_s11 + $0x2c] sm:$0xf] }
  0x38   :  { %565 = vmatpush.bf16.msra.mxu3 %v4048_v56  ;;  %v3944_v23 = vor.u32 %v5565_v20, %v3943_v19  ;;  %v4119_v34 = vld [vmem:[%s8954_s11 + $0x1a8] sm:$0xf]  ;;  %v3928_v35 = vor.u32 %v5561_v33, %v3927_v32  ;;  %v3929_v38 = vld [vmem:[%s8954_s11 + $0x38] sm:$0xf0]  ;;  %v5607_v41 = vld [vmem:[%s8954_s11 + $0x1ac] sm:$0xf] }
  0x39   :  { %v4121_v42 = vld [vmem:[%s8954_s11 + $0x1b8] sm:$0xf0]  ;;  %v3911_v44 = vld [vmem:[%s8954_s11 + $0x8] sm:$0xf]  ;;  %v5605_v48 = vld [vmem:[%s8954_s11 + $0x194] sm:$0xf0] }
  0x3a   :  { %598 = vmatpush.bf16.msrb.mxu2 %v4024_v39  ;;  %v4124_v43 = vor.u32 %v5607_v41, %v4121_v42  ;;  %v5555_v49 = vld [vmem:[%s8954_s11 + $0xc] sm:$0xf]  ;;  %v4105_v54 = vld [vmem:[%s8954_s11 + $0x198] sm:$0xf0]  ;;  %v4087_v56 = vld [vmem:[%s8954_s11 + $0x168] sm:$0xf] }
  0x3b   :  { %590 = vmatpush.bf16.msra.mxu1 %v4068_v36  ;;  %624 = vmatpush.bf16.msrb.mxu0 %v4028_v40  ;;  %v5609_v36 = vld [vmem:[%s8954_s11 + $0x1b4] sm:$0xf0]  ;;  %v3932_v40 = vor.u32 %v5559_v37, %v3929_v38  ;;  %v5603_v53 = vld [vmem:[%s8954_s11 + $0x18c] sm:$0xf]  ;;  %v4071_v62 = vld [vmem:[%s8954_s11 + $0x148] sm:$0xf] }
  0x3c   :  { %566 = vmatpush.bf16.msra.mxu3 %v4032_v4  ;;  %v4120_v39 = vor.u32 %v5609_v36, %v4119_v34  ;;  %v4108_v55 = vor.u32 %v5603_v53, %v4105_v54  ;;  %v5601_v57 = vld [vmem:[%s8954_s11 + $0x174] sm:$0xf0]  ;;  %v5599_v58 = vld [vmem:[%s8954_s11 + $0x16c] sm:$0xf]  ;;  %v4073_v2 = vld [vmem:[%s8954_s11 + $0x158] sm:$0xf0] }
  0x3d   :  { %v4088_v59 = vor.u32 %v5601_v57, %v4087_v56  ;;  %v5597_v63 = vld [vmem:[%s8954_s11 + $0x154] sm:$0xf0]  ;;  %s8955_s8 = sld [smem:[#allocation5_spill]]  ;;  %v4055_v5 = vld [vmem:[%s8954_s11 + $0x128] sm:$0xf] }
  0x3e   :  { %599 = vmatpush.bf16.msrb.mxu2 %v4008_v45  ;;  %v5557_v45 = vld [vmem:[%s8954_s11 + $0x14] sm:$0xf0]  ;;  %v4072_v1 = vor.u32 %v5597_v63, %v4071_v62  ;;  %v5591_v7 = vld [vmem:[%s8954_s11 + $0x12c] sm:$0xf]  ;;  %v4039_v12 = vld [vmem:[%s8954_s11 + $0x108] sm:$0xf] }
  0x3f   :  { %625 = vmatpush.bf16.msrb.mxu0 %v4012_v46  ;;  %591 = vmatpush.bf16.msra.mxu1 %v4052_v60  ;;  %v4103_v46 = vld [vmem:[%s8954_s11 + $0x188] sm:$0xf]  ;;  %v3912_v47 = vor.u32 %v5557_v45, %v3911_v44  ;;  %v4089_v60 = vld [vmem:[%s8954_s11 + $0x178] sm:$0xf0]  ;;  %v5593_v6 = vld [vmem:[%s8954_s11 + $0x134] sm:$0xf0] }
  0x40   :  { %611 = vmatpush.bf16.msrb.mxu3 %v4152_v13  ;;  %v4104_v51 = vor.u32 %v5605_v48, %v4103_v46  ;;  %v4056_v10 = vor.u32 %v5593_v6, %v4055_v5  ;;  %v5589_v13 = vld [vmem:[%s8954_s11 + $0x114] sm:$0xf0]  ;;  %v5587_v14 = vld [vmem:[%s8954_s11 + $0x10c] sm:$0xf]  ;;  %v4041_v15 = vld [vmem:[%s8954_s11 + $0x118] sm:$0xf0] }
  0x41   :  { %v4044_v19 = vor.u32 %v5587_v14, %v4041_v15  ;;  %v4215_v24 = vld [vmem:[%s8956_s10 + $0x70] sm:$0xf]  ;;  %v5633_v25 = vld [vmem:[%s8956_s10 + $0x74] sm:$0xf0]  ;;  %v4191_v41 = vld [vmem:[%s8956_s10 + $0x40] sm:$0xf] }
  0x42   :  { %600 = vmatpush.bf16.msrb.mxu2 %v3992_v50  ;;  %v3913_v50 = vld [vmem:[%s8954_s11 + $0x18] sm:$0xf0]  ;;  %v4216_v26 = vor.u32 %v5633_v25, %v4215_v24  ;;  %v4199_v30 = vld [vmem:[%s8956_s10 + $0x50] sm:$0xf]  ;;  %v5649_v37 = vld [vmem:[%s8956_s10 + $0xf4] sm:$0xf0] }
  0x43   :  { %626 = vmatpush.bf16.msrb.mxu0 %v3996_v52  ;;  %592 = vmatpush.bf16.msra.mxu1 %v4036_v8  ;;  %v3916_v52 = vor.u32 %v5555_v49, %v3913_v50  ;;  %v92_v3 = vld [vmem:[%s8955_s8] sm:$0x3]  ;;  %v4057_v8 = vld [vmem:[%s8954_s11 + $0x138] sm:$0xf0]  ;;  %v4279_v36 = vld [vmem:[%s8956_s10 + $0xf0] sm:$0xf] }
  0x44   :  { %612 = vmatpush.bf16.msrb.mxu3 %v4136_v27  ;;  %v4060_v11 = vor.u32 %v5591_v7, %v4057_v8  ;;  %v4207_v27 = vld [vmem:[%s8956_s10 + $0x60] sm:$0xf]  ;;  %v95_v32 = vperm.slane %v92_v3, 1  ;;  %v4407_v38 = vld [vmem:[%s8956_s10 + $0x1f0] sm:$0xf]  ;;  %v4280_v44 = vor.u32 %v5649_v37, %v4279_v36  ;;  %s8960_s1 = sld [smem:[#allocation11_spill]] }
  0x45   :  { %v5627_v42 = vld [vmem:[%s8956_s10 + $0x44] sm:$0xf0]  ;;  %v4271_v45 = vld [vmem:[%s8956_s10 + $0xe0] sm:$0xf]  ;;  %v4263_v54 = vld [vmem:[%s8956_s10 + $0xd0] sm:$0xf] }
  0x46   :  { %601 = vmatpush.bf16.msrb.mxu2 %v3976_v61  ;;  %v4092_v61 = vor.u32 %v5599_v58, %v4089_v60  ;;  %v4192_v48 = vor.u32 %v5627_v42, %v4191_v41  ;;  %v4399_v49 = vld [vmem:[%s8956_s10 + $0x1e0] sm:$0xf]  ;;  %v5679_v50 = vld [vmem:[%s8956_s10 + $0x1e4] sm:$0xf0]  ;;  %v4247_v60 = vld [vmem:[%s8956_s10 + $0xb0] sm:$0xf] }
  0x47   :  { %627 = vmatpush.bf16.msrb.mxu0 %v3980_v0  ;;  %637 = vmatpush.bf16.msrb.mxu1 %v4156_v18  ;;  %v5595_v0 = vld [vmem:[%s8954_s11 + $0x14c] sm:$0xf]  ;;  %v4040_v18 = vor.u32 %v5589_v13, %v4039_v12  ;;  %v4400_v53 = vor.u32 %v5679_v50, %v4399_v49  ;;  %v4255_v57 = vld [vmem:[%s8956_s10 + $0xc0] sm:$0xf]  ;;  %v5643_v58 = vld [vmem:[%s8956_s10 + $0xc4] sm:$0xf0] }
  0x48   :  { %613 = vmatpush.bf16.msrb.mxu3 %v4120_v39  ;;  %v4076_v4 = vor.u32 %v5595_v0, %v4073_v2  ;;  %v5681_v39 = vld [vmem:[%s8956_s10 + $0x1f4] sm:$0xf0]  ;;  %v4239_v63 = vld [vmem:[%s8956_s10 + $0xa0] sm:$0xf]  ;;  %v5639_v0 = vld [vmem:[%s8956_s10 + $0xa4] sm:$0xf0] }
  0x49   :  { %v4408_v46 = vor.u32 %v5681_v39, %v4407_v38  ;;  %v4183_v2 = vld [vmem:[%s8956_s10 + $0x30] sm:$0xf]  ;;  %v5665_v6 = vld [vmem:[%s8956_s10 + $0x174] sm:$0xf0]  ;;  %v4175_v13 = vld [vmem:[%s8956_s10 + $0x20] sm:$0xf] }
  0x4a   :  { %602 = vmatpush.bf16.msrb.mxu2 %v3960_v9  ;;  %v94_v9 = vperm.slane %v92_v3, 0  ;;  %v5625_v3 = vld [vmem:[%s8956_s10 + $0x34] sm:$0xf0]  ;;  %v4231_v8 = vld [vmem:[%s8956_s10 + $0x90] sm:$0xf]  ;;  %s8961_s12 = sld [smem:[#allocation12_spill]] }
  0x4b   :  { %628 = vmatpush.bf16.msrb.mxu0 %v3964_v17  ;;  %638 = vmatpush.bf16.msrb.mxu1 %v4140_v31  ;;  %v5629_v31 = vld [vmem:[%s8956_s10 + $0x54] sm:$0xf0]  ;;  %v4184_v5 = vor.u32 %v5625_v3, %v4183_v2  ;;  %v5623_v14 = vld [vmem:[%s8956_s10 + $0x24] sm:$0xf0]  ;;  %v5646_v39 = vld [vmem:[%s8956_s10 + $0xe4] sm:$0xf] }
  0x4c   :  { %614 = vmatpush.bf16.msrb.mxu3 %v4104_v51  ;;  %v4200_v33 = vor.u32 %v5629_v31, %v4199_v30  ;;  %v5677_v12 = vld [vmem:[%s8956_s10 + $0x1d4] sm:$0xf0]  ;;  %v5675_v25 = vld [vmem:[%s8956_s10 + $0x1c4] sm:$0xf0]  ;;  %v4167_v30 = vld [vmem:[%s8956_s10 + $0x10] sm:$0xf] }
  0x4d   :  { %v5621_v31 = vld [vmem:[%s8956_s10 + $0x14] sm:$0xf0]  ;;  %v4159_v41 = vld [vmem:[%s8956_s10] sm:$0xf]  ;;  %v4217_v49 = vld [vmem:[%s8956_s10 + $0x78] sm:$0xf0] }
  0x4e   :  { %603 = vmatpush.bf16.msrb.mxu2 %v3944_v23  ;;  %v5673_v36 = vld [vmem:[%s8956_s10 + $0x1b4] sm:$0xf0]  ;;  %v5642_v2 = vld [vmem:[%s8956_s10 + $0xc4] sm:$0xf]  ;;  %v4257_v3 = vld [vmem:[%s8956_s10 + $0xc8] sm:$0xf0] }
  0x4f   :  { %629 = vmatpush.bf16.msrb.mxu0 %v3948_v28  ;;  %639 = vmatpush.bf16.msrb.mxu1 %v4124_v43  ;;  %v5631_v28 = vld [vmem:[%s8956_s10 + $0x64] sm:$0xf0]  ;;  %s8963_s11 = sld [smem:[#allocation9_spill]] }
  0x50   :  { %615 = vmatpush.bf16.msrb.mxu3 %v4088_v59  ;;  %v4208_v29 = vor.u32 %v5631_v28, %v4207_v27  ;;  %v4256_v59 = vor.u32 %v5643_v58, %v4255_v57  ;;  %v4281_v27 = vld [vmem:[%s8956_s10 + $0xf8] sm:$0xf0]  ;;  %v4311_v57 = vld [vmem:[%s8956_s10 + $0x130] sm:$0xf]  ;;  %v5657_v58 = vld [vmem:[%s8956_s10 + $0x134] sm:$0xf0] }
  0x51   :  { %s8964_s14 = sld [smem:[#allocation14_spill]] }
  0x52   :  { %604 = vmatpush.bf16.msrb.mxu2 %v3928_v35 }
  0x53   :  { %630 = vmatpush.bf16.msrb.mxu0 %v3932_v40  ;;  %640 = vmatpush.bf16.msrb.mxu1 %v4108_v55  ;;  %v5645_v55 = vld [vmem:[%s8956_s10 + $0xd4] sm:$0xf0] }
  0x54   :  { %616 = vmatpush.bf16.msrb.mxu3 %v4072_v1  ;;  %v4264_v56 = vor.u32 %v5645_v55, %v4263_v54  ;;  %v4240_v1 = vor.u32 %v5639_v0, %v4239_v63  ;;  %v5644_v54 = vld [vmem:[%s8956_s10 + $0xd4] sm:$0xf]  ;;  %v4265_v55 = vld [vmem:[%s8956_s10 + $0xd8] sm:$0xf0]  ;;  %v4359_v63 = vld [vmem:[%s8956_s10 + $0x190] sm:$0xf] }
  0x55   :  { %v5669_v0 = vld [vmem:[%s8956_s10 + $0x194] sm:$0xf0] }
  0x56   :  { %605 = vmatpush.bf16.msrb.mxu2 %v3912_v47  ;;  %v5647_v47 = vld [vmem:[%s8956_s10 + $0xe4] sm:$0xf0] }
  0x57   :  { %631 = vmatpush.bf16.msrb.mxu0 %v3916_v52  ;;  %641 = vmatpush.bf16.msrb.mxu1 %v4092_v61  ;;  %v4272_v52 = vor.u32 %v5647_v47, %v4271_v45  ;;  %v5641_v61 = vld [vmem:[%s8956_s10 + $0xb4] sm:$0xf0]  ;;  %v5659_v45 = vld [vmem:[%s8956_s10 + $0x144] sm:$0xf0] }
  0x58   :  { %617 = vmatpush.bf16.msrb.mxu3 %v4056_v10  ;;  %v4248_v62 = vor.u32 %v5641_v61, %v4247_v60  ;;  %v4391_v10 = vld [vmem:[%s8956_s10 + $0x1d0] sm:$0xf]  ;;  %v5630_v60 = vld [vmem:[%s8956_s10 + $0x64] sm:$0xf]  ;;  %v4209_v61 = vld [vmem:[%s8956_s10 + $0x68] sm:$0xf0] }
  0x59   :  { %v4392_v15 = vor.u32 %v5677_v12, %v4391_v10  ;;  %v5667_v12 = vld [vmem:[%s8956_s10 + $0x184] sm:$0xf0] }
  0x5b   :  { %642 = vmatpush.bf16.msrb.mxu1 %v4076_v4  ;;  %v4343_v4 = vld [vmem:[%s8956_s10 + $0x170] sm:$0xf] }
  0x5c   :  { %618 = vmatpush.bf16.msrb.mxu3 %v4040_v18  ;;  %v4344_v7 = vor.u32 %v5665_v6, %v4343_v4  ;;  %v5663_v18 = vld [vmem:[%s8956_s10 + $0x164] sm:$0xf0]  ;;  %v4260_v4 = vor.u32 %v5642_v2, %v4257_v3 }
  0x5d   :  { %v5655_v6 = vld [vmem:[%s8956_s10 + $0x124] sm:$0xf0] }
  0x5f   :  { %643 = vmatpush.bf16.msrb.mxu1 %v4060_v11 }
  0x63   :  { %644 = vmatpush.bf16.msrb.mxu1 %v4044_v19 }
  0x9b   :  { %v131_v16 = vpop.f32.mrf.mxu1 }
  0x9c   :  { %v132_v17 = vadd.f32 %v131_v16, %v94_v9  ;;  %v5637_v9 = vld [vmem:[%s8956_s10 + $0x94] sm:$0xf0]  ;;  %v4176_v16 = vor.u32 %v5623_v14, %v4175_v13  ;;  %v5640_v14 = vld [vmem:[%s8956_s10 + $0xb4] sm:$0xf] }
  0x9d   :  { %v4232_v11 = vor.u32 %v5637_v9, %v4231_v8  ;;  %v5628_v8 = vld [vmem:[%s8956_s10 + $0x54] sm:$0xf]  ;;  %v4201_v9 = vld [vmem:[%s8956_s10 + $0x58] sm:$0xf0] }
  0x9e   :  { %v148_v20 = vmax.f32 %v132_v17, 0.0  ;;  %v4335_v17 = vld [vmem:[%s8956_s10 + $0x160] sm:$0xf]  ;;  %v4204_v10 = vor.u32 %v5628_v8, %v4201_v9  ;;  %v5618_v9 = vld [vmem:[%s8956_s10 + $0x4] sm:$0xf] }
  0x9f   :  { %v4336_v19 = vor.u32 %v5663_v18, %v4335_v17  ;;  %v5680_v17 = vld [vmem:[%s8956_s10 + $0x1f4] sm:$0xf]  ;;  %v4409_v18 = vld [vmem:[%s8956_s10 + $0x1f8] sm:$0xf0] }
  0xa0   :  { %v150_v21 = vpack.c.bf16 %v148_v20, %v148_v20  ;;  %v4223_v20 = vld [vmem:[%s8956_s10 + $0x80] sm:$0xf] }
  0xa2   :  { %554 = vmatmul.bf16.vlgmr.msra.gmra.mxu2 %v150_v21  ;;  %580 = vmatmul.bf16.vlgmr.msra.gmra.mxu0 %v150_v21 }
  0xa3   :  { %v133_v23 = vpop.f32.mrf.mxu1  ;;  %1048 = vmatpush.bf16.msra.mxu2 %v4216_v26  ;;  %1074 = vmatpush.bf16.msra.mxu0 %v4344_v7  ;;  %v5648_v26 = vld [vmem:[%s8956_s10 + $0xf4] sm:$0xf] }
  0xa4   :  { %v4383_v23 = vld [vmem:[%s8956_s10 + $0x1c0] sm:$0xf] }
  0xa5   :  { %v4384_v28 = vor.u32 %v5675_v25, %v4383_v23  ;;  %v5626_v23 = vld [vmem:[%s8956_s10 + $0x44] sm:$0xf] }
  0xa7   :  { %1049 = vmatpush.bf16.msra.mxu2 %v4208_v29  ;;  %1075 = vmatpush.bf16.msra.mxu0 %v4336_v19  ;;  %v4284_v29 = vor.u32 %v5648_v26, %v4281_v27  ;;  %v4295_v19 = vld [vmem:[%s8956_s10 + $0x110] sm:$0xf]  ;;  %v5638_v27 = vld [vmem:[%s8956_s10 + $0xa4] sm:$0xf] }
  0xab   :  { %v144_v34 = vpop.f32.mrf.mxu1  ;;  %1050 = vmatpush.bf16.msra.mxu2 %v4200_v33  ;;  %v4168_v33 = vor.u32 %v5621_v31, %v4167_v30  ;;  %v4401_v31 = vld [vmem:[%s8956_s10 + $0x1e8] sm:$0xf0] }
  0xac   :  { %v145_v35 = vadd.f32 %v144_v34, %v95_v32  ;;  %v4327_v32 = vld [vmem:[%s8956_s10 + $0x150] sm:$0xf]  ;;  %v5661_v34 = vld [vmem:[%s8956_s10 + $0x154] sm:$0xf0] }
  0xad   :  { %v4328_v37 = vor.u32 %v5661_v34, %v4327_v32  ;;  %v4287_v32 = vld [vmem:[%s8956_s10 + $0x100] sm:$0xf] }
  0xae   :  { %v149_v40 = vmax.f32 %v145_v35, 0.0  ;;  %v4375_v35 = vld [vmem:[%s8956_s10 + $0x1b0] sm:$0xf] }
  0xaf   :  { %1051 = vmatpush.bf16.msra.mxu2 %v4192_v48  ;;  %v4376_v38 = vor.u32 %v5673_v36, %v4375_v35  ;;  %1076 = vmatpush.bf16.msra.mxu0 %v4328_v37  ;;  %v5632_v48 = vld [vmem:[%s8956_s10 + $0x74] sm:$0xf]  ;;  %v4185_v37 = vld [vmem:[%s8956_s10 + $0x38] sm:$0xf0] }
  0xb0   :  { %v151_v43 = vpack.c.bf16 %v149_v40, %v149_v40  ;;  %v4273_v40 = vld [vmem:[%s8956_s10 + $0xe8] sm:$0xf0]  ;;  %v4220_v50 = vor.u32 %v5632_v48, %v4217_v49  ;;  %v5624_v36 = vld [vmem:[%s8956_s10 + $0x34] sm:$0xf]  ;;  %v5622_v49 = vld [vmem:[%s8956_s10 + $0x24] sm:$0xf] }
  0xb1   :  { %v4276_v42 = vor.u32 %v5646_v39, %v4273_v40  ;;  %v4188_v39 = vor.u32 %v5624_v36, %v4185_v37  ;;  %v4345_v40 = vld [vmem:[%s8956_s10 + $0x178] sm:$0xf0]  ;;  %v5652_v37 = vld [vmem:[%s8956_s10 + $0x114] sm:$0xf] }
  0xb2   :  { %567 = vmatmul.bf16.vlgmr.msra.gmra.mxu3 %v151_v43  ;;  %593 = vmatmul.bf16.vlgmr.msra.gmra.mxu1 %v151_v43 }
  0xb3   :  { %606 = vmatmul.bf16.vlgmr.msrb.gmra.mxu2 %v150_v21  ;;  %632 = vmatmul.bf16.vlgmr.msrb.gmra.mxu0 %v150_v21  ;;  %v146_v51 = vpop.f32.mrf.mxu1  ;;  %v5635_v21 = vld [vmem:[%s8956_s10 + $0x84] sm:$0xf0] }
  0xb4   :  { %1061 = vmatpush.bf16.msra.mxu3 %v4280_v44  ;;  %1087 = vmatpush.bf16.msra.mxu1 %v4408_v46  ;;  %v4224_v24 = vor.u32 %v5635_v21, %v4223_v20  ;;  %v4319_v44 = vld [vmem:[%s8956_s10 + $0x140] sm:$0xf]  ;;  %v4412_v20 = vor.u32 %v5680_v17, %v4409_v18  ;;  %v5653_v21 = vld [vmem:[%s8956_s10 + $0x114] sm:$0xf0] }
  0xb5   :  { %1052 = vmatpush.bf16.msra.mxu2 %v4184_v5  ;;  %v4320_v47 = vor.u32 %v5659_v45, %v4319_v44  ;;  %v4367_v51 = vld [vmem:[%s8956_s10 + $0x1a0] sm:$0xf]  ;;  %v4296_v25 = vor.u32 %v5653_v21, %v4295_v19  ;;  %v5676_v44 = vld [vmem:[%s8956_s10 + $0x1d4] sm:$0xf] }
  0xb6   :  { %v4303_v5 = vld [vmem:[%s8956_s10 + $0x120] sm:$0xf]  ;;  %v5656_v19 = vld [vmem:[%s8956_s10 + $0x134] sm:$0xf] }
  0xb7   :  { %1077 = vmatpush.bf16.msra.mxu0 %v4320_v47  ;;  %v4304_v7 = vor.u32 %v5655_v6, %v4303_v5  ;;  %v4377_v5 = vld [vmem:[%s8956_s10 + $0x1b8] sm:$0xf0]  ;;  %v6874_v6 = vld [vmem:[%s8957_s25] sm:$0xf] }
  0xb8   :  { %1062 = vmatpush.bf16.msra.mxu3 %v4272_v52  ;;  %1088 = vmatpush.bf16.msra.mxu1 %v4400_v53  ;;  %v5671_v52 = vld [vmem:[%s8956_s10 + $0x1a4] sm:$0xf0]  ;;  %v219_v17 = vperm.slane %v6874_v6, 1 }
  0xb9   :  { %1053 = vmatpush.bf16.msra.mxu2 %v4176_v16  ;;  %v4368_v53 = vor.u32 %v5671_v52, %v4367_v51  ;;  %v5662_v51 = vld [vmem:[%s8956_s10 + $0x164] sm:$0xf] }
  0xbc   :  { %1063 = vmatpush.bf16.msra.mxu3 %v4264_v56  ;;  %1089 = vmatpush.bf16.msra.mxu1 %v4392_v15  ;;  %v4268_v56 = vor.u32 %v5644_v54, %v4265_v55  ;;  %v4249_v15 = vld [vmem:[%s8956_s10 + $0xb8] sm:$0xf0]  ;;  %v5634_v55 = vld [vmem:[%s8956_s10 + $0x84] sm:$0xf] }
  0xbd   :  { %1054 = vmatpush.bf16.msra.mxu2 %v4168_v33  ;;  %v4252_v16 = vor.u32 %v5640_v14, %v4249_v15  ;;  %v5651_v33 = vld [vmem:[%s8956_s10 + $0x104] sm:$0xf0]  ;;  %v5670_v15 = vld [vmem:[%s8956_s10 + $0x1a4] sm:$0xf] }
  0xbe   :  { %v4288_v35 = vor.u32 %v5651_v33, %v4287_v32 }
  0xc0   :  { %1064 = vmatpush.bf16.msra.mxu3 %v4256_v59  ;;  %1090 = vmatpush.bf16.msra.mxu1 %v4384_v28  ;;  %v4312_v59 = vor.u32 %v5657_v58, %v4311_v57  ;;  %v4241_v28 = vld [vmem:[%s8956_s10 + $0xa8] sm:$0xf0]  ;;  %v5674_v57 = vld [vmem:[%s8956_s10 + $0x1c4] sm:$0xf] }
  0xc1   :  { %v4244_v30 = vor.u32 %v5638_v27, %v4241_v28 }
  0xc2   :  { %619 = vmatmul.bf16.vlgmr.msrb.gmra.mxu3 %v151_v43  ;;  %645 = vmatmul.bf16.vlgmr.msrb.gmra.mxu1 %v151_v43  ;;  %v5619_v43 = vld [vmem:[%s8956_s10 + $0x4] sm:$0xf0] }
  0xc3   :  { %v4160_v46 = vor.u32 %v5619_v43, %v4159_v41  ;;  %1078 = vmatpush.bf16.msra.mxu0 %v4312_v59  ;;  %v4233_v43 = vld [vmem:[%s8956_s10 + $0x98] sm:$0xf0]  ;;  %v4385_v59 = vld [vmem:[%s8956_s10 + $0x1c8] sm:$0xf0] }
  0xc4   :  { %1065 = vmatpush.bf16.msra.mxu3 %v4248_v62  ;;  %1091 = vmatpush.bf16.msra.mxu1 %v4376_v38  ;;  %v4212_v62 = vor.u32 %v5630_v60, %v4209_v61  ;;  %v5664_v38 = vld [vmem:[%s8956_s10 + $0x174] sm:$0xf]  ;;  %v4388_v60 = vor.u32 %v5674_v57, %v4385_v59 }
  0xc5   :  { %1055 = vmatpush.bf16.msra.mxu2 %v4160_v46  ;;  %v4348_v41 = vor.u32 %v5664_v38, %v4345_v40  ;;  %v4393_v46 = vld [vmem:[%s8956_s10 + $0x1d8] sm:$0xf0]  ;;  %v5620_v61 = vld [vmem:[%s8956_s10 + $0x14] sm:$0xf] }
  0xc6   :  { %v4396_v48 = vor.u32 %v5676_v44, %v4393_v46  ;;  %v4297_v38 = vld [vmem:[%s8956_s10 + $0x118] sm:$0xf0] }
  0xc7   :  { %1079 = vmatpush.bf16.msra.mxu0 %v4304_v7 }
  0xc8   :  { %1066 = vmatpush.bf16.msra.mxu3 %v4240_v1  ;;  %1092 = vmatpush.bf16.msra.mxu1 %v4368_v53  ;;  %v4360_v1 = vor.u32 %v5669_v0, %v4359_v63  ;;  %v4337_v53 = vld [vmem:[%s8956_s10 + $0x168] sm:$0xf0]  ;;  %v5660_v63 = vld [vmem:[%s8956_s10 + $0x154] sm:$0xf] }
  0xc9   :  { %1100 = vmatpush.bf16.msrb.mxu2 %v4220_v50  ;;  %v4177_v50 = vld [vmem:[%s8956_s10 + $0x28] sm:$0xf0]  ;;  %v4340_v54 = vor.u32 %v5662_v51, %v4337_v53  ;;  %v221_v53 = vperm.slane %v6874_v6, 3 }
  0xca   :  { %v4180_v52 = vor.u32 %v5622_v49, %v4177_v50 }
  0xcb   :  { %1080 = vmatpush.bf16.msra.mxu0 %v4296_v25  ;;  %v4361_v25 = vld [vmem:[%s8956_s10 + $0x198] sm:$0xf0] }
  0xcc   :  { %1067 = vmatpush.bf16.msra.mxu3 %v4232_v11  ;;  %1093 = vmatpush.bf16.msra.mxu1 %v4360_v1  ;;  %v4351_v11 = vld [vmem:[%s8956_s10 + $0x180] sm:$0xf]  ;;  %v4329_v1 = vld [vmem:[%s8956_s10 + $0x158] sm:$0xf0] }
  0xcd   :  { %1101 = vmatpush.bf16.msrb.mxu2 %v4212_v62  ;;  %v4352_v13 = vor.u32 %v5667_v12, %v4351_v11  ;;  %v4169_v62 = vld [vmem:[%s8956_s10 + $0x18] sm:$0xf0]  ;;  %v4332_v3 = vor.u32 %v5660_v63, %v4329_v1  ;;  %v5658_v11 = vld [vmem:[%s8956_s10 + $0x144] sm:$0xf] }
  0xce   :  { %v4172_v0 = vor.u32 %v5620_v61, %v4169_v62  ;;  %v220_v62 = vperm.slane %v6874_v6, 2 }
  0xcf   :  { %1081 = vmatpush.bf16.msra.mxu0 %v4288_v35 }
  0xd0   :  { %1068 = vmatpush.bf16.msra.mxu3 %v4224_v24  ;;  %v4193_v24 = vld [vmem:[%s8956_s10 + $0x48] sm:$0xf0]  ;;  %1094 = vmatpush.bf16.msra.mxu1 %v4352_v13 }
  0xd1   :  { %1102 = vmatpush.bf16.msrb.mxu2 %v4204_v10  ;;  %v4196_v26 = vor.u32 %v5626_v23, %v4193_v24  ;;  %v4161_v10 = vld [vmem:[%s8956_s10 + $0x8] sm:$0xf0]  ;;  %v5668_v24 = vld [vmem:[%s8956_s10 + $0x194] sm:$0xf] }
  0xd2   :  { %v4164_v12 = vor.u32 %v5618_v9, %v4161_v10  ;;  %v4321_v13 = vld [vmem:[%s8956_s10 + $0x148] sm:$0xf0]  ;;  %v4364_v28 = vor.u32 %v5668_v24, %v4361_v25  ;;  %v1165_v10 = vld [vmem:[%s8958_s7 + $0x58] sm:$0xff]  ;;  %v1156_v25 = vld [vmem:[%s8958_s7 + $0x10] sm:$0xff] }
  0xd3   :  { %1126 = vmatpush.bf16.msrb.mxu0 %v4348_v41  ;;  %v4324_v14 = vor.u32 %v5658_v11, %v4321_v13  ;;  %v4300_v41 = vor.u32 %v5652_v37, %v4297_v38  ;;  %v1164_v11 = vld [vmem:[%s8958_s7 + $0x50] sm:$0xff]  ;;  %v1162_v13 = vld [vmem:[%s8958_s7 + $0x40] sm:$0xff]  ;;  %v1181_v24 = vld [vmem:[%s8958_s7 + $0xd8] sm:$0xff] }
  0xd4   :  { %1113 = vmatpush.bf16.msrb.mxu3 %v4284_v29  ;;  %1139 = vmatpush.bf16.msrb.mxu1 %v4412_v20  ;;  %v5678_v29 = vld [vmem:[%s8956_s10 + $0x1e4] sm:$0xf]  ;;  %v4313_v20 = vld [vmem:[%s8956_s10 + $0x138] sm:$0xf0]  ;;  %v1172_v37 = vld [vmem:[%s8958_s7 + $0x90] sm:$0xff] }
  0xd5   :  { %1103 = vmatpush.bf16.msrb.mxu2 %v4196_v26  ;;  %v4404_v34 = vor.u32 %v5678_v29, %v4401_v31  ;;  %v4316_v21 = vor.u32 %v5656_v19, %v4313_v20  ;;  %v5654_v26 = vld [vmem:[%s8956_s10 + $0x124] sm:$0xf]  ;;  %v4305_v29 = vld [vmem:[%s8956_s10 + $0x128] sm:$0xf0]  ;;  %v722_v38 = vld [vmem:[%s8959_s5] sm:$0x3] }
  0xd6   :  { %v4353_v31 = vld [vmem:[%s8956_s10 + $0x188] sm:$0xf0]  ;;  %v4308_v33 = vor.u32 %v5654_v26, %v4305_v29  ;;  %v1158_v20 = vld [vmem:[%s8958_s7 + $0x20] sm:$0xff]  ;;  %v1180_v26 = vld [vmem:[%s8958_s7 + $0xd0] sm:$0xff] }
  0xd7   :  { %1127 = vmatpush.bf16.msrb.mxu0 %v4340_v54  ;;  %v1183_v19 = vld [vmem:[%s8958_s7 + $0xe8] sm:$0xff]  ;;  %v1154_v29 = vld [vmem:[%s8958_s7] sm:$0xff] }
  0xd8   :  { %1114 = vmatpush.bf16.msrb.mxu3 %v4276_v42  ;;  %1140 = vmatpush.bf16.msrb.mxu1 %v4404_v34  ;;  %v5636_v42 = vld [vmem:[%s8956_s10 + $0x94] sm:$0xf]  ;;  %v218_v34 = vperm.slane %v6874_v6, 0 }
  0xd9   :  { %1104 = vmatpush.bf16.msrb.mxu2 %v4188_v39  ;;  %v4236_v45 = vor.u32 %v5636_v42, %v4233_v43 }
  0xdb   :  { %1128 = vmatpush.bf16.msrb.mxu0 %v4332_v3 }
  0xdc   :  { %1115 = vmatpush.bf16.msrb.mxu3 %v4268_v56  ;;  %1141 = vmatpush.bf16.msrb.mxu1 %v4396_v48  ;;  %v4225_v56 = vld [vmem:[%s8956_s10 + $0x88] sm:$0xf0] }
  0xdd   :  { %1105 = vmatpush.bf16.msrb.mxu2 %v4180_v52  ;;  %v4228_v58 = vor.u32 %v5634_v55, %v4225_v56  ;;  %v4289_v48 = vld [vmem:[%s8956_s10 + $0x108] sm:$0xf0]  ;;  %v1169_v55 = vld [vmem:[%s8958_s7 + $0x78] sm:$0xff]  ;;  %v1168_v56 = vld [vmem:[%s8958_s7 + $0x70] sm:$0xff] }
  0xdf   :  { %1129 = vmatpush.bf16.msrb.mxu0 %v4324_v14  ;;  %v1161_v14 = vld [vmem:[%s8958_s7 + $0x38] sm:$0xff] }
  0xe0   :  { %1116 = vmatpush.bf16.msrb.mxu3 %v4260_v4  ;;  %1142 = vmatpush.bf16.msrb.mxu1 %v4388_v60  ;;  %v5672_v4 = vld [vmem:[%s8956_s10 + $0x1b4] sm:$0xf]  ;;  %v1167_v60 = vld [vmem:[%s8958_s7 + $0x68] sm:$0xff] }
  0xe1   :  { %1106 = vmatpush.bf16.msrb.mxu2 %v4172_v0  ;;  %v4380_v7 = vor.u32 %v5672_v4, %v4377_v5  ;;  %v1166_v0 = vld [vmem:[%s8958_s7 + $0x60] sm:$0xff] }
  0xe3   :  { %1130 = vmatpush.bf16.msrb.mxu0 %v4316_v21  ;;  %v1182_v21 = vld [vmem:[%s8958_s7 + $0xe0] sm:$0xff] }
  0xe4   :  { %1117 = vmatpush.bf16.msrb.mxu3 %v4252_v16  ;;  %1143 = vmatpush.bf16.msrb.mxu1 %v4380_v7  ;;  %v4369_v16 = vld [vmem:[%s8956_s10 + $0x1a8] sm:$0xf0] }
  0xe5   :  { %1107 = vmatpush.bf16.msrb.mxu2 %v4164_v12  ;;  %v4372_v18 = vor.u32 %v5670_v15, %v4369_v16  ;;  %v1163_v12 = vld [vmem:[%s8958_s7 + $0x48] sm:$0xff]  ;;  %v1185_v15 = vld [vmem:[%s8958_s7 + $0xf8] sm:$0xff]  ;;  %v1160_v16 = vld [vmem:[%s8958_s7 + $0x30] sm:$0xff] }
  0xe7   :  { %1131 = vmatpush.bf16.msrb.mxu0 %v4308_v33  ;;  %v1175_v33 = vld [vmem:[%s8958_s7 + $0xa8] sm:$0xff] }
  0xe8   :  { %1118 = vmatpush.bf16.msrb.mxu3 %v4244_v30  ;;  %1144 = vmatpush.bf16.msrb.mxu1 %v4372_v18  ;;  %v5666_v30 = vld [vmem:[%s8956_s10 + $0x184] sm:$0xf]  ;;  %v1159_v18 = vld [vmem:[%s8958_s7 + $0x28] sm:$0xff] }
  0xe9   :  { %v4356_v39 = vor.u32 %v5666_v30, %v4353_v31  ;;  %v1178_v30 = vld [vmem:[%s8958_s7 + $0xc0] sm:$0xff]  ;;  %v1177_v31 = vld [vmem:[%s8958_s7 + $0xb8] sm:$0xff] }
  0xeb   :  { %1132 = vmatpush.bf16.msrb.mxu0 %v4300_v41 }
  0xec   :  { %1119 = vmatpush.bf16.msrb.mxu3 %v4236_v45  ;;  %1145 = vmatpush.bf16.msrb.mxu1 %v4364_v28  ;;  %v1179_v28 = vld [vmem:[%s8958_s7 + $0xc8] sm:$0xff] }
  0xf0   :  { %1120 = vmatpush.bf16.msrb.mxu3 %v4228_v58  ;;  %1146 = vmatpush.bf16.msrb.mxu1 %v4356_v39  ;;  %v1171_v39 = vld [vmem:[%s8958_s7 + $0x88] sm:$0xff] }
 0x11f   :  { %v581_v47 = vpop.f32.mrf.mxu0 }
 0x120   :  { %v582_v27 = vadd.f32 %v581_v47, %v219_v17  ;;  %v5650_v47 = vld [vmem:[%s8956_s10 + $0x104] sm:$0xf]  ;;  %v1184_v17 = vld [vmem:[%s8958_s7 + $0xf0] sm:$0xff]  ;;  %s8962_s10 = sld [smem:[#allocation13_spill]] }
 0x121   :  { %v4292_v50 = vor.u32 %v5650_v47, %v4289_v48 }
 0x123   :  { %1133 = vmatpush.bf16.msrb.mxu0 %v4292_v50 }
 0x125   :  { %v555_v2 = vpop.f32.mrf.mxu2 }
 0x126   :  { %v556_v42 = vadd.f32 %v555_v2, %v218_v34  ;;  %v1174_v34 = vld [vmem:[%s8958_s7 + $0xa0] sm:$0xff] }
 0x127   :  { %v583_v8 = vpop.f32.mrf.mxu0 }
 0x12d   :  { %v557_v23 = vpop.f32.mrf.mxu2 }
 0x12e   :  { %v1157_v23 = vld [vmem:[%s8958_s7 + $0x18] sm:$0xff] }
 0x12f   :  { %v594_v32 = vpop.f32.mrf.mxu1 }
 0x130   :  { %v595_v35 = vadd.f32 %v594_v32, %v582_v27  ;;  %v633_v36 = vpop.f32.mrf.mxu0  ;;  %v1155_v27 = vld [vmem:[%s8958_s7 + $0x8] sm:$0xff]  ;;  %v1176_v32 = vld [vmem:[%s8958_s7 + $0xb0] sm:$0xff] }
 0x131   :  { %v634_v58 = vadd.f32 %v633_v36, %v221_v53  ;;  %v1173_v36 = vld [vmem:[%s8958_s7 + $0x98] sm:$0xff] }
 0x132   :  { %v651_v40 = vmax.f32 %v595_v35, 0.0 }
 0x134   :  { %v655_v43 = vpack.c.bf16 %v651_v40, %v651_v40  ;;  %v1170_v40 = vld [vmem:[%s8958_s7 + $0x80] sm:$0xff] }
 0x135   :  { %v568_v44 = vpop.f32.mrf.mxu3 }
 0x136   :  { %v569_v45 = vadd.f32 %v568_v44, %v556_v42  ;;  %v607_v46 = vpop.f32.mrf.mxu2  ;;  %1069 = vmatmul.bf16.vlgmr.msra.gmra.mxu3 %v655_v43  ;;  %v724_v42 = vperm.slane %v722_v38, 0  ;;  %v86_v44 = vld [vmem:[%s8960_s1] sm:$0xff] }
 0x137   :  { %v596_v49 = vpop.f32.mrf.mxu1  ;;  %v608_v2 = vadd.f32 %v607_v46, %v220_v62  ;;  %v1269_v46 = vsel %vm1245_vm1, %v86_v44, 0.0 }
 0x138   :  { %v650_v51 = vmax.f32 %v569_v45, 0.0  ;;  %v635_v52 = vpop.f32.mrf.mxu0  ;;  %v1244_v45 = vld [vmem:[%s8961_s12] sm:$0xff]  ;;  %1270 = vadd.xlane.f32.xlu0 %v1269_v46 }
 0x13a   :  { %v654_v54 = vpack.c.bf16 %v650_v51, %v650_v51 }
 0x13c   :  { %1056 = vmatmul.bf16.vlgmr.msra.gmra.mxu2 %v654_v54 }
 0x13d   :  { %v570_v57 = vpop.f32.mrf.mxu3  ;;  %1190 = vmatpush.msra.mxu2 %v1169_v55 }
 0x13e   :  { %v609_v59 = vpop.f32.mrf.mxu2 }
 0x13f   :  { %v646_v61 = vpop.f32.mrf.mxu1  ;;  %1191 = vmatpush.msra.mxu2 %v1168_v56 }
 0x140   :  { %v647_v63 = vadd.f32 %v646_v61, %v634_v58  ;;  %v725_v58 = vperm.slane %v722_v38, 1  ;;  %v4440_v38 = vld [vmem:[%s8962_s10 + $0x28] sm:$0xf] }
 0x141   :  { %1192 = vmatpush.msra.mxu2 %v1167_v60 }
 0x142   :  { %v653_v1 = vmax.f32 %v647_v63, 0.0 }
 0x143   :  { %1193 = vmatpush.msra.mxu2 %v1166_v0 }
 0x144   :  { %v657_v3 = vpack.c.bf16 %v653_v1, %v653_v1 }
 0x145   :  { %v620_v4 = vpop.f32.mrf.mxu3  ;;  %1194 = vmatpush.msra.mxu2 %v1165_v10 }
 0x146   :  { %v621_v5 = vadd.f32 %v620_v4, %v608_v2  ;;  %1095 = vmatmul.bf16.vlgmr.msra.gmra.mxu1 %v657_v3  ;;  %1121 = vmatmul.bf16.vlgmr.msrb.gmra.mxu3 %v655_v43 }
 0x147   :  { %v648_v7 = vpop.f32.mrf.mxu1  ;;  %1195 = vmatpush.msra.mxu2 %v1164_v11  ;;  %v4466_v11 = vld [vmem:[%s8962_s10 + $0x70] sm:$0xf0] }
 0x148   :  { %v652_v8 = vmax.f32 %v621_v5, 0.0 }
 0x149   :  { %1196 = vmatpush.msra.mxu2 %v1163_v12  ;;  %v4472_v12 = vld [vmem:[%s8962_s10 + $0x68] sm:$0xf] }
 0x14a   :  { %v656_v9 = vpack.c.bf16 %v652_v8, %v652_v8  ;;  %v4464_v8 = vld [vmem:[%s8962_s10 + $0x60] sm:$0xf] }
 0x14b   :  { %1197 = vmatpush.msra.mxu2 %v1162_v13 }
 0x14c   :  { %1082 = vmatmul.bf16.vlgmr.msra.gmra.mxu0 %v656_v9  ;;  %1108 = vmatmul.bf16.vlgmr.msrb.gmra.mxu2 %v654_v54 }
 0x14d   :  { %v622_v6 = vpop.f32.mrf.mxu3  ;;  %1198 = vmatpush.msra.mxu2 %v1161_v14  ;;  %1210 = vmatpush.msra.mxu0 %v1185_v15  ;;  %v5697_v14 = vld [vmem:[%s8962_s10 + $0x74] sm:$0xf0]  ;;  %v5695_v15 = vld [vmem:[%s8962_s10 + $0x6c] sm:$0xf] }
 0x14e   :  { %v5694_v6 = vld [vmem:[%s8962_s10 + $0x64] sm:$0xf] }
 0x14f   :  { %1199 = vmatpush.msra.mxu2 %v1160_v16  ;;  %1211 = vmatpush.msra.mxu0 %v1184_v17  ;;  %v4469_v13 = vor.u32 %v5694_v6, %v4466_v11  ;;  %v4474_v16 = vld [vmem:[%s8962_s10 + $0x78] sm:$0xf0]  ;;  %v4448_v17 = vld [vmem:[%s8962_s10 + $0x40] sm:$0xf]  ;;  %v5715_v6 = vld [vmem:[%s8921_s16 + $0x44] sm:$0xf0] }
 0x151   :  { %1200 = vmatpush.msra.mxu2 %v1159_v18  ;;  %1212 = vmatpush.msra.mxu0 %v1183_v19  ;;  %v4473_v18 = vor.u32 %v5697_v14, %v4472_v12  ;;  %v4477_v19 = vor.u32 %v5695_v15, %v4474_v16  ;;  %v4488_v12 = vld [vmem:[%s8918_s13] sm:$0xf]  ;;  %v5702_v14 = vld [vmem:[%s8918_s13 + $0x24] sm:$0xf] }
 0x153   :  { %1201 = vmatpush.msra.mxu2 %v1158_v20  ;;  %1213 = vmatpush.msra.mxu0 %v1182_v21  ;;  %v5692_v20 = vld [vmem:[%s8962_s10 + $0x4c] sm:$0xf0]  ;;  %v5690_v21 = vld [vmem:[%s8962_s10 + $0x44] sm:$0xf] }
 0x154   :  { %1451 = vmatpush.bf16.msra.mxu3 %v4477_v19  ;;  %v4514_v19 = vld [vmem:[%s8918_s13 + $0x38] sm:$0xf0] }
 0x155   :  { %1202 = vmatpush.msra.mxu2 %v1157_v23  ;;  %1214 = vmatpush.msra.mxu0 %v1181_v24  ;;  %v4450_v23 = vld [vmem:[%s8962_s10 + $0x50] sm:$0xf0]  ;;  %v4449_v24 = vor.u32 %v5692_v20, %v4448_v17 }
 0x156   :  { %1147 = vmatmul.bf16.vlgmr.msrb.gmra.mxu1 %v657_v3  ;;  %v4506_v17 = vld [vmem:[%s8918_s13 + $0x30] sm:$0xf0] }
 0x157   :  { %1203 = vmatpush.msra.mxu2 %v1156_v25  ;;  %1215 = vmatpush.msra.mxu0 %v1180_v26  ;;  %v4453_v25 = vor.u32 %v5690_v21, %v4450_v23  ;;  %v4456_v26 = vld [vmem:[%s8962_s10 + $0x48] sm:$0xf]  ;;  %v4509_v20 = vor.u32 %v5702_v14, %v4506_v17  ;;  %v5698_v23 = vld [vmem:[%s8918_s13 + $0x4] sm:$0xf]  ;;  %v4756_v14 = vld [vmem:[%s8921_s16 + $0x1d0] sm:$0xf] }
 0x158   :  { %v4548_v17 = vld [vmem:[%s8921_s16 + $0x30] sm:$0xf] }
 0x159   :  { %1204 = vmatpush.msra.mxu2 %v1155_v27  ;;  %1216 = vmatpush.msra.mxu0 %v1179_v28  ;;  %v5693_v27 = vld [vmem:[%s8962_s10 + $0x54] sm:$0xf0] }
 0x15a   :  { %v4457_v28 = vor.u32 %v5693_v27, %v4456_v26  ;;  %v4498_v26 = vld [vmem:[%s8918_s13 + $0x18] sm:$0xf0] }
 0x15b   :  { %1205 = vmatpush.msra.mxu2 %v1154_v29  ;;  %1217 = vmatpush.msra.mxu0 %v1178_v30  ;;  %v5691_v29 = vld [vmem:[%s8962_s10 + $0x4c] sm:$0xf]  ;;  %v4458_v30 = vld [vmem:[%s8962_s10 + $0x58] sm:$0xf0] }
 0x15c   :  { %1134 = vmatmul.bf16.vlgmr.msrb.gmra.mxu0 %v656_v9  ;;  %v5696_v9 = vld [vmem:[%s8962_s10 + $0x6c] sm:$0xf0] }
 0x15d   :  { %1218 = vmatpush.msra.mxu0 %v1177_v31  ;;  %v4465_v10 = vor.u32 %v5696_v9, %v4464_v8  ;;  %1433 = vmatpush.bf16.msrb.mxu2 %v4473_v18  ;;  %v4432_v31 = vld [vmem:[%s8962_s10 + $0x20] sm:$0xf]  ;;  %v5703_v18 = vld [vmem:[%s8918_s13 + $0x2c] sm:$0xf] }
 0x15e   :  { %v4517_v21 = vor.u32 %v5703_v18, %v4514_v19  ;;  %v5713_v18 = vld [vmem:[%s8921_s16 + $0x34] sm:$0xf0]  ;;  %v4612_v19 = vld [vmem:[%s8921_s16 + $0xb0] sm:$0xf] }
 0x15f   :  { %1219 = vmatpush.msra.mxu0 %v1176_v32  ;;  %1397 = vmatpush.bf16.msra.mxu1 %v4465_v10  ;;  %v4461_v32 = vor.u32 %v5691_v29, %v4458_v30 }
 0x161   :  { %1220 = vmatpush.msra.mxu0 %v1175_v33  ;;  %v5688_v33 = vld [vmem:[%s8962_s10 + $0x2c] sm:$0xf0]  ;;  %1434 = vmatpush.bf16.msrb.mxu2 %v4457_v28 }
 0x162   :  { %1452 = vmatpush.bf16.msra.mxu3 %v4461_v32 }
 0x163   :  { %1221 = vmatpush.msra.mxu0 %v1174_v34  ;;  %1398 = vmatpush.bf16.msra.mxu1 %v4449_v24  ;;  %v5686_v34 = vld [vmem:[%s8962_s10 + $0x24] sm:$0xf]  ;;  %v4490_v24 = vld [vmem:[%s8918_s13 + $0x10] sm:$0xf0] }
 0x164   :  { %v4493_v28 = vor.u32 %v5698_v23, %v4490_v24  ;;  %v4708_v23 = vld [vmem:[%s8921_s16 + $0x170] sm:$0xf]  ;;  %v5753_v24 = vld [vmem:[%s8921_s16 + $0x174] sm:$0xf0] }
 0x165   :  { %1222 = vmatpush.msra.mxu0 %v1173_v36  ;;  %v4433_v36 = vor.u32 %v5688_v33, %v4432_v31  ;;  %v1234_v31 = vld [vmem:[%s8919_s2] sm:$0xff] }
 0x167   :  { %1223 = vmatpush.msra.mxu0 %v1172_v37  ;;  %1399 = vmatpush.bf16.msra.mxu1 %v4433_v36 }
 0x169   :  { %1224 = vmatpush.msra.mxu0 %v1171_v39  ;;  %v5689_v39 = vld [vmem:[%s8962_s10 + $0x34] sm:$0xf0] }
 0x16b   :  { %1225 = vmatpush.msra.mxu0 %v1170_v40  ;;  %v5687_v40 = vld [vmem:[%s8962_s10 + $0x2c] sm:$0xf] }
 0x16d   :  { %1264 = vmatpush.msrb.mxu0 %v1244_v45 }
 0x1b9   :  { %v1070_v35 = vpop.f32.mrf.mxu3 }
 0x1bf   :  { %v1057_v41 = vpop.f32.mrf.mxu2 }
 0x1c0   :  { %v1058_v48 = vadd.f32 %v1057_v41, %v724_v42  ;;  %v4442_v41 = vld [vmem:[%s8962_s10 + $0x38] sm:$0xf0]  ;;  %v4441_v42 = vor.u32 %v5689_v39, %v4440_v38  ;;  %v4512_v39 = vld [vmem:[%s8918_s13 + $0x28] sm:$0xf] }
 0x1c1   :  { %v1072_v43 = vpop.f32.mrf.mxu3 }
 0x1c2   :  { %v1071_v50 = vadd.f32 %v1070_v35, %v1058_v48  ;;  %v4434_v35 = vld [vmem:[%s8962_s10 + $0x30] sm:$0xf0]  ;;  %v4445_v43 = vor.u32 %v5687_v40, %v4442_v41  ;;  %1435 = vmatpush.bf16.msrb.mxu2 %v4441_v42  ;;  %v5705_v40 = vld [vmem:[%s8918_s13 + $0x34] sm:$0xf0]  ;;  %v4496_v41 = vld [vmem:[%s8918_s13 + $0x8] sm:$0xf] }
 0x1c3   :  { %v1096_v47 = vpop.f32.mrf.mxu1  ;;  %v4437_v37 = vor.u32 %v5686_v34, %v4434_v35  ;;  %v4513_v42 = vor.u32 %v5705_v40, %v4512_v39  ;;  %v4740_v40 = vld [vmem:[%s8921_s16 + $0x1b0] sm:$0xf] }
 0x1c4   :  { %1453 = vmatpush.bf16.msra.mxu3 %v4445_v43  ;;  %v5701_v43 = vld [vmem:[%s8918_s13 + $0x14] sm:$0xf0] }
 0x1c7   :  { %v1059_v49 = vpop.f32.mrf.mxu2 }
 0x1c9   :  { %v1083_v51 = vpop.f32.mrf.mxu0  ;;  %v1122_v52 = vpop.f32.mrf.mxu3 }
 0x1ca   :  { %v1084_v53 = vadd.f32 %v1083_v51, %v1071_v50 }
 0x1cb   :  { %v1098_v54 = vpop.f32.mrf.mxu1 }
 0x1cc   :  { %v1097_v55 = vadd.f32 %v1096_v47, %v1084_v53  ;;  %v4416_v54 = vld [vmem:[%s8962_s10] sm:$0xf] }
 0x1ce   :  { %v1152_v56 = vmax.f32 %v1097_v55, 0.0  ;;  %v5684_v55 = vld [vmem:[%s8962_s10 + $0xc] sm:$0xf0] }
 0x1cf   :  { %v1109_v57 = vpop.f32.mrf.mxu2 }
 0x1d0   :  { %1206 = vmatmul.f32.vlgmr.msra.gmra.mxu2 %v1152_v56  ;;  %v1110_v62 = vadd.f32 %v1109_v57, %v725_v58  ;;  %v5682_v56 = vld [vmem:[%s8962_s10 + $0x4] sm:$0xf]  ;;  %v4417_v57 = vor.u32 %v5684_v55, %v4416_v54  ;;  %v4418_v58 = vld [vmem:[%s8962_s10 + $0x10] sm:$0xf0]  ;;  %v5719_v55 = vld [vmem:[%s8921_s16 + $0x64] sm:$0xf0] }
 0x1d1   :  { %v1085_v59 = vpop.f32.mrf.mxu0  ;;  %v1124_v60 = vpop.f32.mrf.mxu3 }
 0x1d2   :  { %v1123_v0 = vadd.f32 %v1122_v52, %v1110_v62  ;;  %v1271_v52 = vpop.xlane.xlu0 %1270  ;;  %v4424_v59 = vld [vmem:[%s8962_s10 + $0x8] sm:$0xf]  ;;  %v5685_v60 = vld [vmem:[%s8962_s10 + $0x14] sm:$0xf0]  ;;  %1400 = vmatpush.bf16.msra.mxu1 %v4417_v57 }
 0x1d3   :  { %v1148_v61 = vpop.f32.mrf.mxu1  ;;  %v1272_v53 = vadd.f32 1e-07, %v1271_v52  ;;  %v4425_v62 = vor.u32 %v5685_v60, %v4424_v59  ;;  %v4772_v60 = vld [vmem:[%s8921_s16 + $0x1f0] sm:$0xf] }
 0x1d5   :  { %1436 = vmatpush.bf16.msrb.mxu2 %v4425_v62  ;;  %vm1278_vm2 = vweird.f32 %v1272_v53  ;;  %v1282_v10 = vand.u32 2147483647, %v1272_v53  ;;  %v1284_v11 = vand.u32 2147483648, %v1272_v53 }
 0x1d7   :  { %v1111_v63 = vpop.f32.mrf.mxu2  ;;  %v1285_v27 = vor.u32 1.1754944e-38, %v1284_v11  ;;  %vm1283_vm5 = vcmp.eq.f32.partialorder %v1282_v10, 8.507059e+37  ;;  %v4620_v10 = vld [vmem:[%s8921_s16 + $0xc0] sm:$0xf] }
 0x1d8   :  { %v5683_v63 = vld [vmem:[%s8962_s10 + $0xc] sm:$0xf] }
 0x1d9   :  { %v1135_v1 = vpop.f32.mrf.mxu0  ;;  %1568 = vmatpush.bf16.msra.mxu2 %v4517_v21  ;;  %v5729_v21 = vld [vmem:[%s8921_s16 + $0xb4] sm:$0xf0] }
 0x1da   :  { %v1136_v2 = vadd.f32 %v1135_v1, %v1123_v0  ;;  %v4426_v0 = vld [vmem:[%s8962_s10 + $0x18] sm:$0xf0] }
 0x1db   :  { %v1150_v3 = vpop.f32.mrf.mxu1  ;;  %v4429_v1 = vor.u32 %v5683_v63, %v4426_v0  ;;  %v4564_v63 = vld [vmem:[%s8921_s16 + $0x50] sm:$0xf]  ;;  %v5717_v0 = vld [vmem:[%s8921_s16 + $0x54] sm:$0xf0] }
 0x1dc   :  { %v1149_v4 = vadd.f32 %v1148_v61, %v1136_v2  ;;  %v4421_v61 = vor.u32 %v5682_v56, %v4418_v58  ;;  %v4504_v2 = vld [vmem:[%s8918_s13 + $0x20] sm:$0xf]  ;;  %v5704_v3 = vld [vmem:[%s8918_s13 + $0x2c] sm:$0xf0]  ;;  %v5735_v58 = vld [vmem:[%s8921_s16 + $0xe4] sm:$0xf0] }
 0x1dd   :  { %1454 = vmatpush.bf16.msra.mxu3 %v4429_v1  ;;  %v4636_v56 = vld [vmem:[%s8921_s16 + $0xe0] sm:$0xf]  ;;  %v4628_v1 = vld [vmem:[%s8921_s16 + $0xd0] sm:$0xf] }
 0x1de   :  { %v1153_v5 = vmax.f32 %v1149_v4, 0.0  ;;  %v4505_v4 = vor.u32 %v5704_v3, %v4504_v2  ;;  %v4637_v59 = vor.u32 %v5735_v58, %v4636_v56  ;;  %v4565_v2 = vor.u32 %v5717_v0, %v4564_v63  ;;  %v5733_v3 = vld [vmem:[%s8921_s16 + $0xd4] sm:$0xf0]  ;;  %v4524_v56 = vld [vmem:[%s8921_s16] sm:$0xf] }
 0x1df   :  { %v4588_v58 = vld [vmem:[%s8921_s16 + $0x80] sm:$0xf]  ;;  %v5747_v63 = vld [vmem:[%s8921_s16 + $0x144] sm:$0xf0]  ;;  %v4724_v0 = vld [vmem:[%s8921_s16 + $0x190] sm:$0xf] }
 0x1e0   :  { %1226 = vmatmul.f32.vlgmr.msra.gmra.mxu0 %v1153_v5  ;;  %1529 = vmatpush.bf16.msrb.mxu1 %v4505_v4  ;;  %v4764_v4 = vld [vmem:[%s8921_s16 + $0x1e0] sm:$0xf] }
 0x1e1   :  { %v1137_v7 = vpop.f32.mrf.mxu0  ;;  %1415 = vmatpush.bf16.msra.mxu0 %v4469_v13  ;;  %v5700_v13 = vld [vmem:[%s8918_s13 + $0xc] sm:$0xf0] }
 0x1e2   :  { %v4489_v16 = vor.u32 %v5700_v13, %v4488_v12  ;;  %v5731_v12 = vld [vmem:[%s8921_s16 + $0xc4] sm:$0xf0] }
 0x1e3   :  { %v4621_v13 = vor.u32 %v5731_v12, %v4620_v10  ;;  %v5720_v10 = vld [vmem:[%s8921_s16 + $0x74] sm:$0xf]  ;;  %v4582_v12 = vld [vmem:[%s8921_s16 + $0x78] sm:$0xf0] }
 0x1e4   :  { %1530 = vmatpush.bf16.msrb.mxu1 %v4489_v16 }
 0x1e5   :  { %1416 = vmatpush.bf16.msra.mxu0 %v4453_v25  ;;  %v5699_v25 = vld [vmem:[%s8918_s13 + $0xc] sm:$0xf] }
 0x1e6   :  { %v4501_v29 = vor.u32 %v5699_v25, %v4498_v26  ;;  %v4613_v25 = vor.u32 %v5729_v21, %v4612_v19  ;;  %v4709_v26 = vor.u32 %v5753_v24, %v4708_v23  ;;  %v5743_v21 = vld [vmem:[%s8921_s16 + $0x124] sm:$0xf0]  ;;  %v5718_v23 = vld [vmem:[%s8921_s16 + $0x64] sm:$0xf] }
 0x1e8   :  { %4413 = vmatmul.msk.f32.vlgmr.msrb.gmra.mxu0 %vm1245_vm1, %v86_v44  ;;  %v5963_v44 = vld [vmem:[%s8963_s11] ss:$0 sm:$0xff]  ;;  %1569 = vmatpush.bf16.msra.mxu2 %v4501_v29 }
 0x1e9   :  { %1417 = vmatpush.bf16.msra.mxu0 %v4437_v37 }
 0x1ed   :  { %1418 = vmatpush.bf16.msra.mxu0 %v4421_v61  ;;  %v5769_v61 = vld [vmem:[%s8921_s16 + $0x1f4] sm:$0xf0] }
 0x1ee   :  { %v4773_v62 = vor.u32 %v5769_v61, %v4772_v60  ;;  %v5723_v60 = vld [vmem:[%s8921_s16 + $0x84] sm:$0xf0]  ;;  %v4684_v61 = vld [vmem:[%s8921_s16 + $0x140] sm:$0xf] }
 0x1f1   :  { %1542 = vmatpush.bf16.msrb.mxu0 %v4509_v20  ;;  %v4549_v20 = vor.u32 %v5713_v18, %v4548_v17  ;;  %v4716_v17 = vld [vmem:[%s8921_s16 + $0x180] sm:$0xf]  ;;  %v5755_v18 = vld [vmem:[%s8921_s16 + $0x184] sm:$0xf0] }
 0x1f2   :  { %v4717_v19 = vor.u32 %v5755_v18, %v4716_v17  ;;  %v5762_v17 = vld [vmem:[%s8921_s16 + $0x1c4] sm:$0xf]  ;;  %v4750_v18 = vld [vmem:[%s8921_s16 + $0x1c8] sm:$0xf0] }
 0x1f5   :  { %1543 = vmatpush.bf16.msrb.mxu0 %v4493_v28  ;;  %v5763_v28 = vld [vmem:[%s8921_s16 + $0x1c4] sm:$0xf0] }
 0x253   :  { %v1207_v45 = vpop.f32.mrf.mxu2 }
 0x254   :  { %v1208_v46 = vadd.f32 %v5963_v44, %v1207_v45  ;;  %v1241_v44 = vld [vmem:[%s8920_s3] sm:$0xff]  ;;  %v4497_v45 = vor.u32 %v5701_v43, %v4496_v41  ;;  %v5761_v41 = vld [vmem:[%s8921_s16 + $0x1b4] sm:$0xf0] }
 0x25d   :  { %v1227_v47 = vpop.f32.mrf.mxu0 }
 0x25e   :  { %v7116_v48 = vadd.f32 %v1227_v47, %v1208_v46 }
 0x260   :  { %1230 = vst [vmem:[%s8964_s14] sm:$0xff] %v7116_v48  ;;  %v1231_v49 = vmul.f32 0.5, %v7116_v48 }
 0x262   :  { %v1232_v50 = vmul.f32 1.442695, %v1231_v49 }
 0x264   :  { %5965 = vpow2.f32 %v1232_v50  ;;  %v5721_v50 = vld [vmem:[%s8921_s16 + $0x74] sm:$0xf0] }
 0x265   :  { %5967 = vrcp.f32 %v1272_v53  ;;  %v1266_v32 = vpop.f32.mrf.mxu0 }
 0x26a   :  { %v5966_v51 = vpop.eup %5965 }
 0x26b   :  { %1236 = vrot.lane.b32.xlu0 %v5966_v51, %s5975_s29  ;;  %v5968_v5 = vpop.eup %5967  ;;  %v4644_v51 = vld [vmem:[%s8921_s16 + $0xf0] sm:$0xf] }
 0x26c   :  { %v1274_v7 = vmul.f32 %v5968_v5, %v1272_v53  ;;  %vm1279_vm3 = vweird.f32 %v5968_v5  ;;  %v5737_v53 = vld [vmem:[%s8921_s16 + $0xf4] sm:$0xf0] }
 0x26d   :  { %vm7153_vm4 = vmor %vm1278_vm2, %vm1279_vm3  ;;  %v4645_v54 = vor.u32 %v5737_v53, %v4644_v51  ;;  %v4732_v53 = vld [vmem:[%s8921_s16 + $0x1a0] sm:$0xf] }
 0x26e   :  { %v1275_v8 = vsub.f32 1.0, %v1274_v7  ;;  %v4629_v7 = vor.u32 %v5733_v3, %v4628_v1  ;;  %v5757_v1 = vld [vmem:[%s8921_s16 + $0x194] sm:$0xf0] }
 0x270   :  { %v1276_v9 = vmul.f32 %v5968_v5, %v1275_v8 }
 0x272   :  { %v1277_v15 = vadd.f32 %v5968_v5, %v1276_v9  ;;  %v4556_v9 = vld [vmem:[%s8921_s16 + $0x40] sm:$0xf] }
 0x273   :  { %v4557_v11 = vor.u32 %v5715_v6, %v4556_v9  ;;  %v4676_v9 = vld [vmem:[%s8921_s16 + $0x130] sm:$0xf]  ;;  %v5745_v6 = vld [vmem:[%s8921_s16 + $0x134] sm:$0xf0] }
 0x274   :  { %v1281_v30 = vsel %vm7153_vm4, %v5968_v5, %v1277_v15  ;;  %v5767_v5 = vld [vmem:[%s8921_s16 + $0x1e4] sm:$0xf0]  ;;  %v5765_v15 = vld [vmem:[%s8921_s16 + $0x1d4] sm:$0xf0] }
 0x275   :  { %v1286_v33 = vsel %vm1283_vm5, %v1285_v27, %v1281_v30  ;;  %v4765_v8 = vor.u32 %v5767_v5, %v4764_v4  ;;  %v4757_v16 = vor.u32 %v5765_v15, %v4756_v14  ;;  %v4748_v27 = vld [vmem:[%s8921_s16 + $0x1c0] sm:$0xf]  ;;  %v4685_v4 = vor.u32 %v5747_v63, %v4684_v61  ;;  %v4646_v14 = vld [vmem:[%s8921_s16 + $0xf8] sm:$0xf0] }
 0x276   :  { %v1287_v36 = vmul.f32 %v1286_v33, %v1266_v32  ;;  %v4749_v29 = vor.u32 %v5763_v28, %v4748_v27  ;;  %v4540_v30 = vld [vmem:[%s8921_s16 + $0x20] sm:$0xf]  ;;  %v4725_v5 = vor.u32 %v5757_v1, %v4724_v0  ;;  %v4585_v15 = vor.u32 %v5720_v10, %v4582_v12  ;;  %v4638_v27 = vld [vmem:[%s8921_s16 + $0xe8] sm:$0xf0]  ;;  %v4758_v61 = vld [vmem:[%s8921_s16 + $0x1d8] sm:$0xf0] }
 0x277   :  { %v4604_v32 = vld [vmem:[%s8921_s16 + $0xa0] sm:$0xf]  ;;  %v5728_v10 = vld [vmem:[%s8921_s16 + $0xb4] sm:$0xf]  ;;  %v4614_v12 = vld [vmem:[%s8921_s16 + $0xb8] sm:$0xf0] }
 0x2dd   :  { %v1237_v34 = vpop.permute.xlu0 %1236 }
 0x2de   :  { %v1239_v35 = vmul.f32 %v1237_v34, %v1234_v31  ;;  %v1242_v46 = vmul.f32 %v1241_v44, %v1237_v34  ;;  %v5711_v31 = vld [vmem:[%s8921_s16 + $0x24] sm:$0xf0] }
 0x2df   :  { %v4541_v33 = vor.u32 %v5711_v31, %v4540_v30  ;;  %v5727_v34 = vld [vmem:[%s8921_s16 + $0xa4] sm:$0xf0]  ;;  %v5768_v30 = vld [vmem:[%s8921_s16 + $0x1f4] sm:$0xf]  ;;  %v4774_v31 = vld [vmem:[%s8921_s16 + $0x1f8] sm:$0xf0] }
 0x2e0   :  { %v7193_v37 = vadd.f32 %v1239_v35, %v7116_v48  ;;  %v1243_v47 = vadd.f32 %v1242_v46, %v7116_v48  ;;  %v4580_v48 = vld [vmem:[%s8921_s16 + $0x70] sm:$0xf]  ;;  %v4700_v35 = vld [vmem:[%s8921_s16 + $0x160] sm:$0xf]  ;;  %v5709_v46 = vld [vmem:[%s8921_s16 + $0x14] sm:$0xf0] }
 0x2e1   :  { %v4581_v52 = vor.u32 %v5721_v50, %v4580_v48  ;;  %v5725_v48 = vld [vmem:[%s8921_s16 + $0x94] sm:$0xf0]  ;;  %v4692_v50 = vld [vmem:[%s8921_s16 + $0x150] sm:$0xf] }
 0x2e2   :  { %v1288_v38 = vpack.c.bf16 %v7193_v37, %v1287_v36  ;;  %v1289_v49 = vpack.c.bf16 %v1243_v47, %v1243_v47  ;;  %v5751_v36 = vld [vmem:[%s8921_s16 + $0x164] sm:$0xf0] }
 0x2e3   :  { %1997 = vmatpush.bf16.msrb.mxu3 %v4581_v52  ;;  %v4701_v39 = vor.u32 %v5751_v36, %v4700_v35  ;;  %v5749_v52 = vld [vmem:[%s8921_s16 + $0x154] sm:$0xf0] }
 0x2e4   :  { %4478 = vmatmul.msk.bf16.vlgmr.msra.gmra.mxu1 %vm1386_vm6, %v1288_v38  ;;  %4480 = vmatmul.msk.bf16.vlgmr.msra.gmra.mxu0 %vm1386_vm6, %v1288_v38 }
 0x2e5   :  { %4482 = vmatmul.msk.bf16.vlgmr.msrb.gmra.mxu2 %vm1386_vm6, %v1288_v38  ;;  %4484 = vmatmul.msk.bf16.vlgmr.msra.gmra.mxu3 %vm1386_vm6, %v1288_v38  ;;  %v4605_v38 = vor.u32 %v5727_v34, %v4604_v32  ;;  %v4777_v34 = vor.u32 %v5768_v30, %v4774_v31 }
 0x2e6   :  { %1555 = vmatpush.bf16.msra.mxu1 %v4513_v42  ;;  %2015 = vmatpush.bf16.msra.mxu0 %v4645_v54  ;;  %v4741_v42 = vor.u32 %v5761_v41, %v4740_v40  ;;  %v5759_v54 = vld [vmem:[%s8921_s16 + $0x1a4] sm:$0xf0]  ;;  %v5716_v41 = vld [vmem:[%s8921_s16 + $0x54] sm:$0xf] }
 0x2e7   :  { %2051 = vmatpush.bf16.msrb.mxu2 %v4773_v62  ;;  %v4589_v62 = vor.u32 %v5723_v60, %v4588_v58  ;;  %v5764_v60 = vld [vmem:[%s8921_s16 + $0x1d4] sm:$0xf] }
 0x2e8   :  { %v4761_v0 = vor.u32 %v5764_v60, %v4758_v61 }
 0x2ea   :  { %1556 = vmatpush.bf16.msra.mxu1 %v4497_v45  ;;  %2016 = vmatpush.bf16.msra.mxu0 %v4637_v59  ;;  %v4532_v45 = vld [vmem:[%s8921_s16 + $0x10] sm:$0xf] }
 0x2eb   :  { %2052 = vmatpush.bf16.msrb.mxu2 %v4765_v8  ;;  %v4533_v47 = vor.u32 %v5709_v46, %v4532_v45  ;;  %v5732_v45 = vld [vmem:[%s8921_s16 + $0xd4] sm:$0xf] }
 0x2ee   :  { %2017 = vmatpush.bf16.msra.mxu0 %v4629_v7 }
 0x2ef   :  { %2053 = vmatpush.bf16.msrb.mxu2 %v4757_v16 }
 0x2f2   :  { %2018 = vmatpush.bf16.msra.mxu0 %v4621_v13  ;;  %v5736_v13 = vld [vmem:[%s8921_s16 + $0xf4] sm:$0xf] }
 0x2f3   :  { %2054 = vmatpush.bf16.msrb.mxu2 %v4749_v29  ;;  %v4649_v16 = vor.u32 %v5736_v13, %v4646_v14  ;;  %v5752_v13 = vld [vmem:[%s8921_s16 + $0x174] sm:$0xf]  ;;  %v4710_v14 = vld [vmem:[%s8921_s16 + $0x178] sm:$0xf0] }
 0x2f4   :  { %4479 = vmatmul.msk.bf16.gmra.mxu1 %vm1386_vm6, %v1289_v49  ;;  %4481 = vmatmul.msk.bf16.gmra.mxu0 %vm1386_vm6, %v1289_v49 }
 0x2f5   :  { %4483 = vmatmul.msk.bf16.gmra.mxu2 %vm1386_vm6, %v1289_v49  ;;  %4485 = vmatmul.msk.bf16.gmra.mxu3 %vm1386_vm6, %v1289_v49  ;;  %v4596_v49 = vld [vmem:[%s8921_s16 + $0x90] sm:$0xf] }
 0x2f6   :  { %2019 = vmatpush.bf16.msra.mxu0 %v4613_v25  ;;  %v4597_v51 = vor.u32 %v5725_v48, %v4596_v49  ;;  %v4574_v25 = vld [vmem:[%s8921_s16 + $0x68] sm:$0xf0]  ;;  %v5766_v49 = vld [vmem:[%s8921_s16 + $0x1e4] sm:$0xf] }
 0x2f7   :  { %2055 = vmatpush.bf16.msrb.mxu2 %v4741_v42  ;;  %v4577_v28 = vor.u32 %v5718_v23, %v4574_v25  ;;  %v4566_v42 = vld [vmem:[%s8921_s16 + $0x58] sm:$0xf0]  ;;  %v4766_v48 = vld [vmem:[%s8921_s16 + $0x1e8] sm:$0xf0]  ;;  %v5726_v23 = vld [vmem:[%s8921_s16 + $0xa4] sm:$0xf] }
 0x2f8   :  { %v4569_v46 = vor.u32 %v5716_v41, %v4566_v42 }
 0x2fa   :  { %2020 = vmatpush.bf16.msra.mxu0 %v4605_v38  ;;  %v4660_v38 = vld [vmem:[%s8921_s16 + $0x110] sm:$0xf] }
 0x2fe   :  { %2021 = vmatpush.bf16.msra.mxu0 %v4597_v51  ;;  %v4769_v51 = vor.u32 %v5766_v49, %v4766_v48  ;;  %v4534_v49 = vld [vmem:[%s8921_s16 + $0x18] sm:$0xf0]  ;;  %v5724_v48 = vld [vmem:[%s8921_s16 + $0x94] sm:$0xf] }
 0x302   :  { %2022 = vmatpush.bf16.msra.mxu0 %v4589_v62 }
 0x304   :  { %4518 = vmatmul.msk.bf16.vlgmr.msrb.gmra.mxu1 %vm118_vm0, %v6172_v22  ;;  %4519 = vmatmul.msk.bf16.vlgmr.msrb.gmra.mxu0 %vm118_vm0, %v6172_v22 }
 0x305   :  { %4521 = vmatmul.msk.bf16.vlgmr.msra.gmra.mxu2 %vm118_vm0, %v6172_v22  ;;  %2033 = vmatpush.bf16.msrb.mxu1 %v4709_v26  ;;  %v5734_v26 = vld [vmem:[%s8921_s16 + $0xe4] sm:$0xf] }
 0x306   :  { %2087 = vmatpush.bf16.msrb.mxu0 %v4649_v16  ;;  %v4641_v29 = vor.u32 %v5734_v26, %v4638_v27  ;;  %v4713_v16 = vor.u32 %v5752_v13, %v4710_v14  ;;  %v5750_v26 = vld [vmem:[%s8921_s16 + $0x164] sm:$0xf]  ;;  %v4702_v27 = vld [vmem:[%s8921_s16 + $0x168] sm:$0xf0]  ;;  %v4726_v14 = vld [vmem:[%s8921_s16 + $0x198] sm:$0xf0] }
 0x307   :  { %v4705_v31 = vor.u32 %v5750_v26, %v4702_v27  ;;  %v5744_v26 = vld [vmem:[%s8921_s16 + $0x134] sm:$0xf]  ;;  %v4678_v27 = vld [vmem:[%s8921_s16 + $0x138] sm:$0xf0] }
 0x309   :  { %2034 = vmatpush.bf16.msrb.mxu1 %v4701_v39  ;;  %v5741_v39 = vld [vmem:[%s8921_s16 + $0x114] sm:$0xf0] }
 0x30a   :  { %2088 = vmatpush.bf16.msrb.mxu0 %v4641_v29  ;;  %v4661_v40 = vor.u32 %v5741_v39, %v4660_v38  ;;  %v4742_v38 = vld [vmem:[%s8921_s16 + $0x1b8] sm:$0xf0] }
 0x314   :  { %4520 = vmatmul.msk.bf16.vlgmr.msra.gmra.mxu1 %vm118_vm0, %v6172_v22  ;;  %v4572_v22 = vld [vmem:[%s8921_s16 + $0x60] sm:$0xf] }
 0x315   :  { %v4573_v57 = vor.u32 %v5719_v55, %v4572_v22  ;;  %v4693_v22 = vor.u32 %v5749_v52, %v4692_v50  ;;  %v4733_v55 = vor.u32 %v5759_v54, %v4732_v53  ;;  %v4652_v52 = vld [vmem:[%s8921_s16 + $0x100] sm:$0xf]  ;;  %v5739_v53 = vld [vmem:[%s8921_s16 + $0x104] sm:$0xf0]  ;;  %v5714_v54 = vld [vmem:[%s8921_s16 + $0x44] sm:$0xf] }
 0x317   :  { %1998 = vmatpush.bf16.msrb.mxu3 %v4573_v57  ;;  %v5707_v57 = vld [vmem:[%s8921_s16 + $0x4] sm:$0xf0]  ;;  %2035 = vmatpush.bf16.msrb.mxu1 %v4693_v22  ;;  %v4653_v22 = vor.u32 %v5739_v53, %v4652_v52  ;;  %v4598_v53 = vld [vmem:[%s8921_s16 + $0x98] sm:$0xf0] }
 0x318   :  { %2056 = vmatpush.bf16.msrb.mxu2 %v4733_v55  ;;  %v4525_v59 = vor.u32 %v5707_v57, %v4524_v56  ;;  %v4558_v55 = vld [vmem:[%s8921_s16 + $0x48] sm:$0xf0]  ;;  %v5730_v56 = vld [vmem:[%s8921_s16 + $0xc4] sm:$0xf] }
 0x319   :  { %v4622_v57 = vld [vmem:[%s8921_s16 + $0xc8] sm:$0xf0]  ;;  %v4561_v58 = vor.u32 %v5714_v54, %v4558_v55  ;;  %v5748_v54 = vld [vmem:[%s8921_s16 + $0x154] sm:$0xf]  ;;  %v4601_v55 = vor.u32 %v5724_v48, %v4598_v53 }
 0x31b   :  { %1999 = vmatpush.bf16.msrb.mxu3 %v4565_v2  ;;  %2036 = vmatpush.bf16.msrb.mxu1 %v4685_v4 }
 0x31c   :  { %2057 = vmatpush.bf16.msrb.mxu2 %v4725_v5  ;;  %v7513_v5 = vld [vmem:[%s8922_s15] sm:$0xf] }
 0x31d   :  { %v1476_v29 = vperm.slane %v7513_v5, 1  ;;  %v1478_v41 = vperm.slane %v7513_v5, 3 }
 0x31f   :  { %2000 = vmatpush.bf16.msrb.mxu3 %v4557_v11  ;;  %v4677_v11 = vor.u32 %v5745_v6, %v4676_v9  ;;  %v5712_v9 = vld [vmem:[%s8921_s16 + $0x34] sm:$0xf]  ;;  %v4550_v6 = vld [vmem:[%s8921_s16 + $0x38] sm:$0xf0] }
 0x320   :  { %2058 = vmatpush.bf16.msrb.mxu2 %v4717_v19  ;;  %v5710_v19 = vld [vmem:[%s8921_s16 + $0x24] sm:$0xf] }
 0x321   :  { %2037 = vmatpush.bf16.msrb.mxu1 %v4677_v11  ;;  %v4553_v11 = vor.u32 %v5712_v9, %v4550_v6  ;;  %v5722_v9 = vld [vmem:[%s8921_s16 + $0x84] sm:$0xf]  ;;  %v5756_v6 = vld [vmem:[%s8921_s16 + $0x194] sm:$0xf] }
 0x323   :  { %2001 = vmatpush.bf16.msrb.mxu3 %v4549_v20  ;;  %v4668_v20 = vld [vmem:[%s8921_s16 + $0x120] sm:$0xf] }
 0x324   :  { %v4669_v24 = vor.u32 %v5743_v21, %v4668_v20  ;;  %2123 = vmatpush.bf16.msra.mxu2 %v4777_v34  ;;  %v4753_v20 = vor.u32 %v5762_v17, %v4750_v18  ;;  %v4542_v21 = vld [vmem:[%s8921_s16 + $0x28] sm:$0xf0]  ;;  %v5760_v34 = vld [vmem:[%s8921_s16 + $0x1b4] sm:$0xf] }
 0x325   :  { %v4545_v25 = vor.u32 %v5710_v19, %v4542_v21  ;;  %v4745_v42 = vor.u32 %v5760_v34, %v4742_v38  ;;  %v4729_v21 = vor.u32 %v5756_v6, %v4726_v14  ;;  %v4718_v34 = vld [vmem:[%s8921_s16 + $0x188] sm:$0xf0] }
 0x326   :  { %2038 = vmatpush.bf16.msrb.mxu1 %v4669_v24  ;;  %v4606_v24 = vld [vmem:[%s8921_s16 + $0xa8] sm:$0xf0] }
 0x327   :  { %2002 = vmatpush.bf16.msrb.mxu3 %v4541_v33  ;;  %v4609_v30 = vor.u32 %v5726_v23, %v4606_v24 }
 0x328   :  { %2124 = vmatpush.bf16.msra.mxu2 %v4769_v51 }
 0x32a   :  { %2039 = vmatpush.bf16.msrb.mxu1 %v4661_v40 }
 0x32b   :  { %2003 = vmatpush.bf16.msrb.mxu3 %v4533_v47  ;;  %v4630_v47 = vld [vmem:[%s8921_s16 + $0xd8] sm:$0xf0] }
 0x32c   :  { %v4633_v50 = vor.u32 %v5732_v45, %v4630_v47  ;;  %2125 = vmatpush.bf16.msra.mxu2 %v4761_v0  ;;  %v5708_v47 = vld [vmem:[%s8921_s16 + $0x14] sm:$0xf] }
 0x32d   :  { %v4537_v52 = vor.u32 %v5708_v47, %v4534_v49 }
 0x32e   :  { %2089 = vmatpush.bf16.msrb.mxu0 %v4633_v50  ;;  %2040 = vmatpush.bf16.msrb.mxu1 %v4653_v22  ;;  %v4694_v22 = vld [vmem:[%s8921_s16 + $0x158] sm:$0xf0] }
 0x32f   :  { %2004 = vmatpush.bf16.msrb.mxu3 %v4525_v59  ;;  %v4625_v59 = vor.u32 %v5730_v56, %v4622_v57  ;;  %v4697_v56 = vor.u32 %v5748_v54, %v4694_v22  ;;  %v5758_v57 = vld [vmem:[%s8921_s16 + $0x1a4] sm:$0xf]  ;;  %v4812_v22 = vld [vmem:[%s8923_s18 + $0x40] sm:$0xf] }
 0x330   :  { %2126 = vmatpush.bf16.msra.mxu2 %v4753_v20 }
 0x332   :  { %2090 = vmatpush.bf16.msrb.mxu0 %v4625_v59  ;;  %2105 = vmatpush.bf16.msra.mxu1 %v4713_v16  ;;  %v5706_v59 = vld [vmem:[%s8921_s16 + $0x4] sm:$0xf] }
 0x333   :  { %2069 = vmatpush.bf16.msra.mxu3 %v4585_v15  ;;  %v4617_v15 = vor.u32 %v5728_v10, %v4614_v12 }
 0x334   :  { %2127 = vmatpush.bf16.msra.mxu2 %v4745_v42 }
 0x336   :  { %2091 = vmatpush.bf16.msrb.mxu0 %v4617_v15  ;;  %2106 = vmatpush.bf16.msra.mxu1 %v4705_v31  ;;  %v5754_v31 = vld [vmem:[%s8921_s16 + $0x184] sm:$0xf] }
 0x337   :  { %2070 = vmatpush.bf16.msra.mxu3 %v4577_v28  ;;  %v1475_v28 = vperm.slane %v7513_v5, 0  ;;  %v4721_v38 = vor.u32 %v5754_v31, %v4718_v34  ;;  %v5782_v31 = vld [vmem:[%s8923_s18 + $0x64] sm:$0xf]  ;;  %v4830_v34 = vld [vmem:[%s8923_s18 + $0x70] sm:$0xf0] }
 0x33a   :  { %2092 = vmatpush.bf16.msrb.mxu0 %v4609_v30  ;;  %2107 = vmatpush.bf16.msra.mxu1 %v4697_v56  ;;  %v4681_v30 = vor.u32 %v5744_v26, %v4678_v27  ;;  %v5773_v26 = vld [vmem:[%s8923_s18 + $0x14] sm:$0xf0] }
 0x33b   :  { %2071 = vmatpush.bf16.msra.mxu3 %v4569_v46 }
 0x33e   :  { %2093 = vmatpush.bf16.msrb.mxu0 %v4601_v55  ;;  %v5780_v55 = vld [vmem:[%s8923_s18 + $0x4c] sm:$0xf0] }
 0x33f   :  { %2072 = vmatpush.bf16.msra.mxu3 %v4561_v58  ;;  %v4734_v58 = vld [vmem:[%s8921_s16 + $0x1a8] sm:$0xf0] }
 0x343   :  { %2073 = vmatpush.bf16.msra.mxu3 %v4553_v11 }
 0x347   :  { %2074 = vmatpush.bf16.msra.mxu3 %v4545_v25 }
 0x34b   :  { %2075 = vmatpush.bf16.msra.mxu3 %v4537_v52  ;;  %v4828_v52 = vld [vmem:[%s8923_s18 + $0x60] sm:$0xf] }
 0x361   :  { %v7342_v43 = vpop.f32.mrf.mxu1  ;;  %v7344_v44 = vpop.f32.mrf.mxu0 }
 0x368   :  { %v7394_v2 = vpop.f32.mrf.mxu2  ;;  %v7396_v3 = vpop.f32.mrf.mxu3 }
 0x369   :  { %v7398_v7 = vpop.f32.mrf.mxu1  ;;  %v7400_v8 = vpop.f32.mrf.mxu0 }
 0x370   :  { %v7450_v32 = vpop.f32.mrf.mxu2  ;;  %v7452_v33 = vpop.f32.mrf.mxu3 }
 0x371   :  { %v7454_v35 = vpop.f32.mrf.mxu1  ;;  %v7456_v36 = vpop.f32.mrf.mxu0 }
 0x378   :  { %v7506_v62 = vpop.f32.mrf.mxu2  ;;  %v7508_v63 = vpop.f32.mrf.mxu3 }
 0x379   :  { %v1409_v1 = vpop.f32.mrf.mxu1  ;;  %v1427_v4 = vpop.f32.mrf.mxu0 }
 0x37a   :  { %v4526_v4 = vld [vmem:[%s8921_s16 + $0x8] sm:$0xf0] }
 0x37b   :  { %v4529_v15 = vor.u32 %v5706_v59, %v4526_v4  ;;  %v4813_v59 = vor.u32 %v5780_v55, %v4812_v22  ;;  %v2219_v22 = vpack.c.bf16 %v7193_v37, %v7193_v37  ;;  %v5216_v55 = vld [vmem:[%s8924_s20 + $0x2e0] sm:$0xf] }
 0x37c   :  { %v5200_v37 = vld [vmem:[%s8924_s20 + $0x2c0] sm:$0xf] }
 0x37d   :  { %2076 = vmatpush.bf16.msra.mxu3 %v4529_v15  ;;  %v4796_v15 = vld [vmem:[%s8923_s18 + $0x20] sm:$0xf] }
 0x380   :  { %v1445_v39 = vpop.f32.mrf.mxu2  ;;  %v1463_v40 = vpop.f32.mrf.mxu3 }
 0x381   :  { %v1532_v45 = vpop.f32.mrf.mxu1  ;;  %v1545_v46 = vpop.f32.mrf.mxu0  ;;  %v5742_v39 = vld [vmem:[%s8921_s16 + $0x124] sm:$0xf] }
 0x382   :  { %v7575_v50 = vadd.f32 %v1532_v45, %v1475_v28  ;;  %v7577_v51 = vadd.f32 %v1545_v46, %v1476_v29 }
 0x384   :  { %v1575_v60 = vadd.f32 %v7575_v50, %v7342_v43  ;;  %v1579_v61 = vadd.f32 %v7575_v50, %v7398_v7  ;;  %v1576_v0 = vadd.f32 %v7577_v51, %v7344_v44  ;;  %v1580_v1 = vadd.f32 %v7577_v51, %v7400_v8  ;;  %v4590_v43 = vld [vmem:[%s8921_s16 + $0x88] sm:$0xf0]  ;;  %v5746_v44 = vld [vmem:[%s8921_s16 + $0x144] sm:$0xf] }
 0x385   :  { %v4737_v7 = vor.u32 %v5758_v57, %v4734_v58  ;;  %v4686_v8 = vld [vmem:[%s8921_s16 + $0x148] sm:$0xf0]  ;;  %v4593_v16 = vor.u32 %v5722_v9, %v4590_v43  ;;  %v1583_v45 = vadd.f32 %v7575_v50, %v7454_v35  ;;  %v1584_v47 = vadd.f32 %v7577_v51, %v7456_v36  ;;  %v5740_v35 = vld [vmem:[%s8921_s16 + $0x114] sm:$0xf]  ;;  %v4662_v36 = vld [vmem:[%s8921_s16 + $0x118] sm:$0xf0] }
 0x386   :  { %v1587_v10 = vmax.f32 %v1575_v60, 0.0  ;;  %v1591_v11 = vmax.f32 %v1579_v61, 0.0  ;;  %v1588_v12 = vmax.f32 %v1576_v0, 0.0  ;;  %v1592_v13 = vmax.f32 %v1580_v1, 0.0  ;;  %v5738_v60 = vld [vmem:[%s8921_s16 + $0x104] sm:$0xf] }
 0x387   :  { %2128 = vmatpush.bf16.msra.mxu2 %v4737_v7  ;;  %v4689_v20 = vor.u32 %v5746_v44, %v4686_v8  ;;  %2094 = vmatpush.bf16.msrb.mxu0 %v4593_v16  ;;  %v1595_v51 = vmax.f32 %v1583_v45, 0.0  ;;  %v4665_v54 = vor.u32 %v5740_v35, %v4662_v36  ;;  %v1596_v58 = vmax.f32 %v1584_v47, 0.0  ;;  %v4654_v61 = vld [vmem:[%s8921_s16 + $0x108] sm:$0xf0]  ;;  %v4836_v44 = vld [vmem:[%s8923_s18 + $0x68] sm:$0xf] }
 0x388   :  { %v1571_v17 = vpop.f32.mrf.mxu2  ;;  %v7626_v18 = vpack.c.bf16 %v1591_v11, %v1587_v10  ;;  %v7628_v19 = vpack.c.bf16 %v1592_v13, %v1588_v12  ;;  %v4657_v43 = vor.u32 %v5738_v60, %v4654_v61  ;;  %v5785_v8 = vld [vmem:[%s8923_s18 + $0x74] sm:$0xf0]  ;;  %v4820_v10 = vld [vmem:[%s8923_s18 + $0x48] sm:$0xf]  ;;  %v5776_v16 = vld [vmem:[%s8923_s18 + $0x2c] sm:$0xf0] }
 0x389   :  { %v1572_v23 = vadd.f32 %v1571_v17, %v1478_v41  ;;  %v1534_v24 = vpop.f32.mrf.mxu1  ;;  %v1547_v25 = vpop.f32.mrf.mxu0  ;;  %2108 = vmatpush.bf16.msra.mxu1 %v4689_v20  ;;  %v1477_v41 = vperm.slane %v7513_v5, 2  ;;  %v5784_v5 = vld [vmem:[%s8923_s18 + $0x6c] sm:$0xf0]  ;;  %v7687_v9 = vpack.c.bf16 %v1595_v51, %v1595_v51  ;;  %v5781_v11 = vld [vmem:[%s8923_s18 + $0x54] sm:$0xf0]  ;;  %v4797_v20 = vor.u32 %v5776_v16, %v4796_v15 }
 0x38a   :  { %2005 = vmatmul.bf16.vlgmr.msrb.gmra.mxu3 %v7626_v18  ;;  %2023 = vmatmul.bf16.vlgmr.msra.gmra.mxu0 %v7628_v19  ;;  %v4829_v53 = vor.u32 %v5784_v5, %v4828_v52  ;;  %v4821_v12 = vor.u32 %v5781_v11, %v4820_v10  ;;  %v4804_v17 = vld [vmem:[%s8923_s18 + $0x28] sm:$0xf]  ;;  %v4822_v45 = vld [vmem:[%s8923_s18 + $0x58] sm:$0xf0]  ;;  %v5774_v47 = vld [vmem:[%s8923_s18 + $0x24] sm:$0xf] }
 0x38b   :  { %v1578_v28 = vadd.f32 %v1572_v23, %v7396_v3  ;;  %v1582_v29 = vadd.f32 %v1572_v23, %v7452_v33  ;;  %2129 = vmatpush.bf16.msra.mxu2 %v4729_v21  ;;  %v4670_v3 = vld [vmem:[%s8921_s16 + $0x128] sm:$0xf0]  ;;  %v1586_v4 = vadd.f32 %v1572_v23, %v7508_v63  ;;  %v4837_v63 = vor.u32 %v5785_v8, %v4836_v44  ;;  %v5777_v21 = vld [vmem:[%s8923_s18 + $0x34] sm:$0xf0]  ;;  %v5772_v23 = vld [vmem:[%s8923_s18 + $0xc] sm:$0xf0] }
 0x38c   :  { %v4673_v46 = vor.u32 %v5742_v39, %v4670_v3  ;;  %2333 = vmatpush.bf16.msrb.mxu3 %v4829_v53  ;;  %v4805_v24 = vor.u32 %v5777_v21, %v4804_v17  ;;  %v4788_v25 = vld [vmem:[%s8923_s18 + $0x8] sm:$0xf]  ;;  %v4833_v39 = vor.u32 %v5782_v31, %v4830_v34  ;;  %v4838_v3 = vld [vmem:[%s8923_s18 + $0x78] sm:$0xf0]  ;;  %v4782_v53 = vld [vmem:[%s8923_s18 + $0x10] sm:$0xf0] }
 0x38d   :  { %v1590_v33 = vmax.f32 %v1578_v28, 0.0  ;;  %v1594_v40 = vmax.f32 %v1582_v29, 0.0  ;;  %2109 = vmatpush.bf16.msra.mxu1 %v4681_v30  ;;  %v1598_v6 = vmax.f32 %v1586_v4, 0.0  ;;  %2359 = vmatpush.bf16.msra.mxu0 %v4837_v63  ;;  %v4789_v29 = vor.u32 %v5773_v26, %v4788_v25  ;;  %v4806_v52 = vld [vmem:[%s8923_s18 + $0x38] sm:$0xf0] }
 0x38e   :  { %v5771_v36 = vld [vmem:[%s8923_s18 + $0xc] sm:$0xf]  ;;  %v4790_v51 = vld [vmem:[%s8923_s18 + $0x18] sm:$0xf0]  ;;  %v4960_v60 = vld [vmem:[%s8924_s20 + $0xe0] sm:$0xf] }
 0x38f   :  { %v7653_v42 = vpack.c.bf16 %v1594_v40, %v1590_v33  ;;  %2130 = vmatpush.bf16.msra.mxu2 %v4721_v38  ;;  %v1606_v13 = vpack.c.bf16 %v1598_v6, %v1598_v6  ;;  %v5783_v38 = vld [vmem:[%s8923_s18 + $0x6c] sm:$0xf]  ;;  %v5778_v40 = vld [vmem:[%s8923_s18 + $0x44] sm:$0xf]  ;;  %v5816_v61 = vld [vmem:[%s8924_s20 + $0xec] sm:$0xf0] }
 0x390   :  { %v1573_v49 = vpop.f32.mrf.mxu2  ;;  %2334 = vmatpush.bf16.msrb.mxu3 %v4813_v59  ;;  %v4841_v33 = vor.u32 %v5783_v38, %v4838_v3  ;;  %v5872_v4 = vld [vmem:[%s8924_s20 + $0x2ac] sm:$0xf0]  ;;  %v4928_v63 = vld [vmem:[%s8924_s20 + $0xa0] sm:$0xf] }
 0x391   :  { %2059 = vmatmul.bf16.vlgmr.msrb.gmra.mxu2 %v7653_v42  ;;  %v1558_v48 = vpop.f32.mrf.mxu1  ;;  %2110 = vmatpush.bf16.msra.mxu1 %v4673_v46  ;;  %v4798_v49 = vld [vmem:[%s8923_s18 + $0x30] sm:$0xf0]  ;;  %v5868_v44 = vld [vmem:[%s8924_s20 + $0x28c] sm:$0xf0]  ;;  %v5152_v11 = vld [vmem:[%s8924_s20 + $0x260] sm:$0xf] }
 0x392   :  { %v1559_v50 = vadd.f32 %v1558_v48, %v1477_v41  ;;  %2360 = vmatpush.bf16.msra.mxu0 %v4821_v12  ;;  %v4814_v41 = vld [vmem:[%s8923_s18 + $0x50] sm:$0xf0]  ;;  %v5775_v48 = vld [vmem:[%s8923_s18 + $0x2c] sm:$0xf]  ;;  %v4801_v5 = vor.u32 %v5774_v47, %v4798_v49  ;;  %v5808_v6 = vld [vmem:[%s8924_s20 + $0xac] sm:$0xf0] }
 0x393   :  { %v4809_v35 = vor.u32 %v5775_v48, %v4806_v52  ;;  %v4929_v10 = vor.u32 %v5808_v6, %v4928_v63  ;;  %v5864_v12 = vld [vmem:[%s8924_s20 + $0x26c] sm:$0xf0]  ;;  %v4912_v17 = vld [vmem:[%s8924_s20 + $0x80] sm:$0xf] }
 0x394   :  { %v1577_v56 = vadd.f32 %v1559_v50, %v7394_v2  ;;  %v1581_v57 = vadd.f32 %v1559_v50, %v7450_v32  ;;  %v7689_v2 = vpack.c.bf16 %v1596_v58, %v1596_v58  ;;  %v1585_v14 = vadd.f32 %v1559_v50, %v7506_v62  ;;  %v4780_v62 = vld [vmem:[%s8923_s18] sm:$0xf]  ;;  %2335 = vmatpush.bf16.msrb.mxu3 %v4797_v20  ;;  %v5770_v50 = vld [vmem:[%s8923_s18 + $0x4] sm:$0xf]  ;;  %v5876_v58 = vld [vmem:[%s8924_s20 + $0x2cc] sm:$0xf0] }
 0x395   :  { %2111 = vmatpush.bf16.msra.mxu1 %v4665_v54  ;;  %v4781_v27 = vor.u32 %v5772_v23, %v4780_v62  ;;  %v4793_v54 = vor.u32 %v5771_v36, %v4790_v51  ;;  %v5201_v59 = vor.u32 %v5876_v58, %v5200_v37  ;;  %v5912_v15 = vld [vmem:[%s8924_s20 + $0x3ec] sm:$0xf0]  ;;  %v5136_v62 = vld [vmem:[%s8924_s20 + $0x240] sm:$0xf] }
 0x396   :  { %v1589_v0 = vmax.f32 %v1577_v56, 0.0  ;;  %v1593_v1 = vmax.f32 %v1581_v57, 0.0  ;;  %v1597_v28 = vmax.f32 %v1585_v14, 0.0  ;;  %2361 = vmatpush.bf16.msra.mxu0 %v4805_v24  ;;  %v5880_v56 = vld [vmem:[%s8924_s20 + $0x2ec] sm:$0xf0]  ;;  %v5153_v14 = vor.u32 %v5864_v12, %v5152_v11 }
 0x397   :  { %v5217_v57 = vor.u32 %v5880_v56, %v5216_v55  ;;  %v5804_v20 = vld [vmem:[%s8924_s20 + $0x8c] sm:$0xf0]  ;;  %v5328_v24 = vld [vmem:[%s8924_s20 + $0x3c0] sm:$0xf]  ;;  %v5814_v11 = vld [vmem:[%s8924_s20 + $0xe4] sm:$0xf] }
 0x398   :  { %v7691_v32 = vpack.c.bf16 %v1593_v1, %v1589_v0  ;;  %2336 = vmatpush.bf16.msrb.mxu3 %v4781_v27  ;;  %v1605_v30 = vpack.c.bf16 %v1597_v28, %v1597_v28  ;;  %v4961_v0 = vor.u32 %v5816_v61, %v4960_v60  ;;  %v5184_v1 = vld [vmem:[%s8924_s20 + $0x2a0] sm:$0xf]  ;;  %v4913_v21 = vor.u32 %v5804_v20, %v4912_v17  ;;  %v5860_v23 = vld [vmem:[%s8924_s20 + $0x24c] sm:$0xf0]  ;;  %v4962_v12 = vld [vmem:[%s8924_s20 + $0xf0] sm:$0xf0] }
 0x399   :  { %v1560_v7 = vpop.f32.mrf.mxu1  ;;  %2112 = vmatpush.bf16.msra.mxu1 %v4657_v43  ;;  %v5137_v26 = vor.u32 %v5860_v23, %v5136_v62  ;;  %v5908_v27 = vld [vmem:[%s8924_s20 + $0x3cc] sm:$0xf0]  ;;  %v5088_v31 = vld [vmem:[%s8924_s20 + $0x1e0] sm:$0xf]  ;;  %v5186_v62 = vld [vmem:[%s8924_s20 + $0x2b0] sm:$0xf0] }
 0x39a   :  { %2010 = vmatmul.bf16.gmra.mxu3 %v7687_v9  ;;  %2028 = vmatmul.bf16.gmra.mxu0 %v7689_v2  ;;  %v5168_v7 = vld [vmem:[%s8924_s20 + $0x280] sm:$0xf]  ;;  %v5329_v28 = vor.u32 %v5908_v27, %v5328_v24  ;;  %v5848_v38 = vld [vmem:[%s8924_s20 + $0x1ec] sm:$0xf0] }
 0x39b   :  { %2041 = vmatmul.bf16.vlgmr.msrb.gmra.mxu1 %v7691_v32  ;;  %2362 = vmatpush.bf16.msra.mxu0 %v4789_v29  ;;  %v5169_v8 = vor.u32 %v5868_v44, %v5168_v7  ;;  %v4896_v29 = vld [vmem:[%s8924_s20 + $0x60] sm:$0xf]  ;;  %v5844_v52 = vld [vmem:[%s8924_s20 + $0x1cc] sm:$0xf0] }
 0x39c   :  { %3167 = vmatpush.bf16.msrb.mxu2 %v4961_v0  ;;  %v5120_v3 = vld [vmem:[%s8924_s20 + $0x220] sm:$0xf]  ;;  %v5792_v37 = vld [vmem:[%s8924_s20 + $0x2c] sm:$0xf0] }
 0x39d   :  { %2372 = vmatpush.bf16.msrb.mxu1 %v4841_v33  ;;  %v5856_v33 = vld [vmem:[%s8924_s20 + $0x22c] sm:$0xf0]  ;;  %v5072_v47 = vld [vmem:[%s8924_s20 + $0x1c0] sm:$0xf] }
 0x39e   :  { %v5056_v58 = vld [vmem:[%s8924_s20 + $0x1a0] sm:$0xf]  ;;  %v5840_v60 = vld [vmem:[%s8924_s20 + $0x1ac] sm:$0xf0] }
 0x39f   :  { %v5057_v61 = vor.u32 %v5840_v60, %v5056_v58  ;;  %v5280_v0 = vld [vmem:[%s8924_s20 + $0x360] sm:$0xf]  ;;  %v5788_v44 = vld [vmem:[%s8924_s20 + $0xc] sm:$0xf0]  ;;  %v5802_v60 = vld [vmem:[%s8924_s20 + $0x84] sm:$0xf] }
 0x3a0   :  { %v4848_v7 = vld [vmem:[%s8924_s20] sm:$0xf]  ;;  %v5832_v27 = vld [vmem:[%s8924_s20 + $0x16c] sm:$0xf0] }
 0x3a1   :  { %2064 = vmatmul.bf16.gmra.mxu2 %v1606_v13  ;;  %v4849_v6 = vor.u32 %v5788_v44, %v4848_v7 }
 0x3aa   :  { %2077 = vmatmul.bf16.vlgmr.msra.gmra.mxu3 %v7626_v18  ;;  %2095 = vmatmul.bf16.vlgmr.msrb.gmra.mxu0 %v7628_v19  ;;  %v5779_v18 = vld [vmem:[%s8923_s18 + $0x4c] sm:$0xf]  ;;  %v4817_v19 = vor.u32 %v5778_v40, %v4814_v41  ;;  %v5312_v40 = vld [vmem:[%s8924_s20 + $0x3a0] sm:$0xf]  ;;  %v5121_v41 = vor.u32 %v5856_v33, %v5120_v3  ;;  %v5866_v3 = vld [vmem:[%s8924_s20 + $0x284] sm:$0xf] }
 0x3ab   :  { %2046 = vmatmul.bf16.gmra.mxu1 %v1605_v30  ;;  %2346 = vmatpush.bf16.msra.mxu3 %v4833_v39  ;;  %v4825_v46 = vor.u32 %v5779_v18, %v4822_v45  ;;  %v5089_v39 = vor.u32 %v5848_v38, %v5088_v31  ;;  %v5904_v18 = vld [vmem:[%s8924_s20 + $0x3ac] sm:$0xf0]  ;;  %v4880_v45 = vld [vmem:[%s8924_s20 + $0x40] sm:$0xf]  ;;  %v5170_v33 = vld [vmem:[%s8924_s20 + $0x290] sm:$0xf0] }
 0x3ac   :  { %3193 = vmatpush.bf16.msrb.mxu0 %v5217_v57  ;;  %v4864_v57 = vld [vmem:[%s8924_s20 + $0x20] sm:$0xf]  ;;  %v5888_v38 = vld [vmem:[%s8924_s20 + $0x32c] sm:$0xf0] }
 0x3ad   :  { %2373 = vmatpush.bf16.msrb.mxu1 %v4825_v46  ;;  %v5796_v46 = vld [vmem:[%s8924_s20 + $0x4c] sm:$0xf0] }
 0x3ae   :  { %v4881_v48 = vor.u32 %v5796_v46, %v4880_v45 }
 0x3af   :  { %2347 = vmatpush.bf16.msra.mxu3 %v4817_v19  ;;  %v5313_v19 = vor.u32 %v5904_v18, %v5312_v40  ;;  %v5008_v18 = vld [vmem:[%s8924_s20 + $0x140] sm:$0xf] }
 0x3b0   :  { %3194 = vmatpush.bf16.msrb.mxu0 %v5201_v59  ;;  %v4865_v59 = vor.u32 %v5792_v37, %v4864_v57  ;;  %v4992_v57 = vld [vmem:[%s8924_s20 + $0x120] sm:$0xf]  ;;  %v5824_v37 = vld [vmem:[%s8924_s20 + $0x12c] sm:$0xf0] }
 0x3b1   :  { %2131 = vmatmul.bf16.vlgmr.msra.gmra.mxu2 %v7653_v42  ;;  %v4785_v42 = vor.u32 %v5770_v50, %v4782_v53  ;;  %2374 = vmatpush.bf16.msrb.mxu1 %v4809_v35  ;;  %v5104_v35 = vld [vmem:[%s8924_s20 + $0x200] sm:$0xf]  ;;  %v5852_v50 = vld [vmem:[%s8924_s20 + $0x20c] sm:$0xf0] }
 0x3b2   :  { %v5296_v53 = vld [vmem:[%s8924_s20 + $0x380] sm:$0xf]  ;;  %v5105_v51 = vor.u32 %v5852_v50, %v5104_v35  ;;  %v5884_v35 = vld [vmem:[%s8924_s20 + $0x30c] sm:$0xf0] }
 0x3b3   :  { %2348 = vmatpush.bf16.msra.mxu3 %v4801_v5  ;;  %v5073_v5 = vor.u32 %v5844_v52, %v5072_v47  ;;  %v5806_v47 = vld [vmem:[%s8924_s20 + $0xa4] sm:$0xf] }
 0x3b5   :  { %2375 = vmatpush.bf16.msrb.mxu1 %v4793_v54  ;;  %v5878_v54 = vld [vmem:[%s8924_s20 + $0x2e4] sm:$0xf] }
 0x3b7   :  { %2349 = vmatpush.bf16.msra.mxu3 %v4785_v42  ;;  %v5900_v42 = vld [vmem:[%s8924_s20 + $0x38c] sm:$0xf0] }
 0x3b8   :  { %v5297_v55 = vor.u32 %v5900_v42, %v5296_v53  ;;  %v5154_v42 = vld [vmem:[%s8924_s20 + $0x270] sm:$0xf0] }
 0x3ba   :  { %2082 = vmatmul.bf16.gmra.mxu3 %v7687_v9  ;;  %2100 = vmatmul.bf16.gmra.mxu0 %v7689_v2  ;;  %v5185_v9 = vor.u32 %v5872_v4, %v5184_v1  ;;  %v4944_v2 = vld [vmem:[%s8924_s20 + $0xc0] sm:$0xf]  ;;  %v5896_v1 = vld [vmem:[%s8924_s20 + $0x36c] sm:$0xf0] }
 0x3bb   :  { %2113 = vmatmul.bf16.vlgmr.msra.gmra.mxu1 %v7691_v32  ;;  %v5812_v32 = vld [vmem:[%s8924_s20 + $0xcc] sm:$0xf0]  ;;  %v5281_v4 = vor.u32 %v5896_v1, %v5280_v0  ;;  %v1671_v1 = vld [vmem:[%s8925_s17] sm:$0x3] }
 0x3bc   :  { %3195 = vmatpush.bf16.msrb.mxu0 %v5185_v9  ;;  %v4945_v43 = vor.u32 %v5812_v32, %v4944_v2  ;;  %v5874_v9 = vld [vmem:[%s8924_s20 + $0x2c4] sm:$0xf]  ;;  %v5202_v2 = vld [vmem:[%s8924_s20 + $0x2d0] sm:$0xf0] }
 0x3be   :  { %3168 = vmatpush.bf16.msrb.mxu2 %v4945_v43  ;;  %v5205_v43 = vor.u32 %v5874_v9, %v5202_v2  ;;  %v5858_v9 = vld [vmem:[%s8924_s20 + $0x244] sm:$0xf]  ;;  %v5138_v2 = vld [vmem:[%s8924_s20 + $0x250] sm:$0xf0] }
 0x3bf   :  { %v5141_v44 = vor.u32 %v5858_v9, %v5138_v2  ;;  %v5786_v9 = vld [vmem:[%s8924_s20 + $0x4] sm:$0xf] }
 0x3c0   :  { %3196 = vmatpush.bf16.msrb.mxu0 %v5169_v8  ;;  %v5040_v8 = vld [vmem:[%s8924_s20 + $0x180] sm:$0xf] }
 0x3c1   :  { %2136 = vmatmul.bf16.gmra.mxu2 %v1606_v13  ;;  %v5344_v13 = vld [vmem:[%s8924_s20 + $0x3e0] sm:$0xf] }
 0x3c2   :  { %3169 = vmatpush.bf16.msrb.mxu2 %v4929_v10  ;;  %v5345_v16 = vor.u32 %v5912_v15, %v5344_v13  ;;  %v5836_v10 = vld [vmem:[%s8924_s20 + $0x18c] sm:$0xf0]  ;;  %v5264_v15 = vld [vmem:[%s8924_s20 + $0x340] sm:$0xf] }
 0x3c3   :  { %v5041_v13 = vor.u32 %v5836_v10, %v5040_v8  ;;  %v5330_v8 = vld [vmem:[%s8924_s20 + $0x3d0] sm:$0xf0] }
 0x3c4   :  { %3197 = vmatpush.bf16.msrb.mxu0 %v5153_v14  ;;  %3206 = vmatpush.bf16.msra.mxu1 %v5345_v16  ;;  %v4965_v14 = vor.u32 %v5814_v11, %v4962_v12  ;;  %v5892_v16 = vld [vmem:[%s8924_s20 + $0x34c] sm:$0xf0]  ;;  %v5798_v12 = vld [vmem:[%s8924_s20 + $0x64] sm:$0xf] }
 0x3c5   :  { %v5265_v20 = vor.u32 %v5892_v16, %v5264_v15  ;;  %v5820_v11 = vld [vmem:[%s8924_s20 + $0x10c] sm:$0xf0] }
 0x3c6   :  { %3170 = vmatpush.bf16.msrb.mxu2 %v4913_v21  ;;  %v5870_v21 = vld [vmem:[%s8924_s20 + $0x2a4] sm:$0xf] }
 0x3c7   :  { %v5189_v24 = vor.u32 %v5870_v21, %v5186_v62  ;;  %v5846_v21 = vld [vmem:[%s8924_s20 + $0x1e4] sm:$0xf]  ;;  %v5090_v62 = vld [vmem:[%s8924_s20 + $0x1f0] sm:$0xf0] }
 0x3c8   :  { %3198 = vmatpush.bf16.msrb.mxu0 %v5137_v26  ;;  %3207 = vmatpush.bf16.msra.mxu1 %v5329_v28  ;;  %v5024_v26 = vld [vmem:[%s8924_s20 + $0x160] sm:$0xf] }
 0x3c9   :  { %v5025_v28 = vor.u32 %v5832_v27, %v5024_v26  ;;  %v5093_v26 = vor.u32 %v5846_v21, %v5090_v62  ;;  %v5854_v27 = vld [vmem:[%s8924_s20 + $0x224] sm:$0xf] }
 0x3ca   :  { %4842 = vmatmul.msk.bf16.vlgmr.msrb.gmra.mxu3 %vm1386_vm6, %v2219_v22  ;;  %4844 = vmatmul.msk.bf16.vlgmr.msra.gmra.mxu0 %vm1386_vm6, %v2219_v22 }
 0x3cb   :  { %2118 = vmatmul.bf16.gmra.mxu1 %v1605_v30  ;;  %v5800_v30 = vld [vmem:[%s8924_s20 + $0x6c] sm:$0xf0]  ;;  %3180 = vmatpush.bf16.msrb.mxu3 %v5089_v39 }
 0x3cc   :  { %v4897_v34 = vor.u32 %v5800_v30, %v4896_v29  ;;  %3199 = vmatpush.bf16.msrb.mxu0 %v5121_v41  ;;  %3208 = vmatpush.bf16.msra.mxu1 %v5313_v19  ;;  %v5810_v29 = vld [vmem:[%s8924_s20 + $0xc4] sm:$0xf]  ;;  %v4946_v30 = vld [vmem:[%s8924_s20 + $0xd0] sm:$0xf0]  ;;  %v5173_v41 = vor.u32 %v5866_v3, %v5170_v33  ;;  %v5828_v19 = vld [vmem:[%s8924_s20 + $0x14c] sm:$0xf0] }
 0x3cd   :  { %v4949_v31 = vor.u32 %v5810_v29, %v4946_v30  ;;  %v5009_v46 = vor.u32 %v5828_v19, %v5008_v18  ;;  %v5902_v30 = vld [vmem:[%s8924_s20 + $0x3a4] sm:$0xf]  ;;  %v5074_v18 = vld [vmem:[%s8924_s20 + $0x1d0] sm:$0xf0] }
 0x3ce   :  { %3171 = vmatpush.bf16.msrb.mxu2 %v4897_v34  ;;  %v5248_v34 = vld [vmem:[%s8924_s20 + $0x320] sm:$0xf]  ;;  %v5842_v3 = vld [vmem:[%s8924_s20 + $0x1c4] sm:$0xf] }
 0x3cf   :  { %3181 = vmatpush.bf16.msrb.mxu3 %v5073_v5  ;;  %v5249_v39 = vor.u32 %v5888_v38, %v5248_v34  ;;  %v5232_v5 = vld [vmem:[%s8924_s20 + $0x300] sm:$0xf]  ;;  %v5794_v38 = vld [vmem:[%s8924_s20 + $0x44] sm:$0xf] }
 0x3d0   :  { %3200 = vmatpush.bf16.msrb.mxu0 %v5105_v51  ;;  %3209 = vmatpush.bf16.msra.mxu1 %v5297_v55  ;;  %v5233_v53 = vor.u32 %v5884_v35, %v5232_v5  ;;  %v5862_v51 = vld [vmem:[%s8924_s20 + $0x264] sm:$0xf]  ;;  %v8136_v35 = vperm.slane %v1671_v1, 1 }
 0x3d1   :  { %v5157_v55 = vor.u32 %v5862_v51, %v5154_v42  ;;  %v5298_v51 = vld [vmem:[%s8924_s20 + $0x390] sm:$0xf0] }
 0x3d2   :  { %3172 = vmatpush.bf16.msrb.mxu2 %v4881_v48  ;;  %v4930_v48 = vld [vmem:[%s8924_s20 + $0xb0] sm:$0xf0] }
 0x3d3   :  { %3182 = vmatpush.bf16.msrb.mxu3 %v5057_v61  ;;  %v4933_v52 = vor.u32 %v5806_v47, %v4930_v48  ;;  %v4914_v61 = vld [vmem:[%s8924_s20 + $0x90] sm:$0xf0]  ;;  %v5850_v48 = vld [vmem:[%s8924_s20 + $0x204] sm:$0xf] }
 0x3d4   :  { %3210 = vmatpush.bf16.msra.mxu1 %v5281_v4  ;;  %v4917_v0 = vor.u32 %v5802_v60, %v4914_v61  ;;  %v5894_v61 = vld [vmem:[%s8924_s20 + $0x364] sm:$0xf] }
 0x3d6   :  { %3173 = vmatpush.bf16.msrb.mxu2 %v4865_v59  ;;  %v4993_v59 = vor.u32 %v5824_v37, %v4992_v57 }
 0x3d7   :  { %3183 = vmatpush.bf16.msrb.mxu3 %v5041_v13  ;;  %v4898_v13 = vld [vmem:[%s8924_s20 + $0x70] sm:$0xf0] }
 0x3d8   :  { %3211 = vmatpush.bf16.msra.mxu1 %v5265_v20  ;;  %v4901_v20 = vor.u32 %v5798_v12, %v4898_v13  ;;  %v5266_v12 = vld [vmem:[%s8924_s20 + $0x350] sm:$0xf0] }
 0x3da   :  { %4843 = vmatmul.msk.bf16.vlgmr.msra.gmra.mxu3 %vm1386_vm6, %v2219_v22  ;;  %3174 = vmatpush.bf16.msrb.mxu2 %v4849_v6  ;;  %v4976_v6 = vld [vmem:[%s8924_s20 + $0x100] sm:$0xf] }
 0x3db   :  { %4845 = vmatmul.msk.bf16.vlgmr.msrb.gmra.mxu1 %vm1386_vm6, %v2219_v22  ;;  %v5218_v22 = vld [vmem:[%s8924_s20 + $0x2f0] sm:$0xf0]  ;;  %3184 = vmatpush.bf16.msrb.mxu3 %v5025_v28  ;;  %v4977_v16 = vor.u32 %v5820_v11, %v4976_v6  ;;  %v5890_v11 = vld [vmem:[%s8924_s20 + $0x344] sm:$0xf] }
 0x3dc   :  { %v5221_v56 = vor.u32 %v5878_v54, %v5218_v22  ;;  %3212 = vmatpush.bf16.msra.mxu1 %v5249_v39  ;;  %v5910_v54 = vld [vmem:[%s8924_s20 + $0x3e4] sm:$0xf]  ;;  %v5122_v28 = vld [vmem:[%s8924_s20 + $0x230] sm:$0xf0] }
 0x3dd   :  { %v5125_v29 = vor.u32 %v5854_v27, %v5122_v28  ;;  %v4882_v39 = vld [vmem:[%s8924_s20 + $0x50] sm:$0xf0] }
 0x3de   :  { %3245 = vmatpush.bf16.msra.mxu0 %v5221_v56  ;;  %3219 = vmatpush.bf16.msra.mxu2 %v4965_v14  ;;  %v5346_v56 = vld [vmem:[%s8924_s20 + $0x3f0] sm:$0xf0]  ;;  %v8088_v14 = vperm.slane %v1671_v1, 0 }
 0x3df   :  { %3185 = vmatpush.bf16.msrb.mxu3 %v5009_v46  ;;  %v5349_v58 = vor.u32 %v5910_v54, %v5346_v56  ;;  %v5077_v46 = vor.u32 %v5842_v3, %v5074_v18  ;;  %v4866_v56 = vld [vmem:[%s8924_s20 + $0x30] sm:$0xf0] }
 0x3e0   :  { %3213 = vmatpush.bf16.msra.mxu1 %v5233_v53  ;;  %v5026_v27 = vld [vmem:[%s8924_s20 + $0x170] sm:$0xf0] }
 0x3e2   :  { %3246 = vmatpush.bf16.msra.mxu0 %v5205_v43  ;;  %3220 = vmatpush.bf16.msra.mxu2 %v4949_v31  ;;  %v5906_v43 = vld [vmem:[%s8924_s20 + $0x3c4] sm:$0xf]  ;;  %v5314_v31 = vld [vmem:[%s8924_s20 + $0x3b0] sm:$0xf0] }
 0x3e3   :  { %3186 = vmatpush.bf16.msrb.mxu3 %v4993_v59  ;;  %v5333_v10 = vor.u32 %v5906_v43, %v5330_v8  ;;  %v5317_v34 = vor.u32 %v5902_v30, %v5314_v31 }
 0x3e4   :  { %3258 = vmatpush.bf16.msrb.mxu1 %v5349_v58  ;;  %v5058_v58 = vld [vmem:[%s8924_s20 + $0x1b0] sm:$0xf0] }
 0x3e6   :  { %3247 = vmatpush.bf16.msra.mxu0 %v5189_v24  ;;  %3221 = vmatpush.bf16.msra.mxu2 %v4933_v52  ;;  %v5898_v52 = vld [vmem:[%s8924_s20 + $0x384] sm:$0xf] }
 0x3e7   :  { %3187 = vmatpush.bf16.msrb.mxu3 %v4977_v16  ;;  %v5301_v54 = vor.u32 %v5898_v52, %v5298_v51  ;;  %v5269_v16 = vor.u32 %v5890_v11, %v5266_v12  ;;  %v5881_v11 = vld [vmem:[%s8924_s20 + $0x2f4] sm:$0xf0] }
 0x3e8   :  { %3259 = vmatpush.bf16.msrb.mxu1 %v5333_v10 }
 0x3ea   :  { %3248 = vmatpush.bf16.msra.mxu0 %v5173_v41  ;;  %3222 = vmatpush.bf16.msra.mxu2 %v4917_v0  ;;  %v4885_v41 = vor.u32 %v5794_v38, %v4882_v39  ;;  %v5282_v0 = vld [vmem:[%s8924_s20 + $0x370] sm:$0xf0] }
 0x3eb   :  { %3232 = vmatpush.bf16.msra.mxu3 %v5093_v26  ;;  %v5285_v1 = vor.u32 %v5894_v61, %v5282_v0  ;;  %v5830_v26 = vld [vmem:[%s8924_s20 + $0x164] sm:$0xf] }
 0x3ec   :  { %3260 = vmatpush.bf16.msrb.mxu1 %v5317_v34 }
 0x3ee   :  { %3249 = vmatpush.bf16.msra.mxu0 %v5157_v55  ;;  %3223 = vmatpush.bf16.msra.mxu2 %v4901_v20  ;;  %v5790_v55 = vld [vmem:[%s8924_s20 + $0x24] sm:$0xf] }
 0x3ef   :  { %3233 = vmatpush.bf16.msra.mxu3 %v5077_v46  ;;  %v4869_v37 = vor.u32 %v5790_v55, %v4866_v56  ;;  %v5234_v46 = vld [vmem:[%s8924_s20 + $0x310] sm:$0xf0]  ;;  %v5822_v55 = vld [vmem:[%s8924_s20 + $0x124] sm:$0xf] }
 0x3f0   :  { %3261 = vmatpush.bf16.msrb.mxu1 %v5301_v54 }
 0x3f2   :  { %3250 = vmatpush.bf16.msra.mxu0 %v5141_v44  ;;  %3224 = vmatpush.bf16.msra.mxu2 %v4885_v41  ;;  %v5042_v44 = vld [vmem:[%s8924_s20 + $0x190] sm:$0xf0] }
 0x3f3   :  { %v5010_v41 = vld [vmem:[%s8924_s20 + $0x150] sm:$0xf0] }
 0x3f4   :  { %3262 = vmatpush.bf16.msrb.mxu1 %v5285_v1 }
 0x3f6   :  { %3251 = vmatpush.bf16.msra.mxu0 %v5125_v29  ;;  %3225 = vmatpush.bf16.msra.mxu2 %v4869_v37  ;;  %v5029_v29 = vor.u32 %v5830_v26, %v5026_v27 }
 0x3f8   :  { %3263 = vmatpush.bf16.msrb.mxu1 %v5269_v16 }
 0x407   :  { %v7862_v25 = vpop.f32.mrf.mxu0 }
 0x40d   :  { %v7900_v49 = vpop.f32.mrf.mxu3 }
 0x40e   :  { %v2007_v33 = vadd.f32 %v7900_v49, %v8088_v14  ;;  %v5106_v49 = vld [vmem:[%s8924_s20 + $0x210] sm:$0xf0] }
 0x40f   :  { %v7914_v36 = vpop.f32.mrf.mxu0  ;;  %v5109_v53 = vor.u32 %v5850_v48, %v5106_v49 }
 0x410   :  { %v2025_v5 = vadd.f32 %v7862_v25, %v2007_v33  ;;  %v5838_v25 = vld [vmem:[%s8924_s20 + $0x1a4] sm:$0xf] }
 0x411   :  { %3252 = vmatpush.bf16.msra.mxu0 %v5109_v53  ;;  %v5061_v60 = vor.u32 %v5838_v25, %v5058_v58  ;;  %v5826_v33 = vld [vmem:[%s8924_s20 + $0x144] sm:$0xf]  ;;  %v8238_v25 = vld [vmem:[%s8926_s19] sm:$0xf] }
 0x412   :  { %v2240_v61 = vperm.slane %v8238_v25, 2 }
 0x413   :  { %3234 = vmatpush.bf16.msra.mxu3 %v5061_v60 }
 0x414   :  { %v7949_v32 = vpop.f32.mrf.mxu2 }
 0x415   :  { %v7960_v63 = vpop.f32.mrf.mxu3 }
 0x416   :  { %v2009_v59 = vadd.f32 %v7960_v63, %v8088_v14  ;;  %v4850_v63 = vld [vmem:[%s8924_s20 + $0x10] sm:$0xf0] }
 0x417   :  { %v7977_v17 = vpop.f32.mrf.mxu0  ;;  %v4853_v43 = vor.u32 %v5786_v9, %v4850_v63 }
 0x418   :  { %v7985_v23 = vpop.f32.mrf.mxu1  ;;  %v2027_v13 = vadd.f32 %v7914_v36, %v2009_v59 }
 0x419   :  { %v2043_v57 = vadd.f32 %v7985_v23, %v2025_v5  ;;  %3226 = vmatpush.bf16.msra.mxu2 %v4853_v43 }
 0x41b   :  { %v2061_v8 = vadd.f32 %v7949_v32, %v2043_v57 }
 0x41c   :  { %v8011_v40 = vpop.f32.mrf.mxu2 }
 0x41d   :  { %v8019_v45 = vpop.f32.mrf.mxu3  ;;  %v2147_v36 = vmul.f32 0.01, %v2061_v8  ;;  %vm2141_vm7 = vcmp.gt.f32.partialorder %v2061_v8, 0.0 }
 0x41e   :  { %v2012_v30 = vadd.f32 %v8019_v45, %v8088_v14  ;;  %v5013_v14 = vor.u32 %v5826_v33, %v5010_v41 }
 0x41f   :  { %v2031_v50 = vpop.f32.mrf.mxu0  ;;  %v8212_v45 = vsel %vm2141_vm7, %v2061_v8, %v2147_v36  ;;  %v5208_v36 = vld [vmem:[%s8924_s20 + $0x2c8] sm:$0xf] }
 0x420   :  { %v8042_v22 = vpop.f32.mrf.mxu1 }
 0x421   :  { %v2045_v32 = vadd.f32 %v8042_v22, %v2027_v13  ;;  %v5250_v22 = vld [vmem:[%s8924_s20 + $0x330] sm:$0xf0] }
 0x423   :  { %v2063_v39 = vadd.f32 %v8011_v40, %v2045_v32  ;;  %v5882_v40 = vld [vmem:[%s8924_s20 + $0x304] sm:$0xf] }
 0x424   :  { %v8062_v4 = vpop.f32.mrf.mxu2  ;;  %v5237_v5 = vor.u32 %v5882_v40, %v5234_v46  ;;  %v5873_v40 = vld [vmem:[%s8924_s20 + $0x2b4] sm:$0xf0] }
 0x425   :  { %v2013_v7 = vpop.f32.mrf.mxu3  ;;  %v2149_v53 = vmul.f32 0.01, %v2063_v39  ;;  %vm2143_vm9 = vcmp.gt.f32.partialorder %v2063_v39, 0.0 }
 0x426   :  { %v5834_v7 = vld [vmem:[%s8924_s20 + $0x184] sm:$0xf] }
 0x427   :  { %v8090_v15 = vpop.f32.mrf.mxu0  ;;  %v5045_v10 = vor.u32 %v5834_v7, %v5042_v44  ;;  %v8242_v0 = vsel %vm2143_vm9, %v2063_v39, %v2149_v53 }
 0x428   :  { %v8098_v24 = vpop.f32.mrf.mxu1 }
 0x429   :  { %3235 = vmatpush.bf16.msra.mxu3 %v5045_v10 }
 0x42c   :  { %v2067_v19 = vpop.f32.mrf.mxu2 }
 0x42d   :  { %v2078_v47 = vpop.f32.mrf.mxu3  ;;  %3236 = vmatpush.bf16.msra.mxu3 %v5029_v29 }
 0x42e   :  { %v2079_v23 = vadd.f32 %v2078_v47, %v8136_v35  ;;  %v2030_v47 = vadd.f32 %v7977_v17, %v2012_v30  ;;  %v4994_v17 = vld [vmem:[%s8924_s20 + $0x130] sm:$0xf0] }
 0x42f   :  { %v8138_v50 = vpop.f32.mrf.mxu0  ;;  %v4997_v57 = vor.u32 %v5822_v55, %v4994_v17  ;;  %v2241_v55 = vperm.slane %v8238_v25, 3 }
 0x430   :  { %v2049_v42 = vpop.f32.mrf.mxu1  ;;  %v2097_v21 = vadd.f32 %v8090_v15, %v2079_v23  ;;  %v5886_v15 = vld [vmem:[%s8924_s20 + $0x324] sm:$0xf]  ;;  %v4978_v23 = vld [vmem:[%s8924_s20 + $0x110] sm:$0xf0] }
 0x431   :  { %v5253_v38 = vor.u32 %v5886_v15, %v5250_v22  ;;  %v2159_v42 = vmul.f32 %v8212_v45, %v8212_v45  ;;  %3237 = vmatpush.bf16.msra.mxu3 %v5013_v14  ;;  %v5192_v14 = vld [vmem:[%s8924_s20 + $0x2a8] sm:$0xf] }
 0x432   :  { %v5193_v53 = vor.u32 %v5873_v40, %v5192_v14  ;;  %v5112_v40 = vld [vmem:[%s8924_s20 + $0x208] sm:$0xf] }
 0x433   :  { %3264 = vmatpush.bf16.msrb.mxu1 %v5253_v38 }
 0x434   :  { %v2132_v2 = vpop.f32.mrf.mxu2 }
 0x435   :  { %v2080_v6 = vpop.f32.mrf.mxu3  ;;  %3238 = vmatpush.bf16.msra.mxu3 %v4997_v57 }
 0x436   :  { %v2081_v31 = vadd.f32 %v2080_v6, %v8136_v35  ;;  %v2161_v6 = vmul.f32 %v8242_v0, %v8242_v0 }
 0x437   :  { %v8185_v20 = vpop.f32.mrf.mxu0  ;;  %3265 = vmatpush.bf16.msrb.mxu1 %v5237_v5  ;;  %v5813_v5 = vld [vmem:[%s8924_s20 + $0xd4] sm:$0xf0] }
 0x438   :  { %v2114_v62 = vpop.f32.mrf.mxu1  ;;  %v2099_v49 = vadd.f32 %v8138_v50, %v2081_v31  ;;  %v2048_v50 = vadd.f32 %v8098_v24, %v2030_v47  ;;  %v5818_v24 = vld [vmem:[%s8924_s20 + $0x104] sm:$0xf]  ;;  %v4968_v31 = vld [vmem:[%s8924_s20 + $0xe8] sm:$0xf] }
 0x439   :  { %v2115_v28 = vadd.f32 %v2114_v62, %v2097_v21  ;;  %v4981_v63 = vor.u32 %v5818_v24, %v4978_v23  ;;  %v2238_v21 = vperm.slane %v8238_v25, 0  ;;  %v5352_v24 = vld [vmem:[%s8924_s20 + $0x3e8] sm:$0xf]  ;;  %v5913_v23 = vld [vmem:[%s8924_s20 + $0x3f4] sm:$0xf0] }
 0x43a   :  { %v2066_v1 = vadd.f32 %v8062_v4, %v2048_v50  ;;  %v5224_v4 = vld [vmem:[%s8924_s20 + $0x2e8] sm:$0xf] }
 0x43b   :  { %v2133_v34 = vadd.f32 %v2132_v2, %v2115_v28  ;;  %3239 = vmatpush.bf16.msra.mxu3 %v4981_v63  ;;  %v5225_v62 = vor.u32 %v5881_v11, %v5224_v4  ;;  %v5877_v28 = vld [vmem:[%s8924_s20 + $0x2d4] sm:$0xf0]  ;;  %v4936_v50 = vld [vmem:[%s8924_s20 + $0xa8] sm:$0xf] }
 0x43c   :  { %v2134_v3 = vpop.f32.mrf.mxu2  ;;  %v2151_v12 = vmul.f32 0.01, %v2066_v1  ;;  %vm2145_vm11 = vcmp.gt.f32.partialorder %v2066_v1, 0.0  ;;  %v5209_v39 = vor.u32 %v5877_v28, %v5208_v36  ;;  %v5336_v4 = vld [vmem:[%s8924_s20 + $0x3c8] sm:$0xf] }
 0x43d   :  { %v2148_v18 = vmul.f32 0.01, %v2133_v34  ;;  %v2083_v19 = vpop.f32.mrf.mxu3  ;;  %vm2142_vm8 = vcmp.gt.f32.partialorder %v2133_v34, 0.0  ;;  %v5909_v11 = vld [vmem:[%s8924_s20 + $0x3d4] sm:$0xf0] }
 0x43e   :  { %v2084_v58 = vadd.f32 %v2083_v19, %v8136_v35  ;;  %v8273_v22 = vsel %vm2145_vm11, %v2066_v1, %v2151_v12  ;;  %v2239_v1 = vperm.slane %v8238_v25, 1  ;;  %v5861_v25 = vld [vmem:[%s8924_s20 + $0x254] sm:$0xf0]  ;;  %v5337_v36 = vor.u32 %v5909_v11, %v5336_v4  ;;  %v5128_v28 = vld [vmem:[%s8924_s20 + $0x228] sm:$0xf] }
 0x43f   :  { %v2103_v48 = vpop.f32.mrf.mxu0  ;;  %v8222_v52 = vsel %vm2142_vm8, %v2133_v34, %v2148_v18  ;;  %v5817_v34 = vld [vmem:[%s8924_s20 + $0xf4] sm:$0xf0]  ;;  %v2163_v18 = vmul.f32 %v8273_v22, %v8273_v22 }
 0x440   :  { %v2116_v51 = vpop.f32.mrf.mxu1  ;;  %v2160_v54 = vmul.f32 %v8222_v52, %v8222_v52  ;;  %v2102_v2 = vadd.f32 %v8185_v20, %v2084_v58  ;;  %v4969_v46 = vor.u32 %v5817_v34, %v4968_v31  ;;  %v5160_v58 = vld [vmem:[%s8924_s20 + $0x268] sm:$0xf]  ;;  %v5905_v31 = vld [vmem:[%s8924_s20 + $0x3b4] sm:$0xf0] }
 0x441   :  { %v2117_v56 = vadd.f32 %v2116_v51, %v2099_v49  ;;  %v4952_v49 = vld [vmem:[%s8924_s20 + $0xc8] sm:$0xf]  ;;  %v5893_v11 = vld [vmem:[%s8924_s20 + $0x354] sm:$0xf0] }
 0x442   :  { %v2165_v37 = vadd.f32 %v2160_v54, %v2159_v42  ;;  %v5176_v51 = vld [vmem:[%s8924_s20 + $0x288] sm:$0xf]  ;;  %v5869_v42 = vld [vmem:[%s8924_s20 + $0x294] sm:$0xf0]  ;;  %v4953_v17 = vor.u32 %v5813_v5, %v4952_v49 }
 0x443   :  { %v2135_v59 = vadd.f32 %v2134_v3, %v2117_v56  ;;  %v5809_v56 = vld [vmem:[%s8924_s20 + $0xb4] sm:$0xf0]  ;;  %v5177_v57 = vor.u32 %v5869_v42, %v5176_v51  ;;  %v5879_v51 = vld [vmem:[%s8924_s20 + $0x2ec] sm:$0xf]  ;;  %v5226_v42 = vld [vmem:[%s8924_s20 + $0x2f8] sm:$0xf0] }
 0x444   :  { %v2137_v60 = vpop.f32.mrf.mxu2  ;;  %2166 = vadd.xlane.f32.xlu1 %v2165_v37 }
 0x445   :  { %v2150_v9 = vmul.f32 0.01, %v2135_v59  ;;  %v2085_v35 = vpop.f32.mrf.mxu3  ;;  %vm2144_vm10 = vcmp.gt.f32.partialorder %v2135_v59, 0.0 }
 0x446   :  { %v5805_v35 = vld [vmem:[%s8924_s20 + $0x94] sm:$0xf0] }
 0x447   :  { %v2364_v43 = vpop.f32.mrf.mxu0  ;;  %v8252_v7 = vsel %vm2144_vm10, %v2135_v59, %v2150_v9  ;;  %v5865_v59 = vld [vmem:[%s8924_s20 + $0x274] sm:$0xf0]  ;;  %v4920_v9 = vld [vmem:[%s8924_s20 + $0x88] sm:$0xf] }
 0x448   :  { %v2119_v44 = vpop.f32.mrf.mxu1  ;;  %v2365_v8 = vadd.f32 %v2364_v43, %v2240_v61  ;;  %v2162_v10 = vmul.f32 %v8252_v7, %v8252_v7  ;;  %v4937_v61 = vor.u32 %v5809_v56, %v4936_v50  ;;  %v5353_v43 = vor.u32 %v5913_v23, %v5352_v24  ;;  %v4872_v56 = vld [vmem:[%s8924_s20 + $0x28] sm:$0xf]  ;;  %v5875_v24 = vld [vmem:[%s8924_s20 + $0x2cc] sm:$0xf]  ;;  %v5210_v23 = vld [vmem:[%s8924_s20 + $0x2d8] sm:$0xf0] }
 0x449   :  { %v2120_v13 = vadd.f32 %v2119_v44, %v2102_v2  ;;  %v5161_v2 = vor.u32 %v5865_v59, %v5160_v58  ;;  %v5144_v44 = vld [vmem:[%s8924_s20 + $0x248] sm:$0xf]  ;;  %v5229_v58 = vor.u32 %v5879_v51, %v5226_v42  ;;  %v5911_v51 = vld [vmem:[%s8924_s20 + $0x3ec] sm:$0xf]  ;;  %v5354_v42 = vld [vmem:[%s8924_s20 + $0x3f8] sm:$0xf0] }
 0x44a   :  { %v2383_v16 = vmax.f32 %v2365_v8, 0.0  ;;  %v2168_v20 = vadd.f32 %v2162_v10, %v2161_v6  ;;  %v4921_v10 = vor.u32 %v5805_v35, %v4920_v9  ;;  %v5288_v59 = vld [vmem:[%s8924_s20 + $0x368] sm:$0xf]  ;;  %v5837_v35 = vld [vmem:[%s8924_s20 + $0x194] sm:$0xf0] }
 0x44b   :  { %v2138_v32 = vadd.f32 %v2137_v60, %v2120_v13  ;;  %v5096_v13 = vld [vmem:[%s8924_s20 + $0x1e8] sm:$0xf] }
 0x44c   :  { %v8265_v26 = vpack.c.bf16 %v2383_v16, %v2383_v16  ;;  %v2139_v27 = vpop.f32.mrf.mxu2  ;;  %2169 = vadd.xlane.f32.xlu1 %v2168_v20  ;;  %v5849_v16 = vld [vmem:[%s8924_s20 + $0x1f4] sm:$0xf0]  ;;  %v5145_v20 = vor.u32 %v5861_v25, %v5144_v44  ;;  %v5048_v9 = vld [vmem:[%s8924_s20 + $0x188] sm:$0xf]  ;;  %v5213_v44 = vor.u32 %v5875_v24, %v5210_v23  ;;  %v5815_v25 = vld [vmem:[%s8924_s20 + $0xec] sm:$0xf] }
 0x44d   :  { %v2152_v29 = vmul.f32 0.01, %v2138_v32  ;;  %v2338_v15 = vpop.f32.mrf.mxu3  ;;  %vm2146_vm12 = vcmp.gt.f32.partialorder %v2138_v32, 0.0  ;;  %v5049_v4 = vor.u32 %v5837_v35, %v5048_v9  ;;  %v5907_v24 = vld [vmem:[%s8924_s20 + $0x3cc] sm:$0xf] }
 0x44e   :  { %v2339_v30 = vadd.f32 %v2338_v15, %v2238_v21  ;;  %3201 = vmatmul.bf16.vlgmr.msrb.gmra.mxu0 %v8265_v26  ;;  %v4904_v21 = vld [vmem:[%s8924_s20 + $0x68] sm:$0xf]  ;;  %v5097_v15 = vor.u32 %v5849_v16, %v5096_v13  ;;  %v5194_v13 = vld [vmem:[%s8924_s20 + $0x2b8] sm:$0xf0]  ;;  %v5821_v35 = vld [vmem:[%s8924_s20 + $0x114] sm:$0xf0] }
 0x44f   :  { %3297 = vmatpush.bf16.msrb.mxu0 %v5225_v62  ;;  %v2366_v38 = vpop.f32.mrf.mxu0  ;;  %v8282_v3 = vsel %vm2146_vm12, %v2138_v32, %v2152_v29  ;;  %v5801_v32 = vld [vmem:[%s8924_s20 + $0x74] sm:$0xf0]  ;;  %v5338_v23 = vld [vmem:[%s8924_s20 + $0x3d8] sm:$0xf0]  ;;  %v4984_v9 = vld [vmem:[%s8924_s20 + $0x108] sm:$0xf] }
 0x450   :  { %v2381_v33 = vmax.f32 %v2339_v30, 0.0  ;;  %v2121_v41 = vpop.f32.mrf.mxu1  ;;  %v2164_v19 = vmul.f32 %v8282_v3, %v8282_v3  ;;  %v5857_v29 = vld [vmem:[%s8924_s20 + $0x234] sm:$0xf0]  ;;  %v5320_v30 = vld [vmem:[%s8924_s20 + $0x3a8] sm:$0xf]  ;;  %v4905_v38 = vor.u32 %v5801_v32, %v4904_v21 }
 0x451   :  { %v5129_v41 = vor.u32 %v5857_v29, %v5128_v28  ;;  %v5321_v14 = vor.u32 %v5905_v31, %v5320_v30  ;;  %v5032_v21 = vld [vmem:[%s8924_s20 + $0x168] sm:$0xf]  ;;  %v5833_v32 = vld [vmem:[%s8924_s20 + $0x174] sm:$0xf0]  ;;  %v4954_v28 = vld [vmem:[%s8924_s20 + $0xd8] sm:$0xf0] }
 0x452   :  { %v8294_v47 = vpack.c.bf16 %v2381_v33, %v2381_v33  ;;  %v2171_v48 = vadd.f32 %v2164_v19, %v2163_v18  ;;  %v5845_v33 = vld [vmem:[%s8924_s20 + $0x1d4] sm:$0xf0]  ;;  %v4888_v18 = vld [vmem:[%s8924_s20 + $0x48] sm:$0xf]  ;;  %v5867_v30 = vld [vmem:[%s8924_s20 + $0x28c] sm:$0xf] }
 0x453   :  { %3298 = vmatpush.bf16.msrb.mxu0 %v5209_v39  ;;  %v5080_v39 = vld [vmem:[%s8924_s20 + $0x1c8] sm:$0xf]  ;;  %v5797_v19 = vld [vmem:[%s8924_s20 + $0x54] sm:$0xf0]  ;;  %v5178_v31 = vld [vmem:[%s8924_s20 + $0x298] sm:$0xf0] }
 0x454   :  { %2172 = vadd.xlane.f32.xlu2 %v2171_v48  ;;  %3175 = vmatmul.bf16.vlgmr.msrb.gmra.mxu2 %v8294_v47  ;;  %v5304_v48 = vld [vmem:[%s8924_s20 + $0x388] sm:$0xf]  ;;  %v5081_v5 = vor.u32 %v5845_v33, %v5080_v39 }
 0x455   :  { %3271 = vmatpush.bf16.msrb.mxu2 %v4969_v46  ;;  %v2340_v54 = vpop.f32.mrf.mxu3  ;;  %v5853_v46 = vld [vmem:[%s8924_s20 + $0x214] sm:$0xf0]  ;;  %v5256_v29 = vld [vmem:[%s8924_s20 + $0x328] sm:$0xf] }
 0x456   :  { %v4889_v54 = vor.u32 %v5797_v19, %v4888_v18  ;;  %v5113_v50 = vor.u32 %v5853_v46, %v5112_v40  ;;  %v5016_v33 = vld [vmem:[%s8924_s20 + $0x148] sm:$0xf]  ;;  %v5181_v19 = vor.u32 %v5867_v30, %v5178_v31  ;;  %v4938_v40 = vld [vmem:[%s8924_s20 + $0xb8] sm:$0xf0]  ;;  %v5899_v30 = vld [vmem:[%s8924_s20 + $0x38c] sm:$0xf] }
 0x457   :  { %3299 = vmatpush.bf16.msrb.mxu0 %v5193_v53  ;;  %v5901_v53 = vld [vmem:[%s8924_s20 + $0x394] sm:$0xf0]  ;;  %v5240_v46 = vld [vmem:[%s8924_s20 + $0x308] sm:$0xf]  ;;  %v5306_v31 = vld [vmem:[%s8924_s20 + $0x398] sm:$0xf0] }
 0x458   :  { %v2377_v37 = vpop.f32.mrf.mxu1 }
 0x459   :  { %v2378_v60 = vadd.f32 %v2377_v37, %v2241_v55  ;;  %3272 = vmatpush.bf16.msrb.mxu2 %v4953_v17  ;;  %v5064_v55 = vld [vmem:[%s8924_s20 + $0x1a8] sm:$0xf]  ;;  %v5841_v17 = vld [vmem:[%s8924_s20 + $0x1b4] sm:$0xf0]  ;;  %v5305_v37 = vor.u32 %v5901_v53, %v5304_v48 }
 0x45a   :  { %v5885_v48 = vld [vmem:[%s8924_s20 + $0x314] sm:$0xf0] }
 0x45b   :  { %v2384_v63 = vmax.f32 %v2378_v60, 0.0  ;;  %3300 = vmatpush.bf16.msrb.mxu0 %v5177_v57  ;;  %v5793_v57 = vld [vmem:[%s8924_s20 + $0x34] sm:$0xf0]  ;;  %v5065_v60 = vor.u32 %v5841_v17, %v5064_v55  ;;  %v5000_v55 = vld [vmem:[%s8924_s20 + $0x128] sm:$0xf] }
 0x45c   :  { %v5825_v17 = vld [vmem:[%s8924_s20 + $0x134] sm:$0xf0] }
 0x45d   :  { %v8341_v8 = vpack.c.bf16 %v2384_v63, %v2384_v63  ;;  %3273 = vmatpush.bf16.msrb.mxu2 %v4937_v61  ;;  %v2351_v6 = vpop.f32.mrf.mxu3  ;;  %v5897_v61 = vld [vmem:[%s8924_s20 + $0x374] sm:$0xf0]  ;;  %v4856_v63 = vld [vmem:[%s8924_s20 + $0x8] sm:$0xf] }
 0x45e   :  { %v2352_v12 = vadd.f32 %v2351_v6, %v2239_v1  ;;  %3253 = vmatmul.bf16.vlgmr.msra.gmra.mxu0 %v8265_v26  ;;  %v4873_v1 = vor.u32 %v5793_v57, %v4872_v56  ;;  %v4970_v6 = vld [vmem:[%s8924_s20 + $0xf8] sm:$0xf0]  ;;  %v5803_v57 = vld [vmem:[%s8924_s20 + $0x8c] sm:$0xf] }
 0x45f   :  { %3214 = vmatmul.bf16.vlgmr.msra.gmra.mxu1 %v8341_v8  ;;  %3301 = vmatpush.bf16.msrb.mxu0 %v5161_v2  ;;  %v5789_v2 = vld [vmem:[%s8924_s20 + $0x14] sm:$0xf0] }
 0x460   :  { %v2382_v62 = vmax.f32 %v2352_v12, 0.0  ;;  %3310 = vmatpush.bf16.msra.mxu1 %v5353_v43  ;;  %v2379_v27 = vpop.f32.mrf.mxu1  ;;  %v5289_v43 = vor.u32 %v5897_v61, %v5288_v59  ;;  %v5871_v12 = vld [vmem:[%s8924_s20 + $0x2ac] sm:$0xf]  ;;  %v4857_v16 = vor.u32 %v5789_v2, %v4856_v63  ;;  %v5001_v61 = vor.u32 %v5825_v17, %v5000_v55 }
 0x461   :  { %3274 = vmatpush.bf16.msrb.mxu2 %v4921_v10  ;;  %v5272_v10 = vld [vmem:[%s8924_s20 + $0x348] sm:$0xf]  ;;  %v5197_v27 = vor.u32 %v5871_v12, %v5194_v13  ;;  %v5859_v59 = vld [vmem:[%s8924_s20 + $0x24c] sm:$0xf]  ;;  %v5322_v13 = vld [vmem:[%s8924_s20 + $0x3b8] sm:$0xf0] }
 0x462   :  { %v8375_v34 = vpack.c.bf16 %v2382_v62, %v2382_v62  ;;  %v5273_v62 = vor.u32 %v5893_v11, %v5272_v10  ;;  %v5799_v63 = vld [vmem:[%s8924_s20 + $0x6c] sm:$0xf]  ;;  %v4985_v11 = vor.u32 %v5821_v35, %v4984_v9  ;;  %v5242_v35 = vld [vmem:[%s8924_s20 + $0x318] sm:$0xf0] }
 0x463   :  { %3302 = vmatpush.bf16.msrb.mxu0 %v5145_v20  ;;  %v4973_v20 = vor.u32 %v5815_v25, %v4970_v6  ;;  %v5098_v25 = vld [vmem:[%s8924_s20 + $0x1f8] sm:$0xf0]  ;;  %v5341_v6 = vor.u32 %v5907_v24, %v5338_v23  ;;  %v5855_v10 = vld [vmem:[%s8924_s20 + $0x22c] sm:$0xf] }
 0x464   :  { %3311 = vmatpush.bf16.msra.mxu1 %v5337_v36  ;;  %3188 = vmatmul.bf16.vlgmr.msrb.gmra.mxu3 %v8375_v34  ;;  %v5811_v36 = vld [vmem:[%s8924_s20 + $0xcc] sm:$0xf]  ;;  %v5018_v23 = vld [vmem:[%s8924_s20 + $0x158] sm:$0xf0] }
 0x465   :  { %3227 = vmatmul.bf16.vlgmr.msra.gmra.mxu2 %v8294_v47  ;;  %3284 = vmatpush.bf16.msrb.mxu3 %v5097_v15  ;;  %v2353_v49 = vpop.f32.mrf.mxu3  ;;  %v5889_v15 = vld [vmem:[%s8924_s20 + $0x334] sm:$0xf0]  ;;  %v4957_v39 = vor.u32 %v5811_v36, %v4954_v28  ;;  %v5903_v12 = vld [vmem:[%s8924_s20 + $0x3ac] sm:$0xf]  ;;  %v5082_v36 = vld [vmem:[%s8924_s20 + $0x1d8] sm:$0xf0] }
 0x466   :  { %3275 = vmatpush.bf16.msrb.mxu2 %v4905_v38  ;;  %v5033_v38 = vor.u32 %v5833_v32, %v5032_v21  ;;  %v5257_v18 = vor.u32 %v5889_v15, %v5256_v29  ;;  %v5863_v49 = vld [vmem:[%s8924_s20 + $0x26c] sm:$0xf]  ;;  %v5325_v28 = vor.u32 %v5903_v12, %v5322_v13  ;;  %v5114_v15 = vld [vmem:[%s8924_s20 + $0x218] sm:$0xf0] }
 0x467   :  { %3303 = vmatpush.bf16.msrb.mxu0 %v5129_v41  ;;  %v5829_v41 = vld [vmem:[%s8924_s20 + $0x154] sm:$0xf0]  ;;  %v5795_v21 = vld [vmem:[%s8924_s20 + $0x4c] sm:$0xf] }
 0x468   :  { %3312 = vmatpush.bf16.msra.mxu1 %v5321_v14  ;;  %v5807_v14 = vld [vmem:[%s8924_s20 + $0xac] sm:$0xf]  ;;  %v5017_v53 = vor.u32 %v5829_v41, %v5016_v33 }
 0x469   :  { %3285 = vmatpush.bf16.msrb.mxu3 %v5081_v5  ;;  %v5162_v5 = vld [vmem:[%s8924_s20 + $0x278] sm:$0xf0]  ;;  %v5851_v29 = vld [vmem:[%s8924_s20 + $0x20c] sm:$0xf] }
 0x46a   :  { %3276 = vmatpush.bf16.msrb.mxu2 %v4889_v54  ;;  %v4941_v54 = vor.u32 %v5807_v14, %v4938_v40  ;;  %v5165_v56 = vor.u32 %v5863_v49, %v5162_v5  ;;  %v5791_v33 = vld [vmem:[%s8924_s20 + $0x2c] sm:$0xf]  ;;  %v5117_v41 = vor.u32 %v5851_v29, %v5114_v15  ;;  %v5066_v14 = vld [vmem:[%s8924_s20 + $0x1b8] sm:$0xf0]  ;;  %v5309_v40 = vor.u32 %v5899_v30, %v5306_v31  ;;  %v5914_v30 = vld [vmem:[%s8927_s22] sm:$0xff] }
 0x46b   :  { %3304 = vmatpush.bf16.msrb.mxu0 %v5113_v50  ;;  %v5241_v50 = vor.u32 %v5885_v48, %v5240_v46  ;;  %v5895_v46 = vld [vmem:[%s8924_s20 + $0x36c] sm:$0xf]  ;;  %v5290_v48 = vld [vmem:[%s8924_s20 + $0x378] sm:$0xf0]  ;;  %v5926_v31 = vld [vmem:[%s8927_s22 + $0x60] sm:$0xff] }
 0x46c   :  { %3313 = vmatpush.bf16.msra.mxu1 %v5305_v37  ;;  %v4922_v37 = vld [vmem:[%s8924_s20 + $0x98] sm:$0xf0]  ;;  %v5293_v55 = vor.u32 %v5895_v46, %v5290_v48  ;;  %v5891_v17 = vld [vmem:[%s8924_s20 + $0x34c] sm:$0xf] }
 0x46d   :  { %3286 = vmatpush.bf16.msrb.mxu3 %v5065_v60  ;;  %v5146_v60 = vld [vmem:[%s8924_s20 + $0x258] sm:$0xf0]  ;;  %v5827_v24 = vld [vmem:[%s8924_s20 + $0x14c] sm:$0xf] }
 0x46e   :  { %3277 = vmatpush.bf16.msrb.mxu2 %v4873_v1  ;;  %3305 = vmatmul.bf16.vlgmr.msrb.gmra.mxu0 %v8265_v26  ;;  %v4925_v1 = vor.u32 %v5803_v57, %v4922_v37  ;;  %v5149_v2 = vor.u32 %v5859_v59, %v5146_v60  ;;  %v5831_v37 = vld [vmem:[%s8924_s20 + $0x16c] sm:$0xf] }
 0x46f   :  { %3349 = vmatpush.bf16.msra.mxu0 %v5229_v58  ;;  %3266 = vmatmul.bf16.vlgmr.msrb.gmra.mxu1 %v8341_v8  ;;  %v5357_v58 = vor.u32 %v5911_v51, %v5354_v42  ;;  %v4858_v51 = vld [vmem:[%s8924_s20 + $0x18] sm:$0xf0]  ;;  %v5835_v42 = vld [vmem:[%s8924_s20 + $0x18c] sm:$0xf] }
 0x470   :  { %3314 = vmatpush.bf16.msra.mxu1 %v5289_v43  ;;  %v4906_v43 = vld [vmem:[%s8924_s20 + $0x78] sm:$0xf0]  ;;  %v5887_v60 = vld [vmem:[%s8924_s20 + $0x32c] sm:$0xf] }
 0x471   :  { %3287 = vmatpush.bf16.msrb.mxu3 %v5049_v4  ;;  %v5130_v4 = vld [vmem:[%s8924_s20 + $0x238] sm:$0xf0]  ;;  %v5883_v9 = vld [vmem:[%s8924_s20 + $0x30c] sm:$0xf] }
 0x472   :  { %3278 = vmatpush.bf16.msrb.mxu2 %v4857_v16  ;;  %v4909_v16 = vor.u32 %v5799_v63, %v4906_v43  ;;  %v5133_v32 = vor.u32 %v5855_v10, %v5130_v4  ;;  %v5021_v63 = vor.u32 %v5827_v24, %v5018_v23  ;;  %v5002_v43 = vld [vmem:[%s8924_s20 + $0x138] sm:$0xf0]  ;;  %v5919_v12 = vld [vmem:[%s8927_s22 + $0x28] sm:$0xff] }
 0x473   :  { %3350 = vmatpush.bf16.msra.mxu0 %v5213_v44  ;;  %v5847_v44 = vld [vmem:[%s8924_s20 + $0x1ec] sm:$0xf]  ;;  %v5921_v4 = vld [vmem:[%s8927_s22 + $0x38] sm:$0xff] }
 0x474   :  { %3315 = vmatpush.bf16.msra.mxu1 %v5273_v62  ;;  %3240 = vmatmul.bf16.vlgmr.msra.gmra.mxu3 %v8375_v34  ;;  %v4890_v62 = vld [vmem:[%s8924_s20 + $0x58] sm:$0xf0] }
 0x475   :  { %3279 = vmatmul.bf16.vlgmr.msrb.gmra.mxu2 %v8294_v47  ;;  %3288 = vmatpush.bf16.msrb.mxu3 %v5033_v38  ;;  %v4893_v38 = vor.u32 %v5795_v21, %v4890_v62  ;;  %v5916_v21 = vld [vmem:[%s8927_s22 + $0x10] sm:$0xff]  ;;  %v5915_v62 = vld [vmem:[%s8927_s22 + $0x8] sm:$0xff] }
 0x476   :  { %3323 = vmatpush.bf16.msra.mxu2 %v4973_v20  ;;  %v5101_v20 = vor.u32 %v5847_v44, %v5098_v25  ;;  %v5819_v25 = vld [vmem:[%s8924_s20 + $0x10c] sm:$0xf] }
 0x477   :  { %3351 = vmatpush.bf16.msra.mxu0 %v5197_v27  ;;  %v5843_v27 = vld [vmem:[%s8924_s20 + $0x1cc] sm:$0xf] }
 0x478   :  { %3316 = vmatpush.bf16.msra.mxu1 %v5257_v18  ;;  %v4874_v18 = vld [vmem:[%s8924_s20 + $0x38] sm:$0xf0] }
 0x479   :  { %3289 = vmatpush.bf16.msrb.mxu3 %v5017_v53  ;;  %v4877_v49 = vor.u32 %v5791_v33, %v4874_v18  ;;  %v5787_v53 = vld [vmem:[%s8924_s20 + $0xc] sm:$0xf] }
 0x47a   :  { %3324 = vmatpush.bf16.msra.mxu2 %v4957_v39  ;;  %v5085_v39 = vor.u32 %v5843_v27, %v5082_v36  ;;  %v5927_v27 = vld [vmem:[%s8927_s22 + $0x68] sm:$0xff] }
 0x47b   :  { %3352 = vmatpush.bf16.msra.mxu0 %v5181_v19  ;;  %v5839_v19 = vld [vmem:[%s8924_s20 + $0x1ac] sm:$0xf] }
 0x47c   :  { %3317 = vmatpush.bf16.msra.mxu1 %v5241_v50  ;;  %v5069_v5 = vor.u32 %v5839_v19, %v5066_v14  ;;  %v5274_v50 = vld [vmem:[%s8924_s20 + $0x358] sm:$0xf0] }
 0x47d   :  { %3290 = vmatpush.bf16.msrb.mxu3 %v5001_v61  ;;  %v5277_v59 = vor.u32 %v5891_v17, %v5274_v50  ;;  %v5258_v61 = vld [vmem:[%s8924_s20 + $0x338] sm:$0xf0]  ;;  %v5951_v50 = vld [vmem:[%s8929_s24 + $0x28] sm:$0xff] }
 0x47e   :  { %3325 = vmatpush.bf16.msra.mxu2 %v4941_v54  ;;  %v5050_v54 = vld [vmem:[%s8924_s20 + $0x198] sm:$0xf0] }
 0x47f   :  { %3353 = vmatpush.bf16.msra.mxu0 %v5165_v56  ;;  %3318 = vmatmul.bf16.vlgmr.msra.gmra.mxu1 %v8341_v8  ;;  %v4861_v56 = vor.u32 %v5787_v53, %v4858_v51  ;;  %v5053_v57 = vor.u32 %v5835_v42, %v5050_v54 }
 0x480   :  { %3362 = vmatpush.bf16.msrb.mxu1 %v5357_v58  ;;  %v5034_v58 = vld [vmem:[%s8924_s20 + $0x178] sm:$0xf0] }
 0x481   :  { %3291 = vmatpush.bf16.msrb.mxu3 %v4985_v11  ;;  %v5920_v11 = vld [vmem:[%s8927_s22 + $0x30] sm:$0xff] }
 0x482   :  { %3326 = vmatpush.bf16.msra.mxu2 %v4925_v1  ;;  %v5261_v1 = vor.u32 %v5887_v60, %v5258_v61 }
 0x483   :  { %3354 = vmatpush.bf16.msra.mxu0 %v5149_v2  ;;  %v5823_v2 = vld [vmem:[%s8924_s20 + $0x12c] sm:$0xf] }
 0x484   :  { %3363 = vmatpush.bf16.msrb.mxu1 %v5341_v6  ;;  %3292 = vmatmul.bf16.vlgmr.msrb.gmra.mxu3 %v8375_v34  ;;  %v5005_v44 = vor.u32 %v5823_v2, %v5002_v43  ;;  %v4986_v6 = vld [vmem:[%s8924_s20 + $0x118] sm:$0xf0]  ;;  %v5936_v43 = vld [vmem:[%s8927_s22 + $0xb0] sm:$0xff] }
 0x485   :  { %3336 = vmatpush.bf16.msra.mxu3 %v5101_v20  ;;  %v4989_v10 = vor.u32 %v5819_v25, %v4986_v6  ;;  %v5929_v20 = vld [vmem:[%s8927_s22 + $0x78] sm:$0xff] }
 0x486   :  { %3327 = vmatpush.bf16.msra.mxu2 %v4909_v16  ;;  %v5917_v16 = vld [vmem:[%s8927_s22 + $0x18] sm:$0xff] }
 0x487   :  { %3355 = vmatpush.bf16.msra.mxu0 %v5133_v32  ;;  %v5928_v32 = vld [vmem:[%s8927_s22 + $0x70] sm:$0xff] }
 0x488   :  { %3364 = vmatpush.bf16.msrb.mxu1 %v5325_v28 }
 0x489   :  { %3337 = vmatpush.bf16.msra.mxu3 %v5085_v39  ;;  %v5953_v39 = vld [vmem:[%s8929_s24 + $0x38] sm:$0xff] }
 0x48a   :  { %3328 = vmatpush.bf16.msra.mxu2 %v4893_v38 }
 0x48b   :  { %3356 = vmatpush.bf16.msra.mxu0 %v5117_v41  ;;  %v5925_v41 = vld [vmem:[%s8927_s22 + $0x58] sm:$0xff] }
 0x48c   :  { %3365 = vmatpush.bf16.msrb.mxu1 %v5309_v40 }
 0x48d   :  { %3338 = vmatpush.bf16.msra.mxu3 %v5069_v5 }
 0x48e   :  { %3329 = vmatpush.bf16.msra.mxu2 %v4877_v49  ;;  %3357 = vmatmul.bf16.vlgmr.msra.gmra.mxu0 %v8265_v26  ;;  %v5037_v26 = vor.u32 %v5831_v37, %v5034_v58  ;;  %v5952_v49 = vld [vmem:[%s8929_s24 + $0x30] sm:$0xff] }
 0x490   :  { %3366 = vmatpush.bf16.msrb.mxu1 %v5293_v55  ;;  %v5924_v55 = vld [vmem:[%s8927_s22 + $0x50] sm:$0xff] }
 0x491   :  { %3339 = vmatpush.bf16.msra.mxu3 %v5053_v57  ;;  %v5950_v57 = vld [vmem:[%s8929_s24 + $0x20] sm:$0xff] }
 0x492   :  { %3330 = vmatpush.bf16.msra.mxu2 %v4861_v56  ;;  %v5923_v56 = vld [vmem:[%s8927_s22 + $0x48] sm:$0xff] }
 0x494   :  { %3367 = vmatpush.bf16.msrb.mxu1 %v5277_v59  ;;  %v5922_v59 = vld [vmem:[%s8927_s22 + $0x40] sm:$0xff] }
 0x495   :  { %3331 = vmatmul.bf16.vlgmr.msra.gmra.mxu2 %v8294_v47  ;;  %3340 = vmatpush.bf16.msra.mxu3 %v5037_v26  ;;  %v5245_v47 = vor.u32 %v5883_v9, %v5242_v35  ;;  %v5949_v9 = vld [vmem:[%s8929_s24 + $0x18] sm:$0xff] }
 0x496   :  { %3643 = vmatpush.bf16.msrb.mxu2 %v5921_v4  ;;  %v5961_v35 = vld [vmem:[%s8929_s24 + $0x78] sm:$0xff] }
 0x498   :  { %3368 = vmatpush.bf16.msrb.mxu1 %v5261_v1  ;;  %v5937_v1 = vld [vmem:[%s8927_s22 + $0xb8] sm:$0xff] }
 0x499   :  { %3341 = vmatpush.bf16.msra.mxu3 %v5021_v63  ;;  %3669 = vmatpush.bf16.msrb.mxu0 %v5937_v1 }
 0x49a   :  { %3644 = vmatpush.bf16.msrb.mxu2 %v5920_v11 }
 0x49c   :  { %3369 = vmatpush.bf16.msrb.mxu1 %v5245_v47  ;;  %v5948_v47 = vld [vmem:[%s8929_s24 + $0x10] sm:$0xff] }
 0x49d   :  { %3342 = vmatpush.bf16.msra.mxu3 %v5005_v44  ;;  %v5960_v44 = vld [vmem:[%s8929_s24 + $0x70] sm:$0xff]  ;;  %3670 = vmatpush.bf16.msrb.mxu0 %v5936_v43 }
 0x49e   :  { %3645 = vmatpush.bf16.msrb.mxu2 %v5919_v12  ;;  %v5935_v12 = vld [vmem:[%s8927_s22 + $0xa8] sm:$0xff] }
 0x49f   :  { %3370 = vmatmul.bf16.vlgmr.msrb.gmra.mxu1 %v8341_v8  ;;  %v5918_v8 = vld [vmem:[%s8927_s22 + $0x20] sm:$0xff] }
 0x4a1   :  { %3343 = vmatpush.bf16.msra.mxu3 %v4989_v10  ;;  %3671 = vmatpush.bf16.msrb.mxu0 %v5935_v12 }
 0x4a2   :  { %3646 = vmatpush.bf16.msrb.mxu2 %v5918_v8  ;;  %v5947_v8 = vld [vmem:[%s8929_s24 + $0x8] sm:$0xff] }
 0x4a4   :  { %3344 = vmatmul.bf16.vlgmr.msra.gmra.mxu3 %v8375_v34 }
 0x4a5   :  { %3656 = vmatpush.bf16.msrb.mxu3 %v5929_v20  ;;  %v5958_v20 = vld [vmem:[%s8929_s24 + $0x60] sm:$0xff] }
 0x4a6   :  { %3647 = vmatpush.bf16.msrb.mxu2 %v5917_v16  ;;  %v5946_v16 = vld [vmem:[%s8929_s24] sm:$0xff] }
 0x4a9   :  { %3657 = vmatpush.bf16.msrb.mxu3 %v5928_v32 }
 0x4aa   :  { %3648 = vmatpush.bf16.msrb.mxu2 %v5916_v21 }
 0x4ad   :  { %3658 = vmatpush.bf16.msrb.mxu3 %v5927_v27  ;;  %v5933_v27 = vld [vmem:[%s8927_s22 + $0x98] sm:$0xff] }
 0x4ae   :  { %3649 = vmatpush.bf16.msrb.mxu2 %v5915_v62 }
 0x4b1   :  { %3659 = vmatpush.bf16.msrb.mxu3 %v5926_v31  ;;  %v5932_v31 = vld [vmem:[%s8927_s22 + $0x90] sm:$0xff] }
 0x4b2   :  { %3650 = vmatpush.bf16.msrb.mxu2 %v5914_v30 }
 0x4b5   :  { %3660 = vmatpush.bf16.msrb.mxu3 %v5925_v41 }
 0x4b6   :  { %3828 = vmatpush.bf16.msra.mxu2 %v5953_v39 }
 0x4b7   :  { %v2167_v34 = vpop.xlane.xlu1 %2166 }
 0x4b8   :  { %v2174_v13 = vmax.f32 %v2167_v34, 1e-24  ;;  %v5959_v34 = vld [vmem:[%s8929_s24 + $0x68] sm:$0xff] }
 0x4b9   :  { %3661 = vmatpush.bf16.msrb.mxu3 %v5924_v55 }
 0x4ba   :  { %5969 = vrsqrt.f32 %v2174_v13  ;;  %vm2183_vm14 = vweird.f32 %v2174_v13  ;;  %3829 = vmatpush.bf16.msra.mxu2 %v5952_v49 }
 0x4bd   :  { %3662 = vmatpush.bf16.msrb.mxu3 %v5923_v56 }
 0x4be   :  { %3830 = vmatpush.bf16.msra.mxu2 %v5951_v50 }
 0x4bf   :  { %v2170_v36 = vpop.xlane.xlu1 %2169 }
 0x4c0   :  { %v5970_v28 = vpop.eup %5969  ;;  %v2175_v29 = vmax.f32 %v2170_v36, 1e-24  ;;  %v5957_v36 = vld [vmem:[%s8929_s24 + $0x58] sm:$0xff] }
 0x4c1   :  { %v2178_v15 = vmul.f32 %v5970_v28, %v2174_v13  ;;  %vm2184_vm13 = vweird.f32 %v5970_v28  ;;  %3663 = vmatpush.bf16.msrb.mxu3 %v5922_v59  ;;  %v5934_v13 = vld [vmem:[%s8927_s22 + $0xa0] sm:$0xff] }
 0x4c2   :  { %5971 = vrsqrt.f32 %v2175_v29  ;;  %vm2185_vm15 = vmor %vm2183_vm14, %vm2184_vm13  ;;  %vm2193_vm3 = vweird.f32 %v2175_v29  ;;  %3831 = vmatpush.bf16.msra.mxu2 %v5950_v57  ;;  %3672 = vmatpush.bf16.msrb.mxu0 %v5934_v13 }
 0x4c3   :  { %v2179_v38 = vmul.f32 %v5970_v28, %v2178_v15 }
 0x4c5   :  { %v2180_v33 = vmul.f32 0.5, %v2179_v38  ;;  %3846 = vmatpush.bf16.msra.mxu3 %v5961_v35  ;;  %v5956_v38 = vld [vmem:[%s8929_s24 + $0x50] sm:$0xff] }
 0x4c6   :  { %3832 = vmatpush.bf16.msra.mxu2 %v5949_v9  ;;  %3673 = vmatpush.bf16.msrb.mxu0 %v5933_v27 }
 0x4c7   :  { %v2181_v18 = vsub.f32 1.5, %v2180_v33  ;;  %v2173_v19 = vpop.xlane.xlu2 %2172 }
 0x4c8   :  { %v5972_v14 = vpop.eup %5971  ;;  %v2176_v40 = vmax.f32 %v2173_v19, 1e-24  ;;  %v5931_v19 = vld [vmem:[%s8927_s22 + $0x88] sm:$0xff] }
 0x4c9   :  { %v2182_v46 = vmul.f32 %v5970_v28, %v2181_v18  ;;  %v2188_v48 = vmul.f32 %v5972_v14, %v2175_v29  ;;  %vm2194_vm2 = vweird.f32 %v5972_v14  ;;  %3847 = vmatpush.bf16.msra.mxu3 %v5960_v44 }
 0x4ca   :  { %5973 = vrsqrt.f32 %v2176_v40  ;;  %vm2195_vm4 = vmor %vm2193_vm3, %vm2194_vm2  ;;  %vm2203_vm6 = vweird.f32 %v2176_v40  ;;  %3833 = vmatpush.bf16.msra.mxu2 %v5948_v47  ;;  %3674 = vmatpush.bf16.msrb.mxu0 %v5932_v31  ;;  %v5940_v47 = vld [vmem:[%s8927_s22 + $0xd0] sm:$0xff] }
 0x4cb   :  { %v2186_v5 = vsel %vm2185_vm15, %v5970_v28, %v2182_v46  ;;  %v2189_v53 = vmul.f32 %v5972_v14, %v2188_v48  ;;  %v8722_v51 = vpop.f32.mrf.mxu0 }
 0x4cc   :  { %v8725_v42 = vmul.f32 %v2186_v5, %v8212_v45  ;;  %v8728_v54 = vmul.f32 %v2186_v5, %v8222_v52  ;;  %v5930_v5 = vld [vmem:[%s8927_s22 + $0x80] sm:$0xff] }
 0x4cd   :  { %v2190_v17 = vmul.f32 0.5, %v2189_v53  ;;  %3848 = vmatpush.bf16.msra.mxu3 %v5959_v34  ;;  %v5945_v53 = vld [vmem:[%s8927_s22 + $0xf8] sm:$0xff] }
 0x4ce   :  { %2213 = vst [vmem:[%s8930_s26] sm:$0xff] %v8725_v42  ;;  %3834 = vmatpush.bf16.msra.mxu2 %v5947_v8  ;;  %3675 = vmatpush.bf16.msrb.mxu0 %v5931_v19  ;;  %v5938_v8 = vld [vmem:[%s8927_s22 + $0xc0] sm:$0xff] }
 0x4cf   :  { %2214 = vst [vmem:[%s8930_s26 + $0x8] sm:$0xff] %v8728_v54  ;;  %v2191_v45 = vsub.f32 1.5, %v2190_v17  ;;  %3682 = vmatpush.bf16.msra.mxu1 %v5945_v53 }
 0x4d0   :  { %v5974_v52 = vpop.eup %5973 }
 0x4d1   :  { %v2192_v37 = vmul.f32 %v5972_v14, %v2191_v45  ;;  %v2198_v58 = vmul.f32 %v5974_v52, %v2176_v40  ;;  %vm2204_vm5 = vweird.f32 %v5974_v52  ;;  %3849 = vmatpush.bf16.msra.mxu3 %v5958_v20  ;;  %v5944_v45 = vld [vmem:[%s8927_s22 + $0xf0] sm:$0xff] }
 0x4d2   :  { %vm2205_vm7 = vmor %vm2203_vm6, %vm2204_vm5  ;;  %3835 = vmatpush.bf16.msra.mxu2 %v5946_v16  ;;  %3676 = vmatpush.bf16.msrb.mxu0 %v5930_v5 }
 0x4d3   :  { %v2196_v60 = vsel %vm2195_vm4, %v5972_v14, %v2192_v37  ;;  %v2199_v61 = vmul.f32 %v5974_v52, %v2198_v58  ;;  %v3204_v26 = vpop.f32.mrf.mxu0  ;;  %v5955_v14 = vld [vmem:[%s8929_s24 + $0x48] sm:$0xff]  ;;  %3683 = vmatpush.bf16.msra.mxu1 %v5944_v45 }
 0x4d4   :  { %v8754_v24 = vmul.f32 %v2196_v60, %v8242_v0  ;;  %v8757_v23 = vmul.f32 %v2196_v60, %v8252_v7  ;;  %v5943_v58 = vld [vmem:[%s8927_s22 + $0xe8] sm:$0xff]  ;;  %v5942_v26 = vld [vmem:[%s8927_s22 + $0xe0] sm:$0xff] }
 0x4d5   :  { %v2200_v63 = vmul.f32 0.5, %v2199_v61  ;;  %3850 = vmatpush.bf16.msra.mxu3 %v5957_v36 }
 0x4d6   :  { %2215 = vst [vmem:[%s8930_s26 + $0x10] sm:$0xff] %v8754_v24  ;;  %v3696_v9 = vpack.c.bf16 %v8754_v24, %v8725_v42  ;;  %v3697_v16 = vpack.c.bf16 %v8757_v23, %v8728_v54 }
 0x4d7   :  { %2216 = vst [vmem:[%s8930_s26 + $0x18] sm:$0xff] %v8757_v23  ;;  %v2201_v0 = vsub.f32 1.5, %v2200_v63  ;;  %v3176_v7 = vpop.f32.mrf.mxu2  ;;  %3684 = vmatpush.bf16.msra.mxu1 %v5943_v58 }
 0x4d9   :  { %v2202_v2 = vmul.f32 %v5974_v52, %v2201_v0  ;;  %3851 = vmatpush.bf16.msra.mxu3 %v5956_v38 }
 0x4db   :  { %v8785_v25 = vpop.f32.mrf.mxu0  ;;  %v2206_v6 = vsel %vm2205_vm7, %v5974_v52, %v2202_v2  ;;  %3685 = vmatpush.bf16.msra.mxu1 %v5942_v26 }
 0x4dc   :  { %v3215_v10 = vpop.f32.mrf.mxu1  ;;  %v8788_v4 = vmul.f32 %v2206_v6, %v8273_v22  ;;  %v8791_v11 = vmul.f32 %v2206_v6, %v8282_v3  ;;  %v8809_v22 = vld [vmem:[%s8931_s21] sm:$0xf]  ;;  %v5939_v6 = vld [vmem:[%s8927_s22 + $0xc8] sm:$0xff] }
 0x4dd   :  { %v2519_v21 = vperm.slane %v8809_v22, 0  ;;  %3852 = vmatpush.bf16.msra.mxu3 %v5955_v14  ;;  %v2520_v55 = vperm.slane %v8809_v22, 1  ;;  %v2521_v2 = vperm.slane %v8809_v22, 2  ;;  %v2522_v36 = vperm.slane %v8809_v22, 3 }
 0x4de   :  { %2217 = vst [vmem:[%s8930_s26 + $0x20] sm:$0xff] %v8788_v4  ;;  %v3698_v13 = vpack.c.bf16 %v8788_v4, %v8788_v4 }
 0x4df   :  { %v3178_v3 = vpop.f32.mrf.mxu2  ;;  %2218 = vst [vmem:[%s8930_s26 + $0x28] sm:$0xff] %v8791_v11  ;;  %v3177_v28 = vadd.f32 %v3176_v7, %v2519_v21  ;;  %v5941_v7 = vld [vmem:[%s8927_s22 + $0xd8] sm:$0xff] }
 0x4e0   :  { %3686 = vmatpush.bf16.msra.mxu1 %v5941_v7 }
 0x4e3   :  { %v3256_v32 = vpop.f32.mrf.mxu0 }
 0x4e4   :  { %v3217_v62 = vpop.f32.mrf.mxu1  ;;  %3687 = vmatpush.bf16.msra.mxu1 %v5940_v47 }
 0x4e7   :  { %v3189_v29 = vpop.f32.mrf.mxu3 }
 0x4e8   :  { %v3190_v15 = vadd.f32 %v3189_v29, %v3177_v28  ;;  %v3228_v30 = vpop.f32.mrf.mxu2  ;;  %3688 = vmatpush.bf16.msra.mxu1 %v5939_v6  ;;  %v3699_v29 = vpack.c.bf16 %v8791_v11, %v8791_v11 }
 0x4e9   :  { %v3229_v52 = vadd.f32 %v3228_v30, %v2520_v55  ;;  %v5964_v55 = vld [vmem:[%s8928_s23] ss:$0 sm:$0xff] }
 0x4ea   :  { %v3203_v39 = vadd.f32 %v8722_v51, %v3190_v15  ;;  %v5954_v51 = vld [vmem:[%s8929_s24 + $0x40] sm:$0xff] }
 0x4eb   :  { %v3306_v33 = vpop.f32.mrf.mxu0  ;;  %3853 = vmatpush.bf16.msra.mxu3 %v5954_v51 }
 0x4ec   :  { %v3216_v41 = vadd.f32 %v3215_v10, %v3203_v39  ;;  %v3267_v18 = vpop.f32.mrf.mxu1  ;;  %3689 = vmatpush.bf16.msra.mxu1 %v5938_v8 }
 0x4ee   :  { %v3375_v40 = vmax.f32 %v3216_v41, 0.0 }
 0x4ef   :  { %v3191_v46 = vpop.f32.mrf.mxu3 }
 0x4f0   :  { %v3379_v48 = vpack.c.bf16 %v3375_v40, %v3375_v40  ;;  %v3230_v49 = vpop.f32.mrf.mxu2 }
 0x4f2   :  { %3651 = vmatmul.bf16.vlgmr.msrb.gmra.mxu2 %v3379_v48 }
 0x4f3   :  { %v3308_v17 = vpop.f32.mrf.mxu0 }
 0x4f4   :  { %v3269_v50 = vpop.f32.mrf.mxu1 }
 0x4f7   :  { %v3241_v56 = vpop.f32.mrf.mxu3 }
 0x4f8   :  { %v3280_v57 = vpop.f32.mrf.mxu2  ;;  %v3242_v37 = vadd.f32 %v3241_v56, %v3229_v52 }
 0x4f9   :  { %v3281_v44 = vadd.f32 %v3280_v57, %v2521_v2 }
 0x4fa   :  { %v3255_v59 = vadd.f32 %v8785_v25, %v3242_v37 }
 0x4fc   :  { %v3319_v60 = vpop.f32.mrf.mxu1  ;;  %v3268_v61 = vadd.f32 %v3267_v18, %v3255_v59 }
 0x4fe   :  { %v3376_v1 = vmax.f32 %v3268_v61, 0.0 }
 0x4ff   :  { %v3243_v35 = vpop.f32.mrf.mxu3 }
 0x500   :  { %v3282_v63 = vpop.f32.mrf.mxu2  ;;  %v3380_v0 = vpack.c.bf16 %v3376_v1, %v3376_v1 }
 0x502   :  { %3836 = vmatmul.bf16.vlgmr.msra.gmra.mxu2 %v3696_v9  ;;  %3664 = vmatmul.bf16.vlgmr.msrb.gmra.mxu3 %v3380_v0 }
 0x504   :  { %v3321_v43 = vpop.f32.mrf.mxu1 }
 0x507   :  { %v3293_v42 = vpop.f32.mrf.mxu3 }
 0x508   :  { %v3294_v24 = vadd.f32 %v3293_v42, %v3281_v44 }
 0x50a   :  { %v3307_v10 = vadd.f32 %v3306_v33, %v3294_v24 }
 0x50b   :  { %v3358_v25 = vpop.f32.mrf.mxu0 }
 0x50c   :  { %v3320_v12 = vadd.f32 %v3319_v60, %v3307_v10 }
 0x50e   :  { %v3377_v34 = vmax.f32 %v3320_v12, 0.0 }
 0x50f   :  { %v3295_v3 = vpop.f32.mrf.mxu3 }
 0x510   :  { %v3381_v20 = vpack.c.bf16 %v3377_v34, %v3377_v34 }
 0x512   :  { %3841 = vmatmul.bf16.gmra.mxu2 %v3698_v13  ;;  %3677 = vmatmul.bf16.vlgmr.msrb.gmra.mxu0 %v3381_v20 }
 0x513   :  { %v3360_v21 = vpop.f32.mrf.mxu0  ;;  %3854 = vmatmul.bf16.vlgmr.msra.gmra.mxu3 %v3697_v16 }
 0x518   :  { %v3332_v32 = vpop.f32.mrf.mxu2 }
 0x519   :  { %v3333_v15 = vadd.f32 %v3332_v32, %v2522_v36 }
 0x51c   :  { %v3371_v62 = vpop.f32.mrf.mxu1 }
 0x520   :  { %v3334_v27 = vpop.f32.mrf.mxu2 }
 0x523   :  { %3859 = vmatmul.bf16.gmra.mxu3 %v3699_v29 }
 0x524   :  { %v3373_v28 = vpop.f32.mrf.mxu1 }
 0x527   :  { %v3345_v4 = vpop.f32.mrf.mxu3 }
 0x528   :  { %v3346_v30 = vadd.f32 %v3345_v4, %v3333_v15 }
 0x52a   :  { %v3359_v31 = vadd.f32 %v3358_v25, %v3346_v30 }
 0x52c   :  { %v3372_v54 = vadd.f32 %v3371_v62, %v3359_v31 }
 0x52e   :  { %v3378_v23 = vmax.f32 %v3372_v54, 0.0 }
 0x52f   :  { %v3347_v38 = vpop.f32.mrf.mxu3 }
 0x530   :  { %v3382_v39 = vpack.c.bf16 %v3378_v23, %v3378_v23 }
 0x532   :  { %3690 = vmatmul.bf16.vlgmr.msra.gmra.mxu1 %v3382_v39 }
 0x575   :  { %v3652_v33 = vpop.f32.mrf.mxu2 }
 0x576   :  { %v3653_v45 = vadd.f32 %v5964_v55, %v3652_v33 }
 0x57d   :  { %v3654_v41 = vpop.f32.mrf.mxu2 }
 0x585   :  { %v3837_v18 = vpop.f32.mrf.mxu2  ;;  %v3665_v19 = vpop.f32.mrf.mxu3 }
 0x586   :  { %v3666_v52 = vadd.f32 %v3665_v19, %v3653_v45 }
 0x58d   :  { %v3839_v14 = vpop.f32.mrf.mxu2  ;;  %v3667_v22 = vpop.f32.mrf.mxu3 }
 0x58f   :  { %v3678_v40 = vpop.f32.mrf.mxu0 }
 0x590   :  { %v3679_v56 = vadd.f32 %v3678_v40, %v3666_v52 }
 0x595   :  { %v3842_v46 = vpop.f32.mrf.mxu2 }
 0x596   :  { %v3855_v48 = vpop.f32.mrf.mxu3 }
 0x597   :  { %v3856_v11 = vadd.f32 %v3855_v48, %v3837_v18  ;;  %v3680_v49 = vpop.f32.mrf.mxu0 }
 0x599   :  { %3864 = vst.msk [vmem:[%s8932_s28] sm:$0xff] %vm1245_vm1, %v3856_v11 }
 0x59d   :  { %v3844_v5 = vpop.f32.mrf.mxu2 }
 0x59e   :  { %v3857_v53 = vpop.f32.mrf.mxu3 }
 0x59f   :  { %v3858_v51 = vadd.f32 %v3857_v53, %v3839_v14 }
 0x5a1   :  { %3865 = vst.msk [vmem:[%s8932_s28 + $0x8] sm:$0xff] %vm1245_vm1, %v3858_v51 }
 0x5a6   :  { %v3860_v17 = vpop.f32.mrf.mxu3 }
 0x5a7   :  { %v3861_v50 = vadd.f32 %v3860_v17, %v3842_v46 }
 0x5a9   :  { %3866 = vst.msk [vmem:[%s8932_s28 + $0x10] sm:$0xff] %vm1245_vm1, %v3861_v50 }
 0x5ae   :  { %v3862_v58 = vpop.f32.mrf.mxu3 }
 0x5af   :  { %v3691_v57 = vpop.f32.mrf.mxu1 }
 0x5b0   :  { %v3692_v37 = vadd.f32 %v3691_v57, %v3679_v56 }
 0x5b2   :  { %3695 = vst.msk [vmem:[%s8933_s27] sm:$0xff] %vm118_vm0, %v3692_v37 }
 0x5b7   :  { %v3693_v59 = vpop.f32.mrf.mxu1 }

</bundles_post_ra>
